<compile_context>
chip_gen: v7x
topology: tpu7x:2x2x1
jax: 0.10.0
libtpu: 0.0.40
codegen_flags: <defaults>
</compile_context>

<pallas_src>
import math

import jax
import jax.numpy as jnp
from jax import lax
from jax.experimental import pallas as pl
from jax.experimental.pallas import tpu as pltpu

KERNEL = 5          # conv kernel_size = (5, 5)
BASE_CH = 15        # base_channels
NEG_SLOPE = 0.3     # LeakyReLU negative slope
BN_EPS = 1e-5


def _leaky(x):
    return jnp.where(x > 0, x, NEG_SLOPE * x)


# ----------------------------- Pallas kernel --------------------------------

def _conv_layer(in_ref, out_ref, w_ref, b_ref):
    """VALID 5x5 conv + bias + LeakyReLU as 5 whole-plane slab matmuls.

    in_ref : [h_in,  w_in*c_in]   activation (channel-fastest along lanes)
    out_ref: [h_out, w_out*c_out]
    w_ref  : [5, w_in*c_in, w_out*c_out]  per-dy banded weight matrices
    b_ref  : [1, w_out*c_out]             channel bias tiled across w
    """
    h_out = out_ref.shape[0]
    acc = jnp.dot(in_ref[0:h_out, :], w_ref[0],
                  preferred_element_type=jnp.float32)
    for dy in range(1, KERNEL):                         # static, fully unrolled
        acc = acc + jnp.dot(in_ref[dy:dy + h_out, :], w_ref[dy],
                            preferred_element_type=jnp.float32)
    out_ref[...] = _leaky(acc + b_ref[...])


def _discrim_kernel(x_ref,
                    w1_ref, b1_ref, w2_ref, b2_ref, w3_ref, b3_ref,
                    w4_ref, b4_ref,
                    wl1_ref, bl1_ref, wl2_ref, bl2_ref, wl3_ref, bl3_ref,
                    out_ref,
                    a1, a2, a3, a4):
    # BN is already folded into (w1, b1); conv1 reads the raw input directly.
    _conv_layer(x_ref, a1, w1_ref, b1_ref)
    _conv_layer(a1, a2, w2_ref, b2_ref)
    _conv_layer(a2, a3, w3_ref, b3_ref)
    _conv_layer(a3, a4, w4_ref, b4_ref)

    # torch.mean(out, (2, 3)) is folded into wl1 (channel selection + 1/(h*w)),
    # so only a sublane sum over h remains here.
    s = jnp.sum(a4[...], axis=0, keepdims=True)          # [1, w4*C]
    h1 = _leaky(jnp.dot(s, wl1_ref[...], preferred_element_type=jnp.float32)
                + bl1_ref[...])
    h2 = _leaky(jnp.dot(h1, wl2_ref[...], preferred_element_type=jnp.float32)
                + bl2_ref[...])
    out = jnp.dot(h2, wl3_ref[...], preferred_element_type=jnp.float32) + bl3_ref[...]
    out_ref[0] = out                                     # [1, 1]


# --------------------- wrapper-side weight restructuring ---------------------

def _toeplitz(w_hwio, w_in):
    """HWIO conv weight -> per-dy banded matmul weights.

    Returns T with shape [kh, w_in*ci, w_out*co] such that
      T[dy][(w+dx)*ci + i, w*co + o] = w_hwio[dy, dx, i, o].
    """
    kh, kw, ci, co = w_hwio.shape
    w_out = w_in - (kw - 1)
    eye = jnp.eye(w_out, dtype=w_hwio.dtype)
    mats = []
    for dy in range(kh):
        t = jnp.zeros((w_in * ci, w_out * co), w_hwio.dtype)
        for dx in range(kw):
            blk = jnp.kron(eye, w_hwio[dy, dx])          # [w_out*ci, w_out*co]
            t = t + jnp.pad(blk, ((dx * ci, (kw - 1 - dx) * ci), (0, 0)))
        mats.append(t)
    return jnp.stack(mats)                               # [kh, w_in*ci, w_out*co]


def _tile_bias(b_1c, w_out):
    # [1, C] -> [1, w_out*C] matching the channel-fastest activation layout.
    return jnp.tile(b_1c, (1, w_out))


# ------------------------------ JAX wrapper ----------------------------------

@jax.jit
def metric_discriminator_forward(x_nchw, params):
    B, C, H, W = x_nchw.shape
    assert C == 1, "module uses a single input channel"
    Cc = BASE_CH
    x = x_nchw.reshape(B, H, W).astype(jnp.float32)      # [B, H, W]

    # BatchNorm2d(1) training-mode batch statistics (biased var), eps=1e-5,
    # folded into conv1:  conv(x*scale + shift, w1) = conv(x, w1*scale) + shift*sum(w1)
    mean = jnp.mean(x)
    var = jnp.mean((x - mean) ** 2)
    scale = params["bn_gamma"] / jnp.sqrt(var + BN_EPS)
    shift = params["bn_beta"] - mean * scale
    w1f = params["w1"] * scale                                           # [5,5,1,C]
    b1f = params["b1"] + shift * jnp.sum(params["w1"], axis=(0, 1, 2))[None, :]

    H1, W1 = H - 4, W - 4
    H2, W2 = H - 8, W - 8
    H3, W3 = H - 12, W - 12
    H4, W4 = H - 16, W - 16

    # Banded matmul weights (built per-forward; layer 1 depends on BN stats).
    t1 = _toeplitz(w1f, W)
    t2 = _toeplitz(params["w2"], W1)
    t3 = _toeplitz(params["w3"], W2)
    t4 = _toeplitz(params["w4"], W3)

    # Fold the spatial mean (1/(H4*W4) channel selection) into Linear1.
    wl1p = jnp.tile(params["wl1"], (W4, 1)) * (1.0 / (H4 * W4))          # [W4*C, 50]

    args = (x,
            t1, _tile_bias(b1f, W1),
            t2, _tile_bias(params["b2"], W2),
            t3, _tile_bias(params["b3"], W3),
            t4, _tile_bias(params["b4"], W4),
            wl1p, params["bl1"], params["wl2"], params["bl2"],
            params["wl3"], params["bl3"])

    def full_spec(a):
        nd = a.ndim
        return pl.BlockSpec(a.shape, lambda b, _nd=nd: (0,) * _nd)

    in_specs = [pl.BlockSpec((None, H, W), lambda b: (b, 0, 0))]    # x: one image / step
    in_specs += [full_spec(a) for a in args[1:]]                    # weights / biases

    out = pl.pallas_call(
        _discrim_kernel,
        out_shape=jax.ShapeDtypeStruct((B, 1, 1), jnp.float32),
        grid_spec=pltpu.PrefetchScalarGridSpec(
            num_scalar_prefetch=0,
            grid=(B,),
            in_specs=in_specs,
            out_specs=pl.BlockSpec((1, 1, 1), lambda b: (b, 0, 0)),
            scratch_shapes=[
                pltpu.VMEM((H1, W1 * Cc), jnp.float32),   # conv1 activations [h, w*c]
                pltpu.VMEM((H2, W2 * Cc), jnp.float32),   # conv2 activations
                pltpu.VMEM((H3, W3 * Cc), jnp.float32),   # conv3 activations
                pltpu.VMEM((H4, W4 * Cc), jnp.float32),   # conv4 activations
            ]),
        compiler_params=pltpu.CompilerParams(dimension_semantics=("parallel",)),
    )(*args)
    return out.reshape(B, 1)


# ------------------------ deterministic parameter init -----------------------

def _spectral_sigma(w2d, iters=50):
    """Deterministic power iteration for the top singular value."""
    v = jnp.ones((w2d.shape[1],), jnp.float32)
    v = v / jnp.linalg.norm(v)
    u = w2d @ v
    for _ in range(iters):
        u = w2d @ v
        u = u / (jnp.linalg.norm(u) + 1e-12)
        v = w2d.T @ u
        v = v / (jnp.linalg.norm(v) + 1e-12)
    return jnp.vdot(u, w2d @ v)


def init_params(key, kernel_size=(5, 5), base_channels=15):
    # TODO(synk): torch spectral_norm keeps random u/v buffers and does one power
    # iteration per forward; here sigma is a converged deterministic power
    # iteration applied once at init, so the exact scaling differs from torch.
    kh, kw = kernel_size
    C = base_channels
    keys = jax.random.split(key, 7)

    def conv_w(k, cin, cout):
        fan_in, fan_out = cin * kh * kw, cout * kh * kw
        bound = math.sqrt(6.0 / (fan_in + fan_out))          # xavier_uniform, gain=1
        w = jax.random.uniform(k, (cout, cin, kh, kw), jnp.float32, -bound, bound)
        w = w / _spectral_sigma(w.reshape(cout, -1))
        return jnp.transpose(w, (2, 3, 1, 0))                # OIHW -> HWIO

    def lin_w(k, fin, fout):
        bound = math.sqrt(6.0 / (fin + fout))
        w = jax.random.uniform(k, (fout, fin), jnp.float32, -bound, bound)
        w = w / _spectral_sigma(w)
        return w.T                                           # [in, out]

    return {
        "bn_gamma": jnp.float32(1.0), "bn_beta": jnp.float32(0.0),
        "w1": conv_w(keys[0], 1, C),  "b1": jnp.zeros((1, C), jnp.float32),
        "w2": conv_w(keys[1], C, C),  "b2": jnp.zeros((1, C), jnp.float32),
        "w3": conv_w(keys[2], C, C),  "b3": jnp.zeros((1, C), jnp.float32),
        "w4": conv_w(keys[3], C, C),  "b4": jnp.zeros((1, C), jnp.float32),
        "wl1": lin_w(keys[4], C, 50), "bl1": jnp.zeros((1, 50), jnp.float32),
        "wl2": lin_w(keys[5], 50, 10),"bl2": jnp.zeros((1, 10), jnp.float32),
        "wl3": lin_w(keys[6], 10, 1), "bl3": jnp.zeros((1, 1), jnp.float32),
    }


# ---------------------------- pure-JAX reference -----------------------------

def reference_forward(x_nchw, params):
    x = jnp.transpose(x_nchw, (0, 2, 3, 1)).astype(jnp.float32)
    mean = jnp.mean(x)
    var = jnp.mean((x - mean) ** 2)
    h = (x - mean) / jnp.sqrt(var + BN_EPS) * params["bn_gamma"] + params["bn_beta"]
    dn = ("NHWC", "HWIO", "NHWC")
    for i in range(1, 5):
        h = lax.conv_general_dilated(h, params[f"w{i}"], (1, 1), "VALID",
                                     dimension_numbers=dn)
        h = _leaky(h + params[f"b{i}"].reshape(1, 1, 1, -1))
    feat = jnp.mean(h, axis=(1, 2))
    h = _leaky(feat @ params["wl1"] + params["bl1"])
    h = _leaky(h @ params["wl2"] + params["bl2"])
    return h @ params["wl3"] + params["bl3"]


# ----------------------------------- main ------------------------------------

if __name__ == "__main__":
    key = jax.random.PRNGKey(0)
    kp, kx = jax.random.split(key)
    params = init_params(kp)

    B, H, W = 2, 24, 24
    x = jax.random.normal(kx, (B, 1, H, W), jnp.float32)   # NCHW, like PyTorch

    out = metric_discriminator_forward(x, params)
    out = jax.block_until_ready(out)

    ref = reference_forward(x, params)
    assert out.shape == (B, 1), out.shape
    if not bool(jnp.allclose(out, ref, rtol=1e-3, atol=1e-3)):
        raise AssertionError(f"mismatch: kernel={out} ref={ref}")
    print("KERNEL_OK")
</pallas_src>

<mosaic_0001>
module attributes {stable_mosaic.version = 11 : i64} {
  func.func @_discrim_kernel(%arg0: i32, %arg1: memref<1x24x24xf32, #tpu.memory_space<vmem>>, %arg2: memref<5x24x300xf32, #tpu.memory_space<vmem>>, %arg3: memref<1x300xf32, #tpu.memory_space<vmem>>, %arg4: memref<5x300x240xf32, #tpu.memory_space<vmem>>, %arg5: memref<1x240xf32, #tpu.memory_space<vmem>>, %arg6: memref<5x240x180xf32, #tpu.memory_space<vmem>>, %arg7: memref<1x180xf32, #tpu.memory_space<vmem>>, %arg8: memref<5x180x120xf32, #tpu.memory_space<vmem>>, %arg9: memref<1x120xf32, #tpu.memory_space<vmem>>, %arg10: memref<120x50xf32, #tpu.memory_space<vmem>>, %arg11: memref<1x50xf32, #tpu.memory_space<vmem>>, %arg12: memref<50x10xf32, #tpu.memory_space<vmem>>, %arg13: memref<1x10xf32, #tpu.memory_space<vmem>>, %arg14: memref<10x1xf32, #tpu.memory_space<vmem>>, %arg15: memref<1x1xf32, #tpu.memory_space<vmem>>, %arg16: memref<1x1x1xf32, #tpu.memory_space<vmem>>, %arg17: memref<20x300xf32, #tpu.memory_space<vmem>>, %arg18: memref<16x240xf32, #tpu.memory_space<vmem>>, %arg19: memref<12x180xf32, #tpu.memory_space<vmem>>, %arg20: memref<8x120xf32, #tpu.memory_space<vmem>>) attributes {dimension_semantics = [#tpu.dimension_semantics<parallel>], iteration_bounds = array<i64: 2>, scalar_prefetch = 0 : i64, scratch_operands = 4 : i64, tpu.core_type = #tpu.core_type<tc>, window_params = [{transform_indices = @transform_0, window_bounds = array<i64: 1, 24, 24>}, {pipeline_mode = #tpu.pipeline_mode<synchronous>, transform_indices = @transform_1, window_bounds = array<i64: 5, 24, 300>}, {pipeline_mode = #tpu.pipeline_mode<synchronous>, transform_indices = @transform_2, window_bounds = array<i64: 1, 300>}, {pipeline_mode = #tpu.pipeline_mode<synchronous>, transform_indices = @transform_3, window_bounds = array<i64: 5, 300, 240>}, {pipeline_mode = #tpu.pipeline_mode<synchronous>, transform_indices = @transform_4, window_bounds = array<i64: 1, 240>}, {pipeline_mode = #tpu.pipeline_mode<synchronous>, transform_indices = @transform_5, window_bounds = array<i64: 5, 240, 180>}, {pipeline_mode = #tpu.pipeline_mode<synchronous>, transform_indices = @transform_6, window_bounds = array<i64: 1, 180>}, {pipeline_mode = #tpu.pipeline_mode<synchronous>, transform_indices = @transform_7, window_bounds = array<i64: 5, 180, 120>}, {pipeline_mode = #tpu.pipeline_mode<synchronous>, transform_indices = @transform_8, window_bounds = array<i64: 1, 120>}, {pipeline_mode = #tpu.pipeline_mode<synchronous>, transform_indices = @transform_9, window_bounds = array<i64: 120, 50>}, {pipeline_mode = #tpu.pipeline_mode<synchronous>, transform_indices = @transform_10, window_bounds = array<i64: 1, 50>}, {pipeline_mode = #tpu.pipeline_mode<synchronous>, transform_indices = @transform_11, window_bounds = array<i64: 50, 10>}, {pipeline_mode = #tpu.pipeline_mode<synchronous>, transform_indices = @transform_12, window_bounds = array<i64: 1, 10>}, {pipeline_mode = #tpu.pipeline_mode<synchronous>, transform_indices = @transform_13, window_bounds = array<i64: 10, 1>}, {pipeline_mode = #tpu.pipeline_mode<synchronous>, transform_indices = @transform_14, window_bounds = array<i64: 1, 1>}, {transform_indices = @transform_15, window_bounds = array<i64: 1, 1, 1>}]} {
    %c0 = arith.constant 0 : index
    %c0_0 = arith.constant 0 : index
    %c0_1 = arith.constant 0 : index
    %0 = vector.load %arg1[%c0, %c0_0, %c0_1] : memref<1x24x24xf32, #tpu.memory_space<vmem>>, vector<1x20x24xf32>
    %1 = vector.shape_cast %0 : vector<1x20x24xf32> to vector<20x24xf32>
    %c0_2 = arith.constant 0 : index
    %c0_3 = arith.constant 0 : index
    %c0_4 = arith.constant 0 : index
    %2 = vector.load %arg2[%c0_2, %c0_3, %c0_4] : memref<5x24x300xf32, #tpu.memory_space<vmem>>, vector<1x24x300xf32>
    %3 = vector.shape_cast %2 : vector<1x24x300xf32> to vector<24x300xf32>
    %cst = arith.constant dense<0.000000e+00> : vector<20x300xf32>
    %4 = tpu.matmul %1, %3, %cst {dimension_numbers = #tpu.dot_dimension_numbers<[1], [0], [0], [1], [0, 0, 1, 1], [], []>} : vector<20x24xf32>, vector<24x300xf32>, vector<20x300xf32> -> vector<20x300xf32>
    %c0_5 = arith.constant 0 : index
    %c1 = arith.constant 1 : index
    %c0_6 = arith.constant 0 : index
    %5 = vector.load %arg1[%c0_5, %c1, %c0_6] : memref<1x24x24xf32, #tpu.memory_space<vmem>>, vector<1x20x24xf32>
    %6 = vector.shape_cast %5 : vector<1x20x24xf32> to vector<20x24xf32>
    %c1_7 = arith.constant 1 : index
    %c0_8 = arith.constant 0 : index
    %c0_9 = arith.constant 0 : index
    %7 = vector.load %arg2[%c1_7, %c0_8, %c0_9] : memref<5x24x300xf32, #tpu.memory_space<vmem>>, vector<1x24x300xf32>
    %8 = vector.shape_cast %7 : vector<1x24x300xf32> to vector<24x300xf32>
    %cst_10 = arith.constant dense<0.000000e+00> : vector<20x300xf32>
    %9 = tpu.matmul %6, %8, %cst_10 {dimension_numbers = #tpu.dot_dimension_numbers<[1], [0], [0], [1], [0, 0, 1, 1], [], []>} : vector<20x24xf32>, vector<24x300xf32>, vector<20x300xf32> -> vector<20x300xf32>
    %10 = arith.addf %4, %9 : vector<20x300xf32>
    %c0_11 = arith.constant 0 : index
    %c2 = arith.constant 2 : index
    %c0_12 = arith.constant 0 : index
    %11 = vector.load %arg1[%c0_11, %c2, %c0_12] : memref<1x24x24xf32, #tpu.memory_space<vmem>>, vector<1x20x24xf32>
    %12 = vector.shape_cast %11 : vector<1x20x24xf32> to vector<20x24xf32>
    %c2_13 = arith.constant 2 : index
    %c0_14 = arith.constant 0 : index
    %c0_15 = arith.constant 0 : index
    %13 = vector.load %arg2[%c2_13, %c0_14, %c0_15] : memref<5x24x300xf32, #tpu.memory_space<vmem>>, vector<1x24x300xf32>
    %14 = vector.shape_cast %13 : vector<1x24x300xf32> to vector<24x300xf32>
    %cst_16 = arith.constant dense<0.000000e+00> : vector<20x300xf32>
    %15 = tpu.matmul %12, %14, %cst_16 {dimension_numbers = #tpu.dot_dimension_numbers<[1], [0], [0], [1], [0, 0, 1, 1], [], []>} : vector<20x24xf32>, vector<24x300xf32>, vector<20x300xf32> -> vector<20x300xf32>
    %16 = arith.addf %10, %15 : vector<20x300xf32>
    %c0_17 = arith.constant 0 : index
    %c3 = arith.constant 3 : index
    %c0_18 = arith.constant 0 : index
    %17 = vector.load %arg1[%c0_17, %c3, %c0_18] : memref<1x24x24xf32, #tpu.memory_space<vmem>>, vector<1x20x24xf32>
    %18 = vector.shape_cast %17 : vector<1x20x24xf32> to vector<20x24xf32>
    %c3_19 = arith.constant 3 : index
    %c0_20 = arith.constant 0 : index
    %c0_21 = arith.constant 0 : index
    %19 = vector.load %arg2[%c3_19, %c0_20, %c0_21] : memref<5x24x300xf32, #tpu.memory_space<vmem>>, vector<1x24x300xf32>
    %20 = vector.shape_cast %19 : vector<1x24x300xf32> to vector<24x300xf32>
    %cst_22 = arith.constant dense<0.000000e+00> : vector<20x300xf32>
    %21 = tpu.matmul %18, %20, %cst_22 {dimension_numbers = #tpu.dot_dimension_numbers<[1], [0], [0], [1], [0, 0, 1, 1], [], []>} : vector<20x24xf32>, vector<24x300xf32>, vector<20x300xf32> -> vector<20x300xf32>
    %22 = arith.addf %16, %21 : vector<20x300xf32>
    %c0_23 = arith.constant 0 : index
    %c4 = arith.constant 4 : index
    %c0_24 = arith.constant 0 : index
    %23 = vector.load %arg1[%c0_23, %c4, %c0_24] : memref<1x24x24xf32, #tpu.memory_space<vmem>>, vector<1x20x24xf32>
    %24 = vector.shape_cast %23 : vector<1x20x24xf32> to vector<20x24xf32>
    %c4_25 = arith.constant 4 : index
    %c0_26 = arith.constant 0 : index
    %c0_27 = arith.constant 0 : index
    %25 = vector.load %arg2[%c4_25, %c0_26, %c0_27] : memref<5x24x300xf32, #tpu.memory_space<vmem>>, vector<1x24x300xf32>
    %26 = vector.shape_cast %25 : vector<1x24x300xf32> to vector<24x300xf32>
    %cst_28 = arith.constant dense<0.000000e+00> : vector<20x300xf32>
    %27 = tpu.matmul %24, %26, %cst_28 {dimension_numbers = #tpu.dot_dimension_numbers<[1], [0], [0], [1], [0, 0, 1, 1], [], []>} : vector<20x24xf32>, vector<24x300xf32>, vector<20x300xf32> -> vector<20x300xf32>
    %28 = arith.addf %22, %27 : vector<20x300xf32>
    %c0_29 = arith.constant 0 : index
    %c0_30 = arith.constant 0 : index
    %29 = vector.load %arg3[%c0_29, %c0_30] : memref<1x300xf32, #tpu.memory_space<vmem>>, vector<1x300xf32>
    %30 = vector.broadcast %29 : vector<1x300xf32> to vector<20x300xf32>
    %31 = arith.addf %28, %30 : vector<20x300xf32>
    %cst_31 = arith.constant 0.000000e+00 : f32
    %32 = vector.broadcast %cst_31 : f32 to vector<20x300xf32>
    %33 = arith.cmpf ogt, %31, %32 : vector<20x300xf32>
    %cst_32 = arith.constant 3.000000e-01 : f32
    %34 = vector.broadcast %cst_32 : f32 to vector<20x300xf32>
    %35 = arith.mulf %34, %31 : vector<20x300xf32>
    %36 = arith.select %33, %31, %35 : vector<20x300xi1>, vector<20x300xf32>
    %c0_33 = arith.constant 0 : index
    %c0_34 = arith.constant 0 : index
    %37 = vector.load %arg17[%c0_33, %c0_34] : memref<20x300xf32, #tpu.memory_space<vmem>>, vector<20x300xf32>
    tpu.vector_store %arg17[%c0_33, %c0_34], %36 {strides = array<i32>} : memref<20x300xf32, #tpu.memory_space<vmem>>, vector<20x300xf32>,
    %c0_35 = arith.constant 0 : index
    %c0_36 = arith.constant 0 : index
    %38 = vector.load %arg17[%c0_35, %c0_36] : memref<20x300xf32, #tpu.memory_space<vmem>>, vector<16x300xf32>
    %c0_37 = arith.constant 0 : index
    %c0_38 = arith.constant 0 : index
    %c0_39 = arith.constant 0 : index
    %39 = vector.load %arg4[%c0_37, %c0_38, %c0_39] : memref<5x300x240xf32, #tpu.memory_space<vmem>>, vector<1x300x240xf32>
    %40 = vector.shape_cast %39 : vector<1x300x240xf32> to vector<300x240xf32>
    %cst_40 = arith.constant dense<0.000000e+00> : vector<16x240xf32>
    %41 = tpu.matmul %38, %40, %cst_40 {dimension_numbers = #tpu.dot_dimension_numbers<[1], [0], [0], [1], [0, 0, 1, 1], [], []>} : vector<16x300xf32>, vector<300x240xf32>, vector<16x240xf32> -> vector<16x240xf32>
    %c1_41 = arith.constant 1 : index
    %c0_42 = arith.constant 0 : index
    %42 = vector.load %arg17[%c1_41, %c0_42] : memref<20x300xf32, #tpu.memory_space<vmem>>, vector<16x300xf32>
    %c1_43 = arith.constant 1 : index
    %c0_44 = arith.constant 0 : index
    %c0_45 = arith.constant 0 : index
    %43 = vector.load %arg4[%c1_43, %c0_44, %c0_45] : memref<5x300x240xf32, #tpu.memory_space<vmem>>, vector<1x300x240xf32>
    %44 = vector.shape_cast %43 : vector<1x300x240xf32> to vector<300x240xf32>
    %cst_46 = arith.constant dense<0.000000e+00> : vector<16x240xf32>
    %45 = tpu.matmul %42, %44, %cst_46 {dimension_numbers = #tpu.dot_dimension_numbers<[1], [0], [0], [1], [0, 0, 1, 1], [], []>} : vector<16x300xf32>, vector<300x240xf32>, vector<16x240xf32> -> vector<16x240xf32>
    %46 = arith.addf %41, %45 : vector<16x240xf32>
    %c2_47 = arith.constant 2 : index
    %c0_48 = arith.constant 0 : index
    %47 = vector.load %arg17[%c2_47, %c0_48] : memref<20x300xf32, #tpu.memory_space<vmem>>, vector<16x300xf32>
    %c2_49 = arith.constant 2 : index
    %c0_50 = arith.constant 0 : index
    %c0_51 = arith.constant 0 : index
    %48 = vector.load %arg4[%c2_49, %c0_50, %c0_51] : memref<5x300x240xf32, #tpu.memory_space<vmem>>, vector<1x300x240xf32>
    %49 = vector.shape_cast %48 : vector<1x300x240xf32> to vector<300x240xf32>
    %cst_52 = arith.constant dense<0.000000e+00> : vector<16x240xf32>
    %50 = tpu.matmul %47, %49, %cst_52 {dimension_numbers = #tpu.dot_dimension_numbers<[1], [0], [0], [1], [0, 0, 1, 1], [], []>} : vector<16x300xf32>, vector<300x240xf32>, vector<16x240xf32> -> vector<16x240xf32>
    %51 = arith.addf %46, %50 : vector<16x240xf32>
    %c3_53 = arith.constant 3 : index
    %c0_54 = arith.constant 0 : index
    %52 = vector.load %arg17[%c3_53, %c0_54] : memref<20x300xf32, #tpu.memory_space<vmem>>, vector<16x300xf32>
    %c3_55 = arith.constant 3 : index
    %c0_56 = arith.constant 0 : index
    %c0_57 = arith.constant 0 : index
    %53 = vector.load %arg4[%c3_55, %c0_56, %c0_57] : memref<5x300x240xf32, #tpu.memory_space<vmem>>, vector<1x300x240xf32>
    %54 = vector.shape_cast %53 : vector<1x300x240xf32> to vector<300x240xf32>
    %cst_58 = arith.constant dense<0.000000e+00> : vector<16x240xf32>
    %55 = tpu.matmul %52, %54, %cst_58 {dimension_numbers = #tpu.dot_dimension_numbers<[1], [0], [0], [1], [0, 0, 1, 1], [], []>} : vector<16x300xf32>, vector<300x240xf32>, vector<16x240xf32> -> vector<16x240xf32>
    %56 = arith.addf %51, %55 : vector<16x240xf32>
    %c4_59 = arith.constant 4 : index
    %c0_60 = arith.constant 0 : index
    %57 = vector.load %arg17[%c4_59, %c0_60] : memref<20x300xf32, #tpu.memory_space<vmem>>, vector<16x300xf32>
    %c4_61 = arith.constant 4 : index
    %c0_62 = arith.constant 0 : index
    %c0_63 = arith.constant 0 : index
    %58 = vector.load %arg4[%c4_61, %c0_62, %c0_63] : memref<5x300x240xf32, #tpu.memory_space<vmem>>, vector<1x300x240xf32>
    %59 = vector.shape_cast %58 : vector<1x300x240xf32> to vector<300x240xf32>
    %cst_64 = arith.constant dense<0.000000e+00> : vector<16x240xf32>
    %60 = tpu.matmul %57, %59, %cst_64 {dimension_numbers = #tpu.dot_dimension_numbers<[1], [0], [0], [1], [0, 0, 1, 1], [], []>} : vector<16x300xf32>, vector<300x240xf32>, vector<16x240xf32> -> vector<16x240xf32>
    %61 = arith.addf %56, %60 : vector<16x240xf32>
    %c0_65 = arith.constant 0 : index
    %c0_66 = arith.constant 0 : index
    %62 = vector.load %arg5[%c0_65, %c0_66] : memref<1x240xf32, #tpu.memory_space<vmem>>, vector<1x240xf32>
    %63 = vector.broadcast %62 : vector<1x240xf32> to vector<16x240xf32>
    %64 = arith.addf %61, %63 : vector<16x240xf32>
    %cst_67 = arith.constant 0.000000e+00 : f32
    %65 = vector.broadcast %cst_67 : f32 to vector<16x240xf32>
    %66 = arith.cmpf ogt, %64, %65 : vector<16x240xf32>
    %cst_68 = arith.constant 3.000000e-01 : f32
    %67 = vector.broadcast %cst_68 : f32 to vector<16x240xf32>
    %68 = arith.mulf %67, %64 : vector<16x240xf32>
    %69 = arith.select %66, %64, %68 : vector<16x240xi1>, vector<16x240xf32>
    %c0_69 = arith.constant 0 : index
    %c0_70 = arith.constant 0 : index
    %70 = vector.load %arg18[%c0_69, %c0_70] : memref<16x240xf32, #tpu.memory_space<vmem>>, vector<16x240xf32>
    tpu.vector_store %arg18[%c0_69, %c0_70], %69 {strides = array<i32>} : memref<16x240xf32, #tpu.memory_space<vmem>>, vector<16x240xf32>,
    %c0_71 = arith.constant 0 : index
    %c0_72 = arith.constant 0 : index
    %71 = vector.load %arg18[%c0_71, %c0_72] : memref<16x240xf32, #tpu.memory_space<vmem>>, vector<12x240xf32>
    %c0_73 = arith.constant 0 : index
    %c0_74 = arith.constant 0 : index
    %c0_75 = arith.constant 0 : index
    %72 = vector.load %arg6[%c0_73, %c0_74, %c0_75] : memref<5x240x180xf32, #tpu.memory_space<vmem>>, vector<1x240x180xf32>
    %73 = vector.shape_cast %72 : vector<1x240x180xf32> to vector<240x180xf32>
    %cst_76 = arith.constant dense<0.000000e+00> : vector<12x180xf32>
    %74 = tpu.matmul %71, %73, %cst_76 {dimension_numbers = #tpu.dot_dimension_numbers<[1], [0], [0], [1], [0, 0, 1, 1], [], []>} : vector<12x240xf32>, vector<240x180xf32>, vector<12x180xf32> -> vector<12x180xf32>
    %c1_77 = arith.constant 1 : index
    %c0_78 = arith.constant 0 : index
    %75 = vector.load %arg18[%c1_77, %c0_78] : memref<16x240xf32, #tpu.memory_space<vmem>>, vector<12x240xf32>
    %c1_79 = arith.constant 1 : index
    %c0_80 = arith.constant 0 : index
    %c0_81 = arith.constant 0 : index
    %76 = vector.load %arg6[%c1_79, %c0_80, %c0_81] : memref<5x240x180xf32, #tpu.memory_space<vmem>>, vector<1x240x180xf32>
    %77 = vector.shape_cast %76 : vector<1x240x180xf32> to vector<240x180xf32>
    %cst_82 = arith.constant dense<0.000000e+00> : vector<12x180xf32>
    %78 = tpu.matmul %75, %77, %cst_82 {dimension_numbers = #tpu.dot_dimension_numbers<[1], [0], [0], [1], [0, 0, 1, 1], [], []>} : vector<12x240xf32>, vector<240x180xf32>, vector<12x180xf32> -> vector<12x180xf32>
    %79 = arith.addf %74, %78 : vector<12x180xf32>
    %c2_83 = arith.constant 2 : index
    %c0_84 = arith.constant 0 : index
    %80 = vector.load %arg18[%c2_83, %c0_84] : memref<16x240xf32, #tpu.memory_space<vmem>>, vector<12x240xf32>
    %c2_85 = arith.constant 2 : index
    %c0_86 = arith.constant 0 : index
    %c0_87 = arith.constant 0 : index
    %81 = vector.load %arg6[%c2_85, %c0_86, %c0_87] : memref<5x240x180xf32, #tpu.memory_space<vmem>>, vector<1x240x180xf32>
    %82 = vector.shape_cast %81 : vector<1x240x180xf32> to vector<240x180xf32>
    %cst_88 = arith.constant dense<0.000000e+00> : vector<12x180xf32>
    %83 = tpu.matmul %80, %82, %cst_88 {dimension_numbers = #tpu.dot_dimension_numbers<[1], [0], [0], [1], [0, 0, 1, 1], [], []>} : vector<12x240xf32>, vector<240x180xf32>, vector<12x180xf32> -> vector<12x180xf32>
    %84 = arith.addf %79, %83 : vector<12x180xf32>
    %c3_89 = arith.constant 3 : index
    %c0_90 = arith.constant 0 : index
    %85 = vector.load %arg18[%c3_89, %c0_90] : memref<16x240xf32, #tpu.memory_space<vmem>>, vector<12x240xf32>
    %c3_91 = arith.constant 3 : index
    %c0_92 = arith.constant 0 : index
    %c0_93 = arith.constant 0 : index
    %86 = vector.load %arg6[%c3_91, %c0_92, %c0_93] : memref<5x240x180xf32, #tpu.memory_space<vmem>>, vector<1x240x180xf32>
    %87 = vector.shape_cast %86 : vector<1x240x180xf32> to vector<240x180xf32>
    %cst_94 = arith.constant dense<0.000000e+00> : vector<12x180xf32>
    %88 = tpu.matmul %85, %87, %cst_94 {dimension_numbers = #tpu.dot_dimension_numbers<[1], [0], [0], [1], [0, 0, 1, 1], [], []>} : vector<12x240xf32>, vector<240x180xf32>, vector<12x180xf32> -> vector<12x180xf32>
    %89 = arith.addf %84, %88 : vector<12x180xf32>
    %c4_95 = arith.constant 4 : index
    %c0_96 = arith.constant 0 : index
    %90 = vector.load %arg18[%c4_95, %c0_96] : memref<16x240xf32, #tpu.memory_space<vmem>>, vector<12x240xf32>
    %c4_97 = arith.constant 4 : index
    %c0_98 = arith.constant 0 : index
    %c0_99 = arith.constant 0 : index
    %91 = vector.load %arg6[%c4_97, %c0_98, %c0_99] : memref<5x240x180xf32, #tpu.memory_space<vmem>>, vector<1x240x180xf32>
    %92 = vector.shape_cast %91 : vector<1x240x180xf32> to vector<240x180xf32>
    %cst_100 = arith.constant dense<0.000000e+00> : vector<12x180xf32>
    %93 = tpu.matmul %90, %92, %cst_100 {dimension_numbers = #tpu.dot_dimension_numbers<[1], [0], [0], [1], [0, 0, 1, 1], [], []>} : vector<12x240xf32>, vector<240x180xf32>, vector<12x180xf32> -> vector<12x180xf32>
    %94 = arith.addf %89, %93 : vector<12x180xf32>
    %c0_101 = arith.constant 0 : index
    %c0_102 = arith.constant 0 : index
    %95 = vector.load %arg7[%c0_101, %c0_102] : memref<1x180xf32, #tpu.memory_space<vmem>>, vector<1x180xf32>
    %96 = vector.broadcast %95 : vector<1x180xf32> to vector<12x180xf32>
    %97 = arith.addf %94, %96 : vector<12x180xf32>
    %cst_103 = arith.constant 0.000000e+00 : f32
    %98 = vector.broadcast %cst_103 : f32 to vector<12x180xf32>
    %99 = arith.cmpf ogt, %97, %98 : vector<12x180xf32>
    %cst_104 = arith.constant 3.000000e-01 : f32
    %100 = vector.broadcast %cst_104 : f32 to vector<12x180xf32>
    %101 = arith.mulf %100, %97 : vector<12x180xf32>
    %102 = arith.select %99, %97, %101 : vector<12x180xi1>, vector<12x180xf32>
    %c0_105 = arith.constant 0 : index
    %c0_106 = arith.constant 0 : index
    %103 = vector.load %arg19[%c0_105, %c0_106] : memref<12x180xf32, #tpu.memory_space<vmem>>, vector<12x180xf32>
    tpu.vector_store %arg19[%c0_105, %c0_106], %102 {strides = array<i32>} : memref<12x180xf32, #tpu.memory_space<vmem>>, vector<12x180xf32>,
    %c0_107 = arith.constant 0 : index
    %c0_108 = arith.constant 0 : index
    %104 = vector.load %arg19[%c0_107, %c0_108] : memref<12x180xf32, #tpu.memory_space<vmem>>, vector<8x180xf32>
    %c0_109 = arith.constant 0 : index
    %c0_110 = arith.constant 0 : index
    %c0_111 = arith.constant 0 : index
    %105 = vector.load %arg8[%c0_109, %c0_110, %c0_111] : memref<5x180x120xf32, #tpu.memory_space<vmem>>, vector<1x180x120xf32>
    %106 = vector.shape_cast %105 : vector<1x180x120xf32> to vector<180x120xf32>
    %cst_112 = arith.constant dense<0.000000e+00> : vector<8x120xf32>
    %107 = tpu.matmul %104, %106, %cst_112 {dimension_numbers = #tpu.dot_dimension_numbers<[1], [0], [0], [1], [0, 0, 1, 1], [], []>} : vector<8x180xf32>, vector<180x120xf32>, vector<8x120xf32> -> vector<8x120xf32>
    %c1_113 = arith.constant 1 : index
    %c0_114 = arith.constant 0 : index
    %108 = vector.load %arg19[%c1_113, %c0_114] : memref<12x180xf32, #tpu.memory_space<vmem>>, vector<8x180xf32>
    %c1_115 = arith.constant 1 : index
    %c0_116 = arith.constant 0 : index
    %c0_117 = arith.constant 0 : index
    %109 = vector.load %arg8[%c1_115, %c0_116, %c0_117] : memref<5x180x120xf32, #tpu.memory_space<vmem>>, vector<1x180x120xf32>
    %110 = vector.shape_cast %109 : vector<1x180x120xf32> to vector<180x120xf32>
    %cst_118 = arith.constant dense<0.000000e+00> : vector<8x120xf32>
    %111 = tpu.matmul %108, %110, %cst_118 {dimension_numbers = #tpu.dot_dimension_numbers<[1], [0], [0], [1], [0, 0, 1, 1], [], []>} : vector<8x180xf32>, vector<180x120xf32>, vector<8x120xf32> -> vector<8x120xf32>
    %112 = arith.addf %107, %111 : vector<8x120xf32>
    %c2_119 = arith.constant 2 : index
    %c0_120 = arith.constant 0 : index
    %113 = vector.load %arg19[%c2_119, %c0_120] : memref<12x180xf32, #tpu.memory_space<vmem>>, vector<8x180xf32>
    %c2_121 = arith.constant 2 : index
    %c0_122 = arith.constant 0 : index
    %c0_123 = arith.constant 0 : index
    %114 = vector.load %arg8[%c2_121, %c0_122, %c0_123] : memref<5x180x120xf32, #tpu.memory_space<vmem>>, vector<1x180x120xf32>
    %115 = vector.shape_cast %114 : vector<1x180x120xf32> to vector<180x120xf32>
    %cst_124 = arith.constant dense<0.000000e+00> : vector<8x120xf32>
    %116 = tpu.matmul %113, %115, %cst_124 {dimension_numbers = #tpu.dot_dimension_numbers<[1], [0], [0], [1], [0, 0, 1, 1], [], []>} : vector<8x180xf32>, vector<180x120xf32>, vector<8x120xf32> -> vector<8x120xf32>
    %117 = arith.addf %112, %116 : vector<8x120xf32>
    %c3_125 = arith.constant 3 : index
    %c0_126 = arith.constant 0 : index
    %118 = vector.load %arg19[%c3_125, %c0_126] : memref<12x180xf32, #tpu.memory_space<vmem>>, vector<8x180xf32>
    %c3_127 = arith.constant 3 : index
    %c0_128 = arith.constant 0 : index
    %c0_129 = arith.constant 0 : index
    %119 = vector.load %arg8[%c3_127, %c0_128, %c0_129] : memref<5x180x120xf32, #tpu.memory_space<vmem>>, vector<1x180x120xf32>
    %120 = vector.shape_cast %119 : vector<1x180x120xf32> to vector<180x120xf32>
    %cst_130 = arith.constant dense<0.000000e+00> : vector<8x120xf32>
    %121 = tpu.matmul %118, %120, %cst_130 {dimension_numbers = #tpu.dot_dimension_numbers<[1], [0], [0], [1], [0, 0, 1, 1], [], []>} : vector<8x180xf32>, vector<180x120xf32>, vector<8x120xf32> -> vector<8x120xf32>
    %122 = arith.addf %117, %121 : vector<8x120xf32>
    %c4_131 = arith.constant 4 : index
    %c0_132 = arith.constant 0 : index
    %123 = vector.load %arg19[%c4_131, %c0_132] : memref<12x180xf32, #tpu.memory_space<vmem>>, vector<8x180xf32>
    %c4_133 = arith.constant 4 : index
    %c0_134 = arith.constant 0 : index
    %c0_135 = arith.constant 0 : index
    %124 = vector.load %arg8[%c4_133, %c0_134, %c0_135] : memref<5x180x120xf32, #tpu.memory_space<vmem>>, vector<1x180x120xf32>
    %125 = vector.shape_cast %124 : vector<1x180x120xf32> to vector<180x120xf32>
    %cst_136 = arith.constant dense<0.000000e+00> : vector<8x120xf32>
    %126 = tpu.matmul %123, %125, %cst_136 {dimension_numbers = #tpu.dot_dimension_numbers<[1], [0], [0], [1], [0, 0, 1, 1], [], []>} : vector<8x180xf32>, vector<180x120xf32>, vector<8x120xf32> -> vector<8x120xf32>
    %127 = arith.addf %122, %126 : vector<8x120xf32>
    %c0_137 = arith.constant 0 : index
    %c0_138 = arith.constant 0 : index
    %128 = vector.load %arg9[%c0_137, %c0_138] : memref<1x120xf32, #tpu.memory_space<vmem>>, vector<1x120xf32>
    %129 = vector.broadcast %128 : vector<1x120xf32> to vector<8x120xf32>
    %130 = arith.addf %127, %129 : vector<8x120xf32>
    %cst_139 = arith.constant 0.000000e+00 : f32
    %131 = vector.broadcast %cst_139 : f32 to vector<8x120xf32>
    %132 = arith.cmpf ogt, %130, %131 : vector<8x120xf32>
    %cst_140 = arith.constant 3.000000e-01 : f32
    %133 = vector.broadcast %cst_140 : f32 to vector<8x120xf32>
    %134 = arith.mulf %133, %130 : vector<8x120xf32>
    %135 = arith.select %132, %130, %134 : vector<8x120xi1>, vector<8x120xf32>
    %c0_141 = arith.constant 0 : index
    %c0_142 = arith.constant 0 : index
    %136 = vector.load %arg20[%c0_141, %c0_142] : memref<8x120xf32, #tpu.memory_space<vmem>>, vector<8x120xf32>
    tpu.vector_store %arg20[%c0_141, %c0_142], %135 {strides = array<i32>} : memref<8x120xf32, #tpu.memory_space<vmem>>, vector<8x120xf32>,
    %c0_143 = arith.constant 0 : index
    %c0_144 = arith.constant 0 : index
    %137 = vector.load %arg20[%c0_143, %c0_144] : memref<8x120xf32, #tpu.memory_space<vmem>>, vector<8x120xf32>
    %cst_145 = arith.constant dense<0.000000e+00> : vector<120xf32>
    %138 = vector.multi_reduction <add>, %137, %cst_145 [0] : vector<8x120xf32> to vector<120xf32>
    %139 = vector.shape_cast %138 : vector<120xf32> to vector<1x120xf32>
    %c0_146 = arith.constant 0 : index
    %c0_147 = arith.constant 0 : index
    %140 = vector.load %arg10[%c0_146, %c0_147] : memref<120x50xf32, #tpu.memory_space<vmem>>, vector<120x50xf32>
    %cst_148 = arith.constant dense<0.000000e+00> : vector<1x50xf32>
    %141 = tpu.matmul %139, %140, %cst_148 {dimension_numbers = #tpu.dot_dimension_numbers<[1], [0], [0], [1], [0, 0, 1, 1], [], []>} : vector<1x120xf32>, vector<120x50xf32>, vector<1x50xf32> -> vector<1x50xf32>
    %c0_149 = arith.constant 0 : index
    %c0_150 = arith.constant 0 : index
    %142 = vector.load %arg11[%c0_149, %c0_150] : memref<1x50xf32, #tpu.memory_space<vmem>>, vector<1x50xf32>
    %143 = arith.addf %141, %142 : vector<1x50xf32>
    %cst_151 = arith.constant 0.000000e+00 : f32
    %144 = vector.broadcast %cst_151 : f32 to vector<1x50xf32>
    %145 = arith.cmpf ogt, %143, %144 : vector<1x50xf32>
    %cst_152 = arith.constant 3.000000e-01 : f32
    %146 = vector.broadcast %cst_152 : f32 to vector<1x50xf32>
    %147 = arith.mulf %146, %143 : vector<1x50xf32>
    %148 = arith.select %145, %143, %147 : vector<1x50xi1>, vector<1x50xf32>
    %c0_153 = arith.constant 0 : index
    %c0_154 = arith.constant 0 : index
    %149 = vector.load %arg12[%c0_153, %c0_154] : memref<50x10xf32, #tpu.memory_space<vmem>>, vector<50x10xf32>
    %cst_155 = arith.constant dense<0.000000e+00> : vector<1x10xf32>
    %150 = tpu.matmul %148, %149, %cst_155 {dimension_numbers = #tpu.dot_dimension_numbers<[1], [0], [0], [1], [0, 0, 1, 1], [], []>} : vector<1x50xf32>, vector<50x10xf32>, vector<1x10xf32> -> vector<1x10xf32>
    %c0_156 = arith.constant 0 : index
    %c0_157 = arith.constant 0 : index
    %151 = vector.load %arg13[%c0_156, %c0_157] : memref<1x10xf32, #tpu.memory_space<vmem>>, vector<1x10xf32>
    %152 = arith.addf %150, %151 : vector<1x10xf32>
    %cst_158 = arith.constant 0.000000e+00 : f32
    %153 = vector.broadcast %cst_158 : f32 to vector<1x10xf32>
    %154 = arith.cmpf ogt, %152, %153 : vector<1x10xf32>
    %cst_159 = arith.constant 3.000000e-01 : f32
    %155 = vector.broadcast %cst_159 : f32 to vector<1x10xf32>
    %156 = arith.mulf %155, %152 : vector<1x10xf32>
    %157 = arith.select %154, %152, %156 : vector<1x10xi1>, vector<1x10xf32>
    %c0_160 = arith.constant 0 : index
    %c0_161 = arith.constant 0 : index
    %158 = vector.load %arg14[%c0_160, %c0_161] : memref<10x1xf32, #tpu.memory_space<vmem>>, vector<10x1xf32>
    %cst_162 = arith.constant dense<0.000000e+00> : vector<1x1xf32>
    %159 = tpu.matmul %157, %158, %cst_162 {dimension_numbers = #tpu.dot_dimension_numbers<[1], [0], [0], [1], [0, 0, 1, 1], [], []>} : vector<1x10xf32>, vector<10x1xf32>, vector<1x1xf32> -> vector<1x1xf32>
    %c0_163 = arith.constant 0 : index
    %c0_164 = arith.constant 0 : index
    %160 = vector.load %arg15[%c0_163, %c0_164] : memref<1x1xf32, #tpu.memory_space<vmem>>, vector<1x1xf32>
    %161 = arith.addf %159, %160 : vector<1x1xf32>
    %c0_165 = arith.constant 0 : index
    %c0_166 = arith.constant 0 : index
    %c0_167 = arith.constant 0 : index
    %162 = vector.load %arg16[%c0_165, %c0_166, %c0_167] : memref<1x1x1xf32, #tpu.memory_space<vmem>>, vector<1x1x1xf32>
    %163 = vector.shape_cast %162 : vector<1x1x1xf32> to vector<1x1xf32>
    %164 = vector.shape_cast %161 : vector<1x1xf32> to vector<1x1x1xf32>
    tpu.vector_store %arg16[%c0_165, %c0_166, %c0_167], %164 {strides = array<i32>} : memref<1x1x1xf32, #tpu.memory_space<vmem>>, vector<1x1x1xf32>,
    return
  }
  func.func @transform_0(%arg0: i32) -> (i32, i32, i32) {
    %c0_i32 = arith.constant 0 : i32
    %c0_i32_0 = arith.constant 0 : i32
    %c0_i32_1 = arith.constant 0 : i32
    return %arg0, %c0_i32, %c0_i32_0 : i32, i32, i32
  }
  func.func @transform_1(%arg0: i32) -> (i32, i32, i32) {
    %c0_i32 = arith.constant 0 : i32
    %c0_i32_0 = arith.constant 0 : i32
    %c0_i32_1 = arith.constant 0 : i32
    %c0_i32_2 = arith.constant 0 : i32
    return %c0_i32, %c0_i32_0, %c0_i32_1 : i32, i32, i32
  }
  func.func @transform_2(%arg0: i32) -> (i32, i32) {
    %c0_i32 = arith.constant 0 : i32
    %c0_i32_0 = arith.constant 0 : i32
    %c0_i32_1 = arith.constant 0 : i32
    return %c0_i32, %c0_i32_0 : i32, i32
  }
  func.func @transform_3(%arg0: i32) -> (i32, i32, i32) {
    %c0_i32 = arith.constant 0 : i32
    %c0_i32_0 = arith.constant 0 : i32
    %c0_i32_1 = arith.constant 0 : i32
    %c0_i32_2 = arith.constant 0 : i32
    return %c0_i32, %c0_i32_0, %c0_i32_1 : i32, i32, i32
  }
  func.func @transform_4(%arg0: i32) -> (i32, i32) {
    %c0_i32 = arith.constant 0 : i32
    %c0_i32_0 = arith.constant 0 : i32
    %c0_i32_1 = arith.constant 0 : i32
    return %c0_i32, %c0_i32_0 : i32, i32
  }
  func.func @transform_5(%arg0: i32) -> (i32, i32, i32) {
    %c0_i32 = arith.constant 0 : i32
    %c0_i32_0 = arith.constant 0 : i32
    %c0_i32_1 = arith.constant 0 : i32
    %c0_i32_2 = arith.constant 0 : i32
    return %c0_i32, %c0_i32_0, %c0_i32_1 : i32, i32, i32
  }
  func.func @transform_6(%arg0: i32) -> (i32, i32) {
    %c0_i32 = arith.constant 0 : i32
    %c0_i32_0 = arith.constant 0 : i32
    %c0_i32_1 = arith.constant 0 : i32
    return %c0_i32, %c0_i32_0 : i32, i32
  }
  func.func @transform_7(%arg0: i32) -> (i32, i32, i32) {
    %c0_i32 = arith.constant 0 : i32
    %c0_i32_0 = arith.constant 0 : i32
    %c0_i32_1 = arith.constant 0 : i32
    %c0_i32_2 = arith.constant 0 : i32
    return %c0_i32, %c0_i32_0, %c0_i32_1 : i32, i32, i32
  }
  func.func @transform_8(%arg0: i32) -> (i32, i32) {
    %c0_i32 = arith.constant 0 : i32
    %c0_i32_0 = arith.constant 0 : i32
    %c0_i32_1 = arith.constant 0 : i32
    return %c0_i32, %c0_i32_0 : i32, i32
  }
  func.func @transform_9(%arg0: i32) -> (i32, i32) {
    %c0_i32 = arith.constant 0 : i32
    %c0_i32_0 = arith.constant 0 : i32
    %c0_i32_1 = arith.constant 0 : i32
    return %c0_i32, %c0_i32_0 : i32, i32
  }
  func.func @transform_10(%arg0: i32) -> (i32, i32) {
    %c0_i32 = arith.constant 0 : i32
    %c0_i32_0 = arith.constant 0 : i32
    %c0_i32_1 = arith.constant 0 : i32
    return %c0_i32, %c0_i32_0 : i32, i32
  }
  func.func @transform_11(%arg0: i32) -> (i32, i32) {
    %c0_i32 = arith.constant 0 : i32
    %c0_i32_0 = arith.constant 0 : i32
    %c0_i32_1 = arith.constant 0 : i32
    return %c0_i32, %c0_i32_0 : i32, i32
  }
  func.func @transform_12(%arg0: i32) -> (i32, i32) {
    %c0_i32 = arith.constant 0 : i32
    %c0_i32_0 = arith.constant 0 : i32
    %c0_i32_1 = arith.constant 0 : i32
    return %c0_i32, %c0_i32_0 : i32, i32
  }
  func.func @transform_13(%arg0: i32) -> (i32, i32) {
    %c0_i32 = arith.constant 0 : i32
    %c0_i32_0 = arith.constant 0 : i32
    %c0_i32_1 = arith.constant 0 : i32
    return %c0_i32, %c0_i32_0 : i32, i32
  }
  func.func @transform_14(%arg0: i32) -> (i32, i32) {
    %c0_i32 = arith.constant 0 : i32
    %c0_i32_0 = arith.constant 0 : i32
    %c0_i32_1 = arith.constant 0 : i32
    return %c0_i32, %c0_i32_0 : i32, i32
  }
  func.func @transform_15(%arg0: i32) -> (i32, i32, i32) {
    %c0_i32 = arith.constant 0 : i32
    %c0_i32_0 = arith.constant 0 : i32
    %c0_i32_1 = arith.constant 0 : i32
    return %arg0, %c0_i32, %c0_i32_0 : i32, i32, i32
  }
}

</mosaic_0001>

<bundles_post_ra>
// kernel: metric_discriminator_forward.1
= control target key start
LH: loop header
LB: loop body
LE: loop exit
PB: predicated region body
PF: predicated region fallthrough
CT: control target
= control target key end

     0   :  { %s6668_s20 = smov 0   ;;  %s9684_s0 = inlined_call_operand.vmem [shape: f32[2,24,24], index: 0, kind: input, shape index: {}]   ;;  %s9685_s1 = inlined_call_operand.vmem [shape: f32[5,24,300], index: 1, kind: input, shape index: {}]   ;;  %s9686_s2 = inlined_call_operand.vmem [shape: f32[1,300], index: 2, kind: input, shape index: {}]   ;;  %s9687_s3 = inlined_call_operand.vmem [shape: f32[5,300,240], index: 3, kind: input, shape index: {}]   ;;  %s9688_s4 = inlined_call_operand.vmem [shape: f32[1,240], index: 4, kind: input, shape index: {}]   ;;  %s9689_s5 = inlined_call_operand.vmem [shape: f32[5,240,180], index: 5, kind: input, shape index: {}]   ;;  %s9690_s6 = inlined_call_operand.vmem [shape: f32[1,180], index: 6, kind: input, shape index: {}]   ;;  %s9691_s7 = inlined_call_operand.vmem [shape: f32[5,180,120], index: 7, kind: input, shape index: {}]   ;;  %s9692_s8 = inlined_call_operand.vmem [shape: f32[1,120], index: 8, kind: input, shape index: {}]   ;;  %s9693_s9 = inlined_call_operand.vmem [shape: f32[120,50], index: 9, kind: input, shape index: {}]   ;;  %s9694_s10 = inlined_call_operand.vmem [shape: f32[1,50], index: 10, kind: input, shape index: {}]   ;;  %s9695_s11 = inlined_call_operand.vmem [shape: f32[50,10], index: 11, kind: input, shape index: {}]   ;;  %s9696_s12 = inlined_call_operand.vmem [shape: f32[1,10], index: 12, kind: input, shape index: {}]   ;;  %s9697_s13 = inlined_call_operand.vmem [shape: f32[10,1], index: 13, kind: input, shape index: {}]   ;;  %s9698_s14 = inlined_call_operand.<no memory space> [shape: f32[1,1], index: 14, kind: input, shape index: {}]   ;;  %s9699_s15 = inlined_call_operand.vmem [shape: f32[2,1,1], index: 15, kind: output, shape index: {}]  }
   0x1   :  { %v20_v0 = vstv %s9698_s14 }
   0x2   :  { %21 = vst [vmem:[#allocation6] sm:$0x1] %v20_v0 }
   0x3 LB: > { %s4612_s21 = sadd.s32 4294967295, %s6579_s20   ;;  %p4616_p0 = scmp.ge.s32.totalorder %s6579_s20, 1  ;;  %s6579_s20 = sphi %s6668_s20, %s27_s20  }
   0x4   : > { %p439_p1 = scmp.lt.s32.totalorder %s6579_s20, 3 }
   0x6   : > { %p440_p2 = pnand %p4616_p0, %p439_p1 }
   0x7   : > { %v4619_v1 = vld [vmem:[%s9685_s1 + $0x50] sm:$0xff] (!%p440_p2)  ;;  %v4622_v2 = vld [vmem:[%s9685_s1 + $0x68] sm:$0xff] (!%p440_p2)  ;;  %v4620_v3 = vld [vmem:[%s9685_s1 + $0x58] sm:$0xff] (!%p440_p2)  ;;  %v6581_v4 = vmov (!%p440_p2), 0.0|0.0   ;;  %vm6582_vm0 = vmmov (!%p440_p2), 0   ;;  %v6583_v9 = vmov (!%p440_p2), 0.0  }
   0x8   : > { %443 = sbr.rel (%p440_p2) target bundleno = 2307 (0x903), region = 80  ;;  %5561 = vmatprep.subr.bf16.mxu1 (!%p440_p2), %v6581_v4  ;;  %v5557_v5 = vpack.c.bf16 (!%p440_p2), %v4622_v2, %v4619_v1  ;;  %v4623_v6 = vld [vmem:[%s9685_s1 + $0x70] sm:$0xff] (!%p440_p2)  ;;  %v4618_v7 = vld [vmem:[%s9685_s1 + $0x48] sm:$0xff] (!%p440_p2)  ;;  %v4621_v8 = vld [vmem:[%s9685_s1 + $0x60] sm:$0xff] (!%p440_p2)  ;;  %5431 = vmatprep.mubr.msk.f32.mxu1 (!%p440_p2), %vm6582_vm0, %v6583_v9  ;;  %p485_p3 = scmp.lt.s32.totalorder (!%p440_p2), %s4612_s21, 1  ;;  %vm518_vm1 = vcmask (!%p440_p2), 195584  }
   0x9   : > { %v5562_v10 = vpack.c.bf16 (!%p440_p2), %v4623_v6, %v4620_v3  ;;  %v5559_v11 = vpack.c.bf16 (!%p440_p2), %v4621_v8, %v4618_v7  ;;  %v4625_v12 = vld [vmem:[%s9685_s1 + $0x80] sm:$0xff] (!%p440_p2)  ;;  %592 = vmatprep.mubr.f32.mxu0 (!%p440_p2), %v6583_v9  ;;  %v497_v13 = vld [vmem:[%s9685_s1 + $0x8] sm:$0xff] (!%p440_p2)  ;;  %v499_v16 = vld [vmem:[%s9685_s1 + $0x18] sm:$0xff] (!%p440_p2)  ;;  %vm1500_vm3 = vcmask (!%p440_p2), 359424   ;;  %vm1507_vm9 = vcmask (!%p440_p2), 355328  }
   0xa   : > { %5558 = vmatprep.subr.bf16.mxu0 (!%p440_p2), %v5557_v5  ;;  %v500_v14 = vld [vmem:[%s9685_s1 + $0x20] sm:$0xff] (!%p440_p2)  ;;  %v4626_v17 = vld [vmem:[%s9685_s1 + $0x88] sm:$0xff] (!%p440_p2)  ;;  %v4624_v18 = vld [vmem:[%s9685_s1 + $0x78] sm:$0xff] (!%p440_p2)  ;;  %vm1683_vm10 = vcmask (!%p440_p2), 1046528   ;;  %vm1707_vm14 = vcmask (!%p440_p2), 1043456   ;;  %vm6584_vm15 = vmmov (!%p440_p2), 1  }
   0xb   : > { %5563 = vmatpush3.bf16.msra.mxu1 (!%p440_p2), %v5562_v10  ;;  %5560 = vmatpush1.bf16.msra.mxu0 (!%p440_p2), %v5559_v11  ;;  %v496_v15 = vld [vmem:[%s9685_s1] sm:$0xff] (!%p440_p2)  ;;  %v5564_v19 = vpack.c.bf16 (!%p440_p2), %v500_v14, %v497_v13  ;;  %v498_v21 = vld [vmem:[%s9685_s1 + $0x10] sm:$0xff] (!%p440_p2)  ;;  %v501_v22 = vld [vmem:[%s9685_s1 + $0x28] sm:$0xff] (!%p440_p2) }
   0xc   : > { %5429 = vmatprep.subr.mxu1 (!%p440_p2), %v6583_v9  ;;  %532 = vmatprep.subr.mxu0 (!%p440_p2), %v4625_v12  ;;  %v5566_v20 = vpack.c.bf16 (!%p440_p2), %v499_v16, %v496_v15  ;;  %v503_v24 = vld [vmem:[%s9685_s1 + $0x38] sm:$0xff] (!%p440_p2)  ;;  %v4643_v26 = vld [vmem:[%s9685_s1 + $0xb0] sm:$0xff] (!%p440_p2)  ;;  %v5569_v28 = vpack.c.bf16 (!%p440_p2), %v501_v22, %v498_v21  ;;  %v504_v32 = vld [vmem:[%s9685_s1 + $0x40] sm:$0xff] (!%p440_p2) }
   0xd   : > { %v4640_v25 = vld [vmem:[%s9685_s1 + $0x98] sm:$0xff] (!%p440_p2)  ;;  %v502_v29 = vld [vmem:[%s9685_s1 + $0x30] sm:$0xff] (!%p440_p2)  ;;  %v4642_v34 = vld [vmem:[%s9685_s1 + $0xa8] sm:$0xff] (!%p440_p2) }
   0xe   : > { %v5571_v30 = vpack.c.bf16 (!%p440_p2), %v4643_v26, %v4640_v25  ;;  %v4639_v33 = vld [vmem:[%s9685_s1 + $0x90] sm:$0xff] (!%p440_p2)  ;;  %v4641_v35 = vld [vmem:[%s9685_s1 + $0xa0] sm:$0xff] (!%p440_p2)  ;;  %v4644_v36 = vld [vmem:[%s9685_s1 + $0xb8] sm:$0xff] (!%p440_p2) }
   0xf   : > { %s9703_s21 = smov (!%p485_p3, %s4612_s21), 1  ;;  %5430 = vmatpush3.msra.mxu1 %v4626_v17  ;;  %533 = vmatpush1.msra.mxu0 %v4624_v18  ;;  %v5573_v38 = vpack.c.bf16 %v4642_v34, %v4639_v33  ;;  %v4646_v39 = vld [vmem:[%s9685_s1 + $0xc8] sm:$0xff]  ;;  %v5576_v40 = vpack.c.bf16 %v4644_v36, %v4641_v35  ;;  %v4655_v41 = vld [vmem:[%s9685_s1 + $0xe0] sm:$0xff]  ;;  %v4658_v42 = vld [vmem:[%s9685_s1 + $0xf8] sm:$0xff] }
  0x10   : > { %s6557_s18 = smul.u32 24, %s9703_s21  ;;  %5565 = vmatprep.subr.bf16.mxu0 %v5564_v19  ;;  %5568 = vmatprep.subr.bf16.mxu1 %v6581_v4  ;;  %v4645_v44 = vld [vmem:[%s9685_s1 + $0xc0] sm:$0xff]  ;;  %v5578_v45 = vpack.c.bf16 %v4658_v42, %v4655_v41  ;;  %v4647_v46 = vld [vmem:[%s9685_s1 + $0xd0] sm:$0xff]  ;;  %v4654_v48 = vld [vmem:[%s9685_s1 + $0xd8] sm:$0xff]  ;;  %s492_s22 = scalar_lea.vmem %s9699_s15, %s9703_s21 }
  0x11   : > { %v4657_v49 = vld [vmem:[%s9685_s1 + $0xf0] sm:$0xff]  ;;  %v4656_v50 = vld [vmem:[%s9685_s1 + $0xe8] sm:$0xff]  ;;  %v4659_v51 = vld [vmem:[%s9685_s1 + $0x100] sm:$0xff] }
  0x12   : > { %s6726_s23 = scalar_lea.vmem %s9684_s0, %s6557_s18  ;;  %v5580_v53 = vpack.c.bf16 %v4657_v49, %v4654_v48  ;;  %v4661_v54 = vld [vmem:[%s9685_s1 + $0x110] sm:$0xff]  ;;  %v5583_v55 = vpack.c.bf16 %v4659_v51, %v4656_v50  ;;  %v4670_v56 = vld [vmem:[%s9685_s1 + $0x128] sm:$0xff]  ;;  %v4673_v57 = vld [vmem:[%s9685_s1 + $0x140] sm:$0xff] }
  0x13   : > { %v505_v23 = vld [vmem:[%s6726_s23 + $0x1] sm:$0xff]  ;;  %v506_v27 = vld [vmem:[%s6726_s23 + $0x9] sm:$0xff]  ;;  %v507_v31 = vld [vmem:[%s6726_s23 + $0x11] sm:$0xf]  ;;  %v5585_v60 = vpack.c.bf16 %v4673_v57, %v4670_v56 }
  0x14   : > { %5432 = vmatmul.mubr.msk.f32.vlgmr.msra.gmra.mrb[0].mxu1 %vm518_vm1, %v505_v23  ;;  %4627 = vmatmul.mubr.msk.f32.vlgmr.msra.gmra.mrb[0].mxu0 %vm518_vm1, %v505_v23  ;;  %v493_v37 = vld [vmem:[%s6726_s23] sm:$0xff]  ;;  %v494_v43 = vld [vmem:[%s6726_s23 + $0x8] sm:$0xff]  ;;  %v495_v47 = vld [vmem:[%s6726_s23 + $0x10] sm:$0xf] }
  0x15   : > { %5434 = vmatprep.mubr.msk.f32.mxu1 %vm6582_vm0, %v6583_v9  ;;  %5567 = vmatpush1.bf16.msra.mxu0 %v5566_v20  ;;  %v863_v52 = vld [vmem:[%s6726_s23 + $0x2] sm:$0xff]  ;;  %v864_v58 = vld [vmem:[%s6726_s23 + $0xa] sm:$0xff]  ;;  %v4662_v61 = vld [vmem:[%s9685_s1 + $0x118] sm:$0xff] }
  0x16   : > { %598 = vmatprep.mubr.f32.mxu0 %v6583_v9  ;;  %704 = vmatprep.subr.mxu0 %v503_v24  ;;  %v4660_v59 = vld [vmem:[%s9685_s1 + $0x108] sm:$0xff]  ;;  %v865_v62 = vld [vmem:[%s6726_s23 + $0x12] sm:$0xf]  ;;  %v4669_v63 = vld [vmem:[%s9685_s1 + $0x120] sm:$0xff] }
  0x17   : > { %5570 = vmatpush3.bf16.msra.mxu1 %v5569_v28  ;;  %v4672_v0 = vld [vmem:[%s9685_s1 + $0x138] sm:$0xff]  ;;  %v4671_v1 = vld [vmem:[%s9685_s1 + $0x130] sm:$0xff]  ;;  %v4674_v2 = vld [vmem:[%s9685_s1 + $0x148] sm:$0xff] }
  0x18   : > { %5435 = vmatmul.mubr.msk.f32.gmra.mrb[2].mxu1 %vm518_vm1, %v506_v27  ;;  %4628 = vmatmul.mubr.msk.f32.gmra.mrb[2].mxu0 %vm518_vm1, %v506_v27  ;;  %v1057_v3 = vld [vmem:[%s6726_s23 + $0x3] sm:$0xff]  ;;  %v5587_v5 = vpack.c.bf16 %v4672_v0, %v4669_v63  ;;  %v4676_v6 = vld [vmem:[%s9685_s1 + $0x158] sm:$0xff]  ;;  %v5590_v7 = vpack.c.bf16 %v4674_v2, %v4671_v1  ;;  %v1058_v11 = vld [vmem:[%s6726_s23 + $0xb] sm:$0xff] }
  0x19   : > { %5437 = vmatprep.mubr.msk.f32.mxu1 %vm6582_vm0, %v6583_v9  ;;  %604 = vmatprep.mubr.f32.mxu0 %v6583_v9  ;;  %v4685_v8 = vld [vmem:[%s9687_s3 + $0x268] sm:$0xff]  ;;  %v4687_v10 = vld [vmem:[%s9687_s3 + $0x278] sm:$0xff]  ;;  %v4675_v12 = vld [vmem:[%s9685_s1 + $0x150] sm:$0xff] }
  0x1a   : > { %705 = vmatpush1.msra.mxu0 %v502_v29  ;;  %5444 = vmatprep.subr.mxu1 %v6583_v9  ;;  %v5592_v13 = vpack.c.bf16 %v4687_v10, %v4685_v8  ;;  %v4677_v14 = vld [vmem:[%s9685_s1 + $0x160] sm:$0xff]  ;;  %v1059_v15 = vld [vmem:[%s6726_s23 + $0x13] sm:$0xf]  ;;  %v4689_v22 = vld [vmem:[%s9687_s3 + $0x288] sm:$0xff] }
  0x1b   : > { %5572 = vmatprep.subr.bf16.mxu0 %v5571_v30  ;;  %5445 = vmatpush3.msra.mxu1 %v504_v32  ;;  %v1251_v16 = vld [vmem:[%s6726_s23 + $0x4] sm:$0xff]  ;;  %v1252_v17 = vld [vmem:[%s6726_s23 + $0xc] sm:$0xff]  ;;  %v1253_v18 = vld [vmem:[%s6726_s23 + $0x14] sm:$0xf] }
  0x1c   : > { %5438 = vmatmul.mubr.msk.f32.gmra.mrb[4].mxu1 %vm518_vm1, %v507_v31  ;;  %4629 = vmatmul.mubr.msk.f32.gmra.mrb[4].mxu0 %vm518_vm1, %v507_v31  ;;  %v4684_v19 = vld [vmem:[%s9687_s3 + $0x260] sm:$0xff]  ;;  %v4686_v20 = vld [vmem:[%s9687_s3 + $0x270] sm:$0xff]  ;;  %v4691_v23 = vld [vmem:[%s9687_s3 + $0x298] sm:$0xff] }
  0x1d   : > { %5446 = vmatprep.mubr.msk.f32.mxu1 %vm6582_vm0, %v6583_v9  ;;  %764 = vmatprep.mubr.f32.mxu0 %v6583_v9  ;;  %v5594_v21 = vpack.c.bf16 %v4686_v20, %v4684_v19  ;;  %v5596_v24 = vpack.c.bf16 %v4691_v23, %v4689_v22  ;;  %v4688_v25 = vld [vmem:[%s9687_s3 + $0x280] sm:$0xff]  ;;  %v4690_v26 = vld [vmem:[%s9687_s3 + $0x290] sm:$0xff]  ;;  %v4693_v28 = vld [vmem:[%s9687_s3 + $0x2a8] sm:$0xff] }
  0x1e   : > { %5575 = vmatprep.subr.bf16.mxu1 %v6581_v4  ;;  %v5598_v27 = vpack.c.bf16 %v4690_v26, %v4688_v25  ;;  %v4695_v29 = vld [vmem:[%s9687_s3 + $0x2b8] sm:$0xff]  ;;  %v4692_v31 = vld [vmem:[%s9687_s3 + $0x2a0] sm:$0xff]  ;;  %v4694_v32 = vld [vmem:[%s9687_s3 + $0x2b0] sm:$0xff] }
  0x1f   : > { %v5600_v30 = vpack.c.bf16 %v4695_v29, %v4693_v28  ;;  %v5602_v33 = vpack.c.bf16 %v4694_v32, %v4692_v31  ;;  %v4697_v34 = vld [vmem:[%s9687_s3 + $0x2c8] sm:$0xff]  ;;  %v4699_v35 = vld [vmem:[%s9687_s3 + $0x2d8] sm:$0xff]  ;;  %v4704_v49 = vld [vmem:[%s9687_s3 + $0x300] sm:$0xff] }
  0x20   : > { %5447 = vmatmul.mubr.msk.f32.vlgmr.msra.gmra.mrb[6].mxu1 %vm518_vm1, %v493_v37  ;;  %4633 = vmatmul.mubr.msk.f32.vlgmr.msra.gmra.mrb[0].mxu0 %vm518_vm1, %v493_v37  ;;  %v5604_v36 = vpack.c.bf16 %v4699_v35, %v4697_v34  ;;  %v4696_v37 = vld [vmem:[%s9687_s3 + $0x2c0] sm:$0xff]  ;;  %v4703_v41 = vld [vmem:[%s9687_s3 + $0x2f8] sm:$0xff]  ;;  %v4706_v50 = vld [vmem:[%s9687_s3 + $0x310] sm:$0xff] }
  0x21   : > { %5574 = vmatpush1.bf16.msra.mxu0 %v5573_v38  ;;  %5449 = vmatprep.mubr.msk.f32.mxu1 %vm6582_vm0, %v6583_v9  ;;  %v4698_v38 = vld [vmem:[%s9687_s3 + $0x2d0] sm:$0xff]  ;;  %v5614_v51 = vpack.c.bf16 %v4706_v50, %v4704_v49  ;;  %v4717_v0 = vld [vmem:[%s9687_s3 + $0x368] sm:$0xff]  ;;  %v4719_v1 = vld [vmem:[%s9687_s3 + $0x378] sm:$0xff] }
  0x22   : > { %770 = vmatprep.mubr.f32.mxu0 %v6583_v9  ;;  %889 = vmatprep.subr.mxu0 %v4646_v39  ;;  %v5606_v39 = vpack.c.bf16 %v4698_v38, %v4696_v37  ;;  %v4710_v56 = vld [vmem:[%s9687_s3 + $0x330] sm:$0xff]  ;;  %v5624_v2 = vpack.c.bf16 %v4719_v1, %v4717_v0  ;;  %v4723_v8 = vld [vmem:[%s9687_s3 + $0x398] sm:$0xff]  ;;  %v4729_v20 = vld [vmem:[%s9687_s3 + $0x3c8] sm:$0xff] }
  0x23   : > { %5577 = vmatpush3.bf16.msra.mxu1 %v5576_v40  ;;  %v4701_v40 = vld [vmem:[%s9687_s3 + $0x2e8] sm:$0xff]  ;;  %v4728_v23 = vld [vmem:[%s9687_s3 + $0x3c0] sm:$0xff] }
  0x24   : > { %5450 = vmatmul.mubr.msk.f32.gmra.mrb[8].mxu1 %vm518_vm1, %v494_v43  ;;  %4634 = vmatmul.mubr.msk.f32.gmra.mrb[2].mxu0 %vm518_vm1, %v494_v43  ;;  %v5608_v42 = vpack.c.bf16 %v4703_v41, %v4701_v40  ;;  %v4700_v43 = vld [vmem:[%s9687_s3 + $0x2e0] sm:$0xff]  ;;  %v4733_v26 = vld [vmem:[%s9687_s3 + $0x3e8] sm:$0xff] }
  0x25   : > { %5452 = vmatprep.mubr.msk.f32.mxu1 %vm6582_vm0, %v6583_v9  ;;  %776 = vmatprep.mubr.f32.mxu0 %v6583_v9  ;;  %v4732_v29 = vld [vmem:[%s9687_s3 + $0x3e0] sm:$0xff]  ;;  %v4737_v32 = vld [vmem:[%s9687_s3 + $0x408] sm:$0xff] }
  0x26   : > { %890 = vmatpush1.msra.mxu0 %v4645_v44  ;;  %5459 = vmatprep.subr.mxu1 %v6583_v9  ;;  %v4702_v44 = vld [vmem:[%s9687_s3 + $0x2f0] sm:$0xff]  ;;  %v4736_v35 = vld [vmem:[%s9687_s3 + $0x400] sm:$0xff]  ;;  %v4741_v38 = vld [vmem:[%s9687_s3 + $0x428] sm:$0xff] }
  0x27   : > { %5460 = vmatpush3.msra.mxu1 %v4647_v46  ;;  %5579 = vmatprep.subr.bf16.mxu0 %v5578_v45  ;;  %v5610_v45 = vpack.c.bf16 %v4702_v44, %v4700_v43  ;;  %v4705_v46 = vld [vmem:[%s9687_s3 + $0x308] sm:$0xff]  ;;  %v4740_v41 = vld [vmem:[%s9687_s3 + $0x420] sm:$0xff] }
  0x28   : > { %5453 = vmatmul.mubr.msk.f32.gmra.mrb[10].mxu1 %vm518_vm1, %v495_v47  ;;  %4635 = vmatmul.mubr.msk.f32.gmra.mrb[4].mxu0 %vm518_vm1, %v495_v47  ;;  %v4707_v47 = vld [vmem:[%s9687_s3 + $0x318] sm:$0xff]  ;;  %v4745_v44 = vld [vmem:[%s9687_s3 + $0x448] sm:$0xff] }
  0x29   : > { %5461 = vmatprep.mubr.msk.f32.mxu1 %vm6582_vm0, %v6583_v9  ;;  %949 = vmatprep.mubr.f32.mxu0 %v6583_v9  ;;  %v5612_v48 = vpack.c.bf16 %v4707_v47, %v4705_v46  ;;  %v4744_v47 = vld [vmem:[%s9687_s3 + $0x440] sm:$0xff]  ;;  %v4749_v50 = vld [vmem:[%s9687_s3 + $0x468] sm:$0xff] }
  0x2a   : > { %5582 = vmatprep.subr.bf16.mxu1 %v6581_v4 }
  0x2c   : > { %5462 = vmatmul.mubr.msk.f32.vlgmr.msra.gmra.mrb[12].mxu1 %vm518_vm1, %v863_v52  ;;  %4648 = vmatmul.mubr.msk.f32.vlgmr.msra.gmra.mrb[0].mxu0 %vm518_vm1, %v863_v52  ;;  %v4709_v52 = vld [vmem:[%s9687_s3 + $0x328] sm:$0xff] }
  0x2d   : > { %5581 = vmatpush1.bf16.msra.mxu0 %v5580_v53  ;;  %5464 = vmatprep.mubr.msk.f32.mxu1 %vm6582_vm0, %v6583_v9  ;;  %v4711_v53 = vld [vmem:[%s9687_s3 + $0x338] sm:$0xff] }
  0x2e   : > { %955 = vmatprep.mubr.f32.mxu0 %v6583_v9  ;;  %1083 = vmatprep.subr.mxu0 %v4661_v54  ;;  %v5616_v54 = vpack.c.bf16 %v4711_v53, %v4709_v52 }
  0x2f   : > { %5584 = vmatpush3.bf16.msra.mxu1 %v5583_v55  ;;  %v4708_v55 = vld [vmem:[%s9687_s3 + $0x320] sm:$0xff] }
  0x30   : > { %5465 = vmatmul.mubr.msk.f32.gmra.mrb[14].mxu1 %vm518_vm1, %v864_v58  ;;  %4649 = vmatmul.mubr.msk.f32.gmra.mrb[2].mxu0 %vm518_vm1, %v864_v58  ;;  %v5618_v57 = vpack.c.bf16 %v4710_v56, %v4708_v55  ;;  %v4713_v58 = vld [vmem:[%s9687_s3 + $0x348] sm:$0xff] }
  0x31   : > { %5467 = vmatprep.mubr.msk.f32.mxu1 %vm6582_vm0, %v6583_v9  ;;  %961 = vmatprep.mubr.f32.mxu0 %v6583_v9 }
  0x32   : > { %1084 = vmatpush1.msra.mxu0 %v4660_v59  ;;  %5474 = vmatprep.subr.mxu1 %v6583_v9  ;;  %v4715_v59 = vld [vmem:[%s9687_s3 + $0x358] sm:$0xff] }
  0x33   : > { %5475 = vmatpush3.msra.mxu1 %v4662_v61  ;;  %5586 = vmatprep.subr.bf16.mxu0 %v5585_v60  ;;  %v5620_v60 = vpack.c.bf16 %v4715_v59, %v4713_v58  ;;  %v4712_v61 = vld [vmem:[%s9687_s3 + $0x340] sm:$0xff] }
  0x34   : > { %5468 = vmatmul.mubr.msk.f32.gmra.mrb[16].mxu1 %vm518_vm1, %v865_v62  ;;  %4650 = vmatmul.mubr.msk.f32.gmra.mrb[4].mxu0 %vm518_vm1, %v865_v62  ;;  %v4714_v62 = vld [vmem:[%s9687_s3 + $0x350] sm:$0xff] }
  0x35   : > { %5476 = vmatprep.mubr.msk.f32.mxu1 %vm6582_vm0, %v6583_v9  ;;  %1143 = vmatprep.mubr.f32.mxu0 %v6583_v9  ;;  %v5622_v63 = vpack.c.bf16 %v4714_v62, %v4712_v61 }
  0x36   : > { %5589 = vmatprep.subr.bf16.mxu1 %v6581_v4 }
  0x38   : > { %5477 = vmatmul.mubr.msk.f32.vlgmr.msra.gmra.mrb[18].mxu1 %vm518_vm1, %v1057_v3  ;;  %4663 = vmatmul.mubr.msk.f32.vlgmr.msra.gmra.mrb[0].mxu0 %vm518_vm1, %v1057_v3  ;;  %v4716_v3 = vld [vmem:[%s9687_s3 + $0x360] sm:$0xff] }
  0x39   : > { %5588 = vmatpush1.bf16.msra.mxu0 %v5587_v5  ;;  %5479 = vmatprep.mubr.msk.f32.mxu1 %vm6582_vm0, %v6583_v9  ;;  %v4718_v5 = vld [vmem:[%s9687_s3 + $0x370] sm:$0xff] }
  0x3a   : > { %1149 = vmatprep.mubr.f32.mxu0 %v6583_v9  ;;  %1277 = vmatprep.subr.mxu0 %v4676_v6  ;;  %v5626_v6 = vpack.c.bf16 %v4718_v5, %v4716_v3 }
  0x3b   : > { %5591 = vmatpush3.bf16.msra.mxu1 %v5590_v7  ;;  %v4721_v7 = vld [vmem:[%s9687_s3 + $0x388] sm:$0xff] }
  0x3c   : > { %5480 = vmatmul.mubr.msk.f32.gmra.mrb[20].mxu1 %vm518_vm1, %v1058_v11  ;;  %4664 = vmatmul.mubr.msk.f32.gmra.mrb[2].mxu0 %vm518_vm1, %v1058_v11  ;;  %v5628_v10 = vpack.c.bf16 %v4723_v8, %v4721_v7  ;;  %v4720_v11 = vld [vmem:[%s9687_s3 + $0x380] sm:$0xff] }
  0x3d   : > { %5482 = vmatprep.mubr.msk.f32.mxu1 %vm6582_vm0, %v6583_v9  ;;  %1155 = vmatprep.mubr.f32.mxu0 %v6583_v9 }
  0x3e   : > { %1278 = vmatpush1.msra.mxu0 %v4675_v12  ;;  %5489 = vmatprep.subr.mxu1 %v6583_v9  ;;  %v4722_v12 = vld [vmem:[%s9687_s3 + $0x390] sm:$0xff] }
  0x3f   : > { %5490 = vmatpush3.msra.mxu1 %v4677_v14  ;;  %5593 = vmatprep.subr.bf16.mxu0 %v5592_v13  ;;  %v5630_v13 = vpack.c.bf16 %v4722_v12, %v4720_v11  ;;  %v4725_v14 = vld [vmem:[%s9687_s3 + $0x3a8] sm:$0xff] }
  0x40   : > { %5483 = vmatmul.mubr.msk.f32.gmra.mrb[22].mxu1 %vm518_vm1, %v1059_v15  ;;  %4665 = vmatmul.mubr.msk.f32.gmra.mrb[4].mxu0 %vm518_vm1, %v1059_v15  ;;  %v4727_v15 = vld [vmem:[%s9687_s3 + $0x3b8] sm:$0xff] }
  0x41   : > { %5491 = vmatprep.mubr.msk.f32.mxu1 %vm6582_vm0, %v6583_v9  ;;  %1337 = vmatprep.mubr.f32.mxu0 %v6583_v9 }
  0x44   : > { %5492 = vmatmul.mubr.msk.f32.vlgmr.msra.gmra.mrb[24].mxu1 %vm518_vm1, %v1251_v16  ;;  %4678 = vmatmul.mubr.msk.f32.vlgmr.msra.gmra.mrb[0].mxu0 %vm518_vm1, %v1251_v16  ;;  %v5632_v16 = vpack.c.bf16 %v4727_v15, %v4725_v14  ;;  %v1447_v15 = vlaneseq }
  0x45   : > { %5494 = vmatprep.mubr.msk.f32.mxu1 %vm6582_vm0, %v6583_v9  ;;  %1343 = vmatprep.mubr.f32.mxu0 %v6583_v9 }
  0x46   : > { %5595 = vmatpush1.bf16.msra.mxu0 %v5594_v21  ;;  %v4731_v21 = vld [vmem:[%s9687_s3 + $0x3d8] sm:$0xff] }
  0x47   : > { %5597 = vmatprep.subr.bf16.mxu0 %v5596_v24  ;;  %v5636_v22 = vpack.c.bf16 %v4731_v21, %v4729_v20  ;;  %v4730_v24 = vld [vmem:[%s9687_s3 + $0x3d0] sm:$0xff] }
  0x48   : > { %5495 = vmatmul.mubr.msk.f32.gmra.mrb[26].mxu1 %vm518_vm1, %v1252_v17  ;;  %4679 = vmatmul.mubr.msk.f32.gmra.mrb[2].mxu0 %vm518_vm1, %v1252_v17  ;;  %v4724_v17 = vld [vmem:[%s9687_s3 + $0x3a0] sm:$0xff]  ;;  %v5638_v25 = vpack.c.bf16 %v4730_v24, %v4728_v23 }
  0x49   : > { %5497 = vmatprep.mubr.msk.f32.mxu1 %vm6582_vm0, %v6583_v9  ;;  %1349 = vmatprep.mubr.f32.mxu0 %v6583_v9  ;;  %v1445_v24 = vld [vmem:[%s9686_s2] sm:$0x7] }
  0x4a   : > { %5599 = vmatpush1.bf16.msra.mxu0 %v5598_v27  ;;  %v4735_v27 = vld [vmem:[%s9687_s3 + $0x3f8] sm:$0xff] }
  0x4b   : > { %5601 = vmatprep.subr.bf16.mxu0 %v5600_v30  ;;  %v5640_v28 = vpack.c.bf16 %v4735_v27, %v4733_v26  ;;  %v4734_v30 = vld [vmem:[%s9687_s3 + $0x3f0] sm:$0xff] }
  0x4c   : > { %5498 = vmatmul.mubr.msk.f32.gmra.mrb[28].mxu1 %vm518_vm1, %v1253_v18  ;;  %4680 = vmatmul.mubr.msk.f32.gmra.mrb[4].mxu0 %vm518_vm1, %v1253_v18  ;;  %v4726_v18 = vld [vmem:[%s9687_s3 + $0x3b0] sm:$0xff]  ;;  %v5642_v31 = vpack.c.bf16 %v4734_v30, %v4732_v29  ;;  %vm7174_vm1 = vmpackc.low %vm1707_vm14, %vm6584_vm15 }
  0x4d   : > { %v5634_v19 = vpack.c.bf16 %v4726_v18, %v4724_v17 }
  0x4e   : > { %5603 = vmatpush1.bf16.msra.mxu0 %v5602_v33  ;;  %v4739_v33 = vld [vmem:[%s9687_s3 + $0x418] sm:$0xff] }
  0x4f   : > { %5605 = vmatprep.subr.bf16.mxu0 %v5604_v36  ;;  %v5644_v34 = vpack.c.bf16 %v4739_v33, %v4737_v32  ;;  %v4738_v36 = vld [vmem:[%s9687_s3 + $0x410] sm:$0xff] }
  0x50   : > { %v5646_v37 = vpack.c.bf16 %v4738_v36, %v4736_v35 }
  0x52   : > { %5607 = vmatpush1.bf16.msra.mxu0 %v5606_v39  ;;  %v4743_v39 = vld [vmem:[%s9687_s3 + $0x438] sm:$0xff] }
  0x53   : > { %5609 = vmatprep.subr.bf16.mxu0 %v5608_v42  ;;  %v5648_v40 = vpack.c.bf16 %v4743_v39, %v4741_v38  ;;  %v4742_v42 = vld [vmem:[%s9687_s3 + $0x430] sm:$0xff] }
  0x54   : > { %v5650_v43 = vpack.c.bf16 %v4742_v42, %v4740_v41 }
  0x56   : > { %5611 = vmatpush1.bf16.msra.mxu0 %v5610_v45  ;;  %v4747_v45 = vld [vmem:[%s9687_s3 + $0x458] sm:$0xff] }
  0x57   : > { %5613 = vmatprep.subr.bf16.mxu0 %v5612_v48  ;;  %v5652_v46 = vpack.c.bf16 %v4747_v45, %v4745_v44  ;;  %v4746_v48 = vld [vmem:[%s9687_s3 + $0x450] sm:$0xff] }
  0x58   : > { %v5654_v49 = vpack.c.bf16 %v4746_v48, %v4744_v47 }
  0x5a   : > { %5615 = vmatpush1.bf16.msra.mxu0 %v5614_v51  ;;  %v4751_v51 = vld [vmem:[%s9687_s3 + $0x478] sm:$0xff] }
  0x5b   : > { %5617 = vmatprep.subr.bf16.mxu0 %v5616_v54  ;;  %v5656_v52 = vpack.c.bf16 %v4751_v51, %v4749_v50 }
  0x5e   : > { %5619 = vmatpush1.bf16.msra.mxu0 %v5618_v57 }
  0x5f   : > { %5621 = vmatprep.subr.bf16.mxu0 %v5620_v60 }
  0x62   : > { %5623 = vmatpush1.bf16.msra.mxu0 %v5622_v63 }
  0x63   : > { %5625 = vmatprep.subr.bf16.mxu0 %v5624_v2 }
  0x66   : > { %5627 = vmatpush1.bf16.msra.mxu0 %v5626_v6 }
  0x67   : > { %5629 = vmatprep.subr.bf16.mxu0 %v5628_v10 }
  0x6a   : > { %5631 = vmatpush1.bf16.msra.mxu0 %v5630_v13 }
  0x6b   : > { %5633 = vmatprep.subr.bf16.mxu0 %v5632_v16 }
  0x6e   : > { %5635 = vmatpush1.bf16.msra.mxu0 %v5634_v19  ;;  %v1448_v19 = vshrl.u32 %v1447_v15, 7 }
  0x6f   : > { %5637 = vmatprep.subr.bf16.mxu0 %v5636_v22 }
  0x70   : > { %v7117_v23 = vsub.s32 0, %v1448_v19  ;;  %v1457_v26 = vsub.s32 2, %v1448_v19 }
  0x72   : > { %5639 = vmatpush1.bf16.msra.mxu0 %v5638_v25  ;;  %v7122_v25 = vsub.s32 1, %v1448_v19  ;;  %v1450_v30 = vrot.slane %v1445_v24, %v7117_v23  ;;  %v1458_v32 = vrot.slane %v1445_v24, %v1457_v26 }
  0x73   : > { %5641 = vmatprep.subr.bf16.mxu0 %v5640_v28 }
  0x76   : > { %5643 = vmatpush1.bf16.msra.mxu0 %v5642_v31  ;;  %v1454_v31 = vrot.slane %v1445_v24, %v7122_v25 }
  0x77   : > { %5645 = vmatprep.subr.bf16.mxu0 %v5644_v34 }
  0x7a   : > { %5647 = vmatpush1.bf16.msra.mxu0 %v5646_v37 }
  0x7b   : > { %5649 = vmatprep.subr.bf16.mxu0 %v5648_v40 }
  0x7e   : > { %5651 = vmatpush1.bf16.msra.mxu0 %v5650_v43 }
  0x7f   : > { %5653 = vmatprep.subr.bf16.mxu0 %v5652_v46 }
  0x82   : > { %5655 = vmatpush1.bf16.msra.mxu0 %v5654_v49 }
  0x83   : > { %5657 = vmatprep.subr.bf16.mxu0 %v5656_v52 }
  0xe7   : > { %v677_v53 = vpop.f32.mrb[0].mxu1 }
  0xe8   : > { %v5433_v54 = vpop.f32.mrb[1].mxu1 }
  0xeb   : > { %v682_v55 = vpop.f32.mrb[2].mxu1 }
  0xec   : > { %v5436_v56 = vpop.f32.mrb[3].mxu1 }
  0xef   : > { %v687_v57 = vpop.f32.mrb[4].mxu1 }
  0xf0   : > { %v5439_v58 = vpop.f32.mrb[5].mxu1 }
  0xf3   : > { %v849_v59 = vpop.f32.mrb[6].mxu1 }
  0xf4   : > { %v850_v60 = vadd.f32 %v849_v59, %v677_v53  ;;  %v5448_v61 = vpop.f32.mrb[7].mxu1 }
  0xf7   : > { %v854_v62 = vpop.f32.mrb[8].mxu1 }
  0xf8   : > { %v855_v63 = vadd.f32 %v854_v62, %v682_v55  ;;  %v5451_v0 = vpop.f32.mrb[9].mxu1 }
  0xfb   : > { %v859_v1 = vpop.f32.mrb[10].mxu1 }
  0xfc   : > { %v860_v2 = vadd.f32 %v859_v1, %v687_v57  ;;  %v5454_v3 = vpop.f32.mrb[11].mxu1 }
  0xff   : > { %v1034_v5 = vpop.f32.mrb[12].mxu1 }
 0x100   : > { %v1050_v6 = vadd.f32 %v1034_v5, %v850_v60  ;;  %v5463_v7 = vpop.f32.mrb[13].mxu1 }
 0x101   : > { %v4748_v7 = vld [vmem:[%s9687_s3 + $0x460] sm:$0xff] }
 0x103   : > { %v1039_v8 = vpop.f32.mrb[14].mxu1 }
 0x104   : > { %v1053_v10 = vadd.f32 %v1039_v8, %v855_v63  ;;  %v5466_v11 = vpop.f32.mrb[15].mxu1  ;;  %v4750_v8 = vld [vmem:[%s9687_s3 + $0x470] sm:$0xff] }
 0x105   : > { %v5658_v24 = vpack.c.bf16 %v4750_v8, %v4748_v7  ;;  %v1523_v8 = vld [vmem:[%s9687_s3 + $0x40] sm:$0xff] }
 0x107   : > { %v1044_v12 = vpop.f32.mrb[16].mxu1 }
 0x108   : > { %v1056_v13 = vadd.f32 %v1044_v12, %v860_v2  ;;  %v5469_v14 = vpop.f32.mrb[17].mxu1 }
 0x10b   : > { %v1228_v16 = vpop.f32.mrb[18].mxu1 }
 0x10c   : > { %v1244_v17 = vadd.f32 %v1228_v16, %v1050_v6  ;;  %v5478_v18 = vpop.f32.mrb[19].mxu1 }
 0x10f   : > { %v1233_v20 = vpop.f32.mrb[20].mxu1 }
 0x110   : > { %v1247_v21 = vadd.f32 %v1233_v20, %v1053_v10  ;;  %v5481_v22 = vpop.f32.mrb[21].mxu1  ;;  %v4753_v10 = vld [vmem:[%s9687_s3 + $0x488] sm:$0xff] }
 0x113   : > { %v1238_v27 = vpop.f32.mrb[22].mxu1 }
 0x114   : > { %v1250_v28 = vadd.f32 %v1238_v27, %v1056_v13  ;;  %v5484_v29 = vpop.f32.mrb[23].mxu1  ;;  %v4755_v13 = vld [vmem:[%s9687_s3 + $0x498] sm:$0xff] }
 0x115   : > { %v5660_v27 = vpack.c.bf16 %v4755_v13, %v4753_v10  ;;  %v4754_v29 = vld [vmem:[%s9687_s3 + $0x490] sm:$0xff]  ;;  %v1530_v13 = vld [vmem:[%s9687_s3 + $0x78] sm:$0xff] }
 0x116   : > { %v1525_v10 = vld [vmem:[%s9687_s3 + $0x50] sm:$0xff] }
 0x117   : > { %v1422_v33 = vpop.f32.mrb[24].mxu1  ;;  %v1339_v34 = vpop.f32.mrb[0].mxu0 }
 0x118   : > { %v1438_v35 = vadd.f32 %v1422_v33, %v1244_v17  ;;  %v1462_v36 = vadd.f32 %v1450_v30, %v1339_v34  ;;  %v1341_v37 = vpop.f32.mrb[1].mxu0  ;;  %v5493_v38 = vpop.f32.mrb[25].mxu1 }
 0x119   : > { %v1463_v39 = vadd.f32 %v1454_v31, %v1341_v37  ;;  %v4758_v38 = vld [vmem:[%s9687_s3 + $0x4b0] sm:$0xf]  ;;  %v5051_v37 = vld [vmem:[%s9689_s5 + $0x338] sm:$0xff] }
 0x11a   : > { %v1464_v40 = vadd.f32 %v1458_v32, %v1438_v35  ;;  %vm1471_vm2 = vcmp.gt.f32.partialorder %v1462_v36, 0.0  ;;  %v1480_v41 = vmul.f32 0.3, %v1462_v36  ;;  %v4756_v35 = vld [vmem:[%s9687_s3 + $0x4a0] sm:$0xff] }
 0x11b   : > { %vm1472_vm4 = vcmp.gt.f32.partialorder %v1463_v39, 0.0  ;;  %v1481_v42 = vmul.f32 0.3, %v1463_v39  ;;  %v1427_v43 = vpop.f32.mrb[26].mxu1  ;;  %v1345_v44 = vpop.f32.mrb[2].mxu0 }
 0x11c   : > { %vm1473_vm5 = vcmp.gt.f32.partialorder %v1464_v40, 0.0  ;;  %v1482_v45 = vmul.f32 0.3, %v1464_v40  ;;  %v7126_v46 = vsel %vm1471_vm2, %v1462_v36, %v1480_v41  ;;  %v1441_v47 = vadd.f32 %v1427_v43, %v1247_v21  ;;  %v1347_v48 = vpop.f32.mrb[3].mxu0  ;;  %v5496_v49 = vpop.f32.mrb[27].mxu1  ;;  %v1516_v41 = vld [vmem:[%s9687_s3 + $0x8] sm:$0xff] }
 0x11d   : > { %1498 = vst [vmem:[#allocation2] sm:$0xff] %v7126_v46  ;;  %v7129_v50 = vsel %vm1472_vm4, %v1463_v39, %v1481_v42  ;;  %v1465_v51 = vadd.f32 %v1450_v30, %v1345_v44  ;;  %v1466_v52 = vadd.f32 %v1454_v31, %v1347_v48  ;;  %v1518_v42 = vld [vmem:[%s9687_s3 + $0x18] sm:$0xff]  ;;  %vm2122_vm2 = vcmask 1045504  }
 0x11e   : > { %v1491_v53 = vsel %vm1473_vm5, %v1464_v40, %v1482_v45  ;;  %1499 = vst [vmem:[#allocation2 + $0x8] sm:$0xff] %v7129_v50  ;;  %v1467_v54 = vadd.f32 %v1458_v32, %v1441_v47  ;;  %v5667_v45 = vpack.c.bf16 %v4758_v38, %v4756_v35  ;;  %v5670_v49 = vpack.c.bf16 %v1518_v42, %v1516_v41  ;;  %v1539_v35 = vld [vmem:[%s9687_s3 + $0xc0] sm:$0xff]  ;;  %v1544_v38 = vld [vmem:[%s9687_s3 + $0xe8] sm:$0xff] }
 0x11f   : > { %1501 = vst.msk [vmem:[#allocation2 + $0x10] sm:$0xff] %vm1500_vm3, %v1491_v53  ;;  %vm1474_vm6 = vcmp.gt.f32.partialorder %v1465_v51, 0.0  ;;  %v1483_v55 = vmul.f32 0.3, %v1465_v51  ;;  %vm1475_vm7 = vcmp.gt.f32.partialorder %v1466_v52, 0.0  ;;  %v1432_v58 = vpop.f32.mrb[28].mxu1 }
 0x120   : > { %v1484_v56 = vmul.f32 0.3, %v1466_v52  ;;  %vm1476_vm8 = vcmp.gt.f32.partialorder %v1467_v54, 0.0  ;;  %v1485_v57 = vmul.f32 0.3, %v1467_v54  ;;  %v1351_v59 = vpop.f32.mrb[4].mxu0  ;;  %v1444_v62 = vadd.f32 %v1432_v58, %v1250_v28 }
 0x121   : > { %v7133_v60 = vsel %vm1474_vm6, %v1465_v51, %v1483_v55  ;;  %v1468_v63 = vadd.f32 %v1450_v30, %v1351_v59  ;;  %v1353_v0 = vpop.f32.mrb[5].mxu0  ;;  %v5499_v1 = vpop.f32.mrb[29].mxu1  ;;  %v4752_v28 = vld [vmem:[%s9687_s3 + $0x480] sm:$0xff]  ;;  %v1520_v55 = vld [vmem:[%s9687_s3 + $0x28] sm:$0xff]  ;;  %vm2399_vm4 = vcmask 1044480   ;;  %vm2892_vm6 = vcmask 916480  }
 0x122   : > { %v7135_v61 = vsel %vm1475_vm7, %v1466_v52, %v1484_v56  ;;  %v1494_v2 = vsel %vm1476_vm8, %v1467_v54, %v1485_v57  ;;  %1502 = vst [vmem:[#allocation2 + $0x18] sm:$0xff] %v7133_v60  ;;  %v1469_v3 = vadd.f32 %v1454_v31, %v1353_v0  ;;  %v1470_v5 = vadd.f32 %v1458_v32, %v1444_v62  ;;  %v4757_v31 = vld [vmem:[%s9687_s3 + $0x4a8] sm:$0xff]  ;;  %v4759_v32 = vld [vmem:[%s9687_s3 + $0x4b8] sm:$0xf]  ;;  %v1515_v51 = vld [vmem:[%s9687_s3] sm:$0xff] }
 0x123   : > { %1503 = vst [vmem:[#allocation2 + $0x20] sm:$0xff] %v7135_v61  ;;  %1504 = vst.msk [vmem:[#allocation2 + $0x28] sm:$0xff] %vm1500_vm3, %v1494_v2  ;;  %vm1477_vm11 = vcmp.gt.f32.partialorder %v1468_v63, 0.0  ;;  %v1486_v6 = vmul.f32 0.3, %v1468_v63  ;;  %v1688_v20 = vrot.slane %v7135_v61, 1  ;;  %v5662_v33 = vpack.c.bf16 %v4754_v29, %v4752_v28 }
 0x124   : > { %vm1478_vm12 = vcmp.gt.f32.partialorder %v1469_v3, 0.0  ;;  %v1487_v11 = vmul.f32 0.3, %v1469_v3  ;;  %v1591_v12 = vld [vmem:[#allocation2] sm:$0xfe]  ;;  %vm1479_vm13 = vcmp.gt.f32.partialorder %v1470_v5, 0.0  ;;  %v5664_v34 = vpack.c.bf16 %v4759_v32, %v4757_v31 }
 0x125   : > { %v1488_v14 = vmul.f32 0.3, %v1470_v5  ;;  %v1495_v15 = vsel %vm1477_vm11, %v1468_v63, %v1486_v6  ;;  %v1592_v16 = vld [vmem:[#allocation2 + $0x8] sm:$0xfe]  ;;  %v1684_v17 = vrot.slane %v1591_v12, 1  ;;  %v1685_v22 = vrot.slane %v7133_v60, 1 }
 0x126   : > { %1505 = vst [vmem:[#allocation2 + $0x30] sm:$0xf] %v1495_v15  ;;  %v1496_v18 = vsel %vm1478_vm12, %v1469_v3, %v1487_v11  ;;  %v1687_v19 = vrot.slane %v1592_v16, 1  ;;  %v1593_v48 = vld [vmem:[#allocation2 + $0x10] sm:$0xfe]  ;;  %v1522_v56 = vld [vmem:[%s9687_s3 + $0x38] sm:$0xff] }
 0x127   : > { %v1497_v21 = vsel %vm1479_vm13, %v1470_v5, %v1488_v14  ;;  %1506 = vst [vmem:[#allocation2 + $0x38] sm:$0xf] %v1496_v18  ;;  %v1686_v30 = vsel %vm1683_vm10, %v1684_v17, %v1685_v22  ;;  %v1517_v52 = vld [vmem:[%s9687_s3 + $0x10] sm:$0xff]  ;;  %v1690_v58 = vrot.slane %v1593_v48, 1  ;;  %v5674_v62 = vpack.c.bf16 %v1522_v56, %v1520_v55  ;;  %v1519_v63 = vld [vmem:[%s9687_s3 + $0x20] sm:$0xff]  ;;  %v1524_v3 = vld [vmem:[%s9687_s3 + $0x48] sm:$0xff] }
 0x128   : > { %1508 = vst.msk [vmem:[#allocation2 + $0x40] sm:$0xf] %vm1507_vm9, %v1497_v21  ;;  %v1689_v26 = vsel %vm1683_vm10, %v1687_v19, %v1688_v20  ;;  %v5672_v59 = vpack.c.bf16 %v1517_v52, %v1515_v51  ;;  %v1521_v0 = vld [vmem:[%s9687_s3 + $0x30] sm:$0xff]  ;;  %v1526_v5 = vld [vmem:[%s9687_s3 + $0x58] sm:$0xff]  ;;  %v1528_v12 = vld [vmem:[%s9687_s3 + $0x68] sm:$0xff]  ;;  %v5680_v14 = vpack.c.bf16 %v1525_v10, %v1523_v8  ;;  %vm3716_vm12 = vcmask 424960  }
 0x129   : > { %1778 = vmatprep.mubr.f32.mxu0 %v1689_v26  ;;  %v5676_v6 = vpack.c.bf16 %v1521_v0, %v1519_v63  ;;  %v5678_v7 = vpack.c.bf16 %v1526_v5, %v1524_v3  ;;  %v5682_v15 = vpack.c.bf16 %v1530_v13, %v1528_v12  ;;  %v1527_v16 = vld [vmem:[%s9687_s3 + $0x60] sm:$0xff]  ;;  %v1529_v17 = vld [vmem:[%s9687_s3 + $0x70] sm:$0xff]  ;;  %v1532_v18 = vld [vmem:[%s9687_s3 + $0x88] sm:$0xff] }
 0x12a   : > { %1779 = vmatmul.mubr.f32.vlgmr.msra.gmra.mrb[6].mxu0 %v1686_v30  ;;  %v7187_v44 = vld [vmem:[#allocation2 + $0x28] sm:$0xff]  ;;  %v1534_v19 = vld [vmem:[%s9687_s3 + $0x98] sm:$0xff]  ;;  %v1531_v21 = vld [vmem:[%s9687_s3 + $0x80] sm:$0xff] }
 0x12b   : > { %5659 = vmatpush1.bf16.msra.mxu0 %v5658_v24  ;;  %v1691_v54 = vrot.slane %v7187_v44, 1  ;;  %v1536_v24 = vld [vmem:[%s9687_s3 + $0xa8] sm:$0xff]  ;;  %v1538_v26 = vld [vmem:[%s9687_s3 + $0xb8] sm:$0xff]  ;;  %v1535_v29 = vld [vmem:[%s9687_s3 + $0xa0] sm:$0xff] }
 0x12c   : > { %5661 = vmatprep.subr.bf16.mxu0 %v5660_v27  ;;  %v5690_v28 = vpack.c.bf16 %v1538_v26, %v1536_v24  ;;  %v1537_v30 = vld [vmem:[%s9687_s3 + $0xb0] sm:$0xff]  ;;  %v1540_v31 = vld [vmem:[%s9687_s3 + $0xc8] sm:$0xff]  ;;  %v1542_v32 = vld [vmem:[%s9687_s3 + $0xd8] sm:$0xff] }
 0x12d   : > { %v1594_v36 = vld [vmem:[#allocation2 + $0x30] sm:$0x1]  ;;  %v1692_v1 = vsel %vm1683_vm10, %v1690_v58, %v1691_v54  ;;  %v1543_v42 = vld [vmem:[%s9687_s3 + $0xe0] sm:$0xff]  ;;  %v1560_v3 = vld [vmem:[%s9687_s3 + $0x168] sm:$0xff] }
 0x12e   : > { %v1595_v39 = vld [vmem:[#allocation2 + $0x38] sm:$0x1]  ;;  %v1693_v40 = vrot.slane %v1594_v36, 1  ;;  %v1541_v36 = vld [vmem:[%s9687_s3 + $0xd0] sm:$0xff]  ;;  %v1547_v51 = vld [vmem:[%s9687_s3 + $0x100] sm:$0xff] }
 0x12f   : > { %v1695_v43 = vrot.slane %v1595_v39, 1  ;;  %5663 = vmatpush1.bf16.msra.mxu0 %v5662_v33  ;;  %v1596_v57 = vld [vmem:[#allocation2 + $0x40] sm:$0x1]  ;;  %v5692_v33 = vpack.c.bf16 %v1537_v30, %v1535_v29  ;;  %v1546_v39 = vld [vmem:[%s9687_s3 + $0xf8] sm:$0xff]  ;;  %v1549_v52 = vld [vmem:[%s9687_s3 + $0x110] sm:$0xff] }
 0x130   : > { %5666 = vmatprep.subr.msk.bf16.mxu0 %vm7174_vm1, %v5664_v34  ;;  %v1694_v53 = vsel %vm1683_vm10, %v1685_v22, %v1693_v40  ;;  %v1697_v2 = vrot.slane %v1596_v57, 1  ;;  %v1533_v22 = vld [vmem:[%s9687_s3 + $0x90] sm:$0xff]  ;;  %v5694_v34 = vpack.c.bf16 %v1542_v32, %v1540_v31  ;;  %v5696_v40 = vpack.c.bf16 %v1541_v36, %v1539_v35  ;;  %v1551_v57 = vld [vmem:[%s9687_s3 + $0x120] sm:$0xff]  ;;  %v1562_v5 = vld [vmem:[%s9687_s3 + $0x178] sm:$0xff] }
 0x131   : > { %v1696_v47 = vsel %vm1683_vm10, %v1688_v20, %v1695_v43  ;;  %v5686_v20 = vpack.c.bf16 %v1534_v19, %v1532_v18  ;;  %v5688_v27 = vpack.c.bf16 %v1533_v22, %v1531_v21  ;;  %v5698_v41 = vpack.c.bf16 %v1546_v39, %v1544_v38  ;;  %v1545_v43 = vld [vmem:[%s9687_s3 + $0xf0] sm:$0xff]  ;;  %v1559_v8 = vld [vmem:[%s9687_s3 + $0x160] sm:$0xff]  ;;  %v1566_v12 = vld [vmem:[%s9687_s3 + $0x198] sm:$0xff] }
 0x132   : > { %1784 = vmatprep.mubr.f32.mxu0 %v1696_v47  ;;  %v1698_v11 = vsel %vm1683_vm10, %v1691_v54, %v1697_v2  ;;  %v1550_v47 = vld [vmem:[%s9687_s3 + $0x118] sm:$0xff]  ;;  %v5700_v48 = vpack.c.bf16 %v1545_v43, %v1543_v42  ;;  %v5704_v55 = vpack.c.bf16 %v1549_v52, %v1547_v51  ;;  %v1553_v58 = vld [vmem:[%s9687_s3 + $0x130] sm:$0xff]  ;;  %v1572_v22 = vld [vmem:[%s9687_s3 + $0x1c8] sm:$0xff] }
 0x133   : > { %1785 = vmatmul.mubr.f32.gmra.mrb[8].mxu0 %v1694_v53  ;;  %v1552_v53 = vld [vmem:[%s9687_s3 + $0x128] sm:$0xff]  ;;  %v1554_v54 = vld [vmem:[%s9687_s3 + $0x138] sm:$0xff]  ;;  %v5708_v63 = vpack.c.bf16 %v1553_v58, %v1551_v57  ;;  %v1557_v2 = vld [vmem:[%s9687_s3 + $0x150] sm:$0xff] }
 0x134   : > { %5669 = vmatpush1.bf16.msk.msra.mxu0 %vm7174_vm1, %v5667_v45  ;;  %1855 = vmatprep.mubr.f32.mxu0 %v6583_v9  ;;  %v1548_v45 = vld [vmem:[%s9687_s3 + $0x108] sm:$0xff]  ;;  %v5706_v56 = vpack.c.bf16 %v1554_v54, %v1552_v53  ;;  %v1561_v10 = vld [vmem:[%s9687_s3 + $0x170] sm:$0xff]  ;;  %v1570_v18 = vld [vmem:[%s9687_s3 + $0x1b8] sm:$0xff] }
 0x135   : > { %5671 = vmatprep.subr.bf16.mxu0 %v5670_v49  ;;  %v5702_v49 = vpack.c.bf16 %v1550_v47, %v1548_v45  ;;  %v5716_v13 = vpack.c.bf16 %v1561_v10, %v1559_v8  ;;  %v1569_v21 = vld [vmem:[%s9687_s3 + $0x1b0] sm:$0xff]  ;;  %v1574_v24 = vld [vmem:[%s9687_s3 + $0x1d8] sm:$0xff]  ;;  %v1576_v30 = vld [vmem:[%s9687_s3 + $0x1e8] sm:$0xff] }
 0x136   : > { %v1573_v29 = vld [vmem:[%s9687_s3 + $0x1d0] sm:$0xff]  ;;  %v1578_v31 = vld [vmem:[%s9687_s3 + $0x1f8] sm:$0xff]  ;;  %v1580_v36 = vld [vmem:[%s9687_s3 + $0x208] sm:$0xff] }
 0x137   : > { %4762 = vmatmul.mubr.msk.f32.vlgmr.msra.gmra.mrb[6].mxu0 %vm1500_vm3, %v1692_v1  ;;  %v1555_v1 = vld [vmem:[%s9687_s3 + $0x140] sm:$0xff]  ;;  %v1577_v35 = vld [vmem:[%s9687_s3 + $0x1f0] sm:$0xff]  ;;  %v1582_v38 = vld [vmem:[%s9687_s3 + $0x218] sm:$0xff] }
 0x138   : > { %5673 = vmatpush1.bf16.msra.mxu0 %v5672_v59  ;;  %1861 = vmatprep.mubr.f32.mxu0 %v6583_v9  ;;  %v1556_v59 = vld [vmem:[%s9687_s3 + $0x148] sm:$0xff]  ;;  %v1581_v42 = vld [vmem:[%s9687_s3 + $0x210] sm:$0xff]  ;;  %v1586_v45 = vld [vmem:[%s9687_s3 + $0x238] sm:$0xff] }
 0x139   : > { %5675 = vmatprep.subr.bf16.mxu0 %v5674_v62  ;;  %v1558_v62 = vld [vmem:[%s9687_s3 + $0x158] sm:$0xff]  ;;  %v1584_v43 = vld [vmem:[%s9687_s3 + $0x228] sm:$0xff]  ;;  %v1585_v51 = vld [vmem:[%s9687_s3 + $0x230] sm:$0xff] }
 0x13a   : > { %v5710_v0 = vpack.c.bf16 %v1558_v62, %v1556_v59  ;;  %v1588_v52 = vld [vmem:[%s9687_s3 + $0x248] sm:$0xff]  ;;  %v1590_v53 = vld [vmem:[%s9687_s3 + $0x258] sm:$0xf]  ;;  %v1589_v57 = vld [vmem:[%s9687_s3 + $0x250] sm:$0xf] }
 0x13b   : > { %4763 = vmatmul.mubr.msk.f32.gmra.mrb[8].mxu0 %vm1500_vm3, %v1698_v11  ;;  %v1564_v11 = vld [vmem:[%s9687_s3 + $0x188] sm:$0xff]  ;;  %v4774_v8 = vld [vmem:[%s9687_s3 + $0x4f0] sm:$0xff] }
 0x13c   : > { %5677 = vmatpush1.bf16.msra.mxu0 %v5676_v6  ;;  %1943 = vmatprep.mubr.f32.mxu0 %v7129_v50  ;;  %v5684_v50 = vpack.c.bf16 %v1529_v17, %v1527_v16  ;;  %v5712_v6 = vpack.c.bf16 %v1557_v2, %v1555_v1  ;;  %v1565_v16 = vld [vmem:[%s9687_s3 + $0x190] sm:$0xff]  ;;  %v1568_v17 = vld [vmem:[%s9687_s3 + $0x1a8] sm:$0xff]  ;;  %v4775_v2 = vld [vmem:[%s9687_s3 + $0x4f8] sm:$0xff] }
 0x13d   : > { %5679 = vmatprep.subr.bf16.mxu0 %v5678_v7  ;;  %v5714_v7 = vpack.c.bf16 %v1562_v5, %v1560_v3  ;;  %v4769_v58 = vld [vmem:[%s9687_s3 + $0x4c8] sm:$0xff]  ;;  %v1511_v10 = vld [vmem:[#allocation2 + $0x10] sm:$0xff] }
 0x13e   : > { %v4773_v1 = vld [vmem:[%s9687_s3 + $0x4e8] sm:$0xff] }
 0x13f   : > { %v2034_v5 = vld [vmem:[#allocation2 + $0x8] sm:$0xfc] }
 0x140   : > { %5681 = vmatpush1.bf16.msra.mxu0 %v5680_v14  ;;  %v5718_v14 = vpack.c.bf16 %v1566_v12, %v1564_v11  ;;  %v4777_v11 = vld [vmem:[%s9687_s3 + $0x508] sm:$0xff]  ;;  %v4779_v12 = vld [vmem:[%s9687_s3 + $0x518] sm:$0xff] }
 0x141   : > { %5683 = vmatprep.subr.bf16.mxu0 %v5682_v15  ;;  %v1563_v15 = vld [vmem:[%s9687_s3 + $0x180] sm:$0xff] }
 0x142   : > { %v5720_v19 = vpack.c.bf16 %v1565_v16, %v1563_v15  ;;  %v2127_v15 = vrot.slane %v7135_v61, 2  ;;  %v5756_v16 = vpack.c.bf16 %v4779_v12, %v4777_v11  ;;  %v4810_v11 = vld [vmem:[%s9687_s3 + $0x610] sm:$0xff]  ;;  %v4813_v12 = vld [vmem:[%s9687_s3 + $0x628] sm:$0xff] }
 0x144   : > { %5685 = vmatpush1.bf16.msra.mxu0 %v5684_v50  ;;  %v5722_v50 = vpack.c.bf16 %v1570_v18, %v1568_v17  ;;  %v4776_v17 = vld [vmem:[%s9687_s3 + $0x500] sm:$0xff]  ;;  %v4778_v18 = vld [vmem:[%s9687_s3 + $0x510] sm:$0xff] }
 0x145   : > { %5687 = vmatprep.subr.bf16.mxu0 %v5686_v20  ;;  %v1567_v20 = vld [vmem:[%s9687_s3 + $0x1a0] sm:$0xff] }
 0x146   : > { %v5724_v26 = vpack.c.bf16 %v1569_v21, %v1567_v20  ;;  %v5758_v21 = vpack.c.bf16 %v4778_v18, %v4776_v17  ;;  %v4812_v17 = vld [vmem:[%s9687_s3 + $0x620] sm:$0xff]  ;;  %v4814_v18 = vld [vmem:[%s9687_s3 + $0x630] sm:$0xff] }
 0x148   : > { %5689 = vmatpush1.bf16.msra.mxu0 %v5688_v27  ;;  %v5726_v27 = vpack.c.bf16 %v1574_v24, %v1572_v22  ;;  %v4780_v24 = vld [vmem:[%s9687_s3 + $0x520] sm:$0xff] }
 0x149   : > { %5691 = vmatprep.subr.bf16.mxu0 %v5690_v28  ;;  %v1571_v28 = vld [vmem:[%s9687_s3 + $0x1c0] sm:$0xff] }
 0x14a   : > { %v5728_v32 = vpack.c.bf16 %v1573_v29, %v1571_v28  ;;  %v4787_v28 = vld [vmem:[%s9687_s3 + $0x558] sm:$0xff] }
 0x14c   : > { %5693 = vmatpush1.bf16.msra.mxu0 %v5692_v33  ;;  %v5730_v33 = vpack.c.bf16 %v1578_v31, %v1576_v30  ;;  %v4784_v31 = vld [vmem:[%s9687_s3 + $0x540] sm:$0xff] }
 0x14d   : > { %5695 = vmatprep.subr.bf16.mxu0 %v5694_v34  ;;  %v1575_v34 = vld [vmem:[%s9687_s3 + $0x1e0] sm:$0xff] }
 0x14e   : > { %v5732_v39 = vpack.c.bf16 %v1577_v35, %v1575_v34  ;;  %v4791_v34 = vld [vmem:[%s9687_s3 + $0x578] sm:$0xff] }
 0x150   : > { %5697 = vmatpush1.bf16.msra.mxu0 %v5696_v40  ;;  %v5734_v40 = vpack.c.bf16 %v1582_v38, %v1580_v36  ;;  %v4788_v38 = vld [vmem:[%s9687_s3 + $0x560] sm:$0xff] }
 0x151   : > { %5699 = vmatprep.subr.bf16.mxu0 %v5698_v41  ;;  %v1579_v41 = vld [vmem:[%s9687_s3 + $0x200] sm:$0xff] }
 0x152   : > { %v5736_v47 = vpack.c.bf16 %v1581_v42, %v1579_v41  ;;  %v4795_v41 = vld [vmem:[%s9687_s3 + $0x598] sm:$0xff] }
 0x154   : > { %5701 = vmatpush1.bf16.msra.mxu0 %v5700_v48  ;;  %v5738_v48 = vpack.c.bf16 %v1586_v45, %v1584_v43  ;;  %v4792_v45 = vld [vmem:[%s9687_s3 + $0x580] sm:$0xff] }
 0x155   : > { %5703 = vmatprep.subr.bf16.mxu0 %v5702_v49  ;;  %v1583_v49 = vld [vmem:[%s9687_s3 + $0x220] sm:$0xff] }
 0x156   : > { %v5740_v54 = vpack.c.bf16 %v1585_v51, %v1583_v49  ;;  %v4799_v49 = vld [vmem:[%s9687_s3 + $0x5b8] sm:$0xff] }
 0x158   : > { %5705 = vmatpush1.bf16.msra.mxu0 %v5704_v55  ;;  %v5742_v55 = vpack.c.bf16 %v1590_v53, %v1588_v52  ;;  %v4796_v53 = vld [vmem:[%s9687_s3 + $0x5a0] sm:$0xff] }
 0x159   : > { %5707 = vmatprep.subr.bf16.mxu0 %v5706_v56  ;;  %v1587_v56 = vld [vmem:[%s9687_s3 + $0x240] sm:$0xff] }
 0x15a   : > { %v5745_v59 = vpack.c.bf16 %v1589_v57, %v1587_v56  ;;  %v4803_v56 = vld [vmem:[%s9687_s3 + $0x5d8] sm:$0xff] }
 0x15c   : > { %5709 = vmatpush1.bf16.msra.mxu0 %v5708_v63  ;;  %v4768_v63 = vld [vmem:[%s9687_s3 + $0x4c0] sm:$0xff] }
 0x15d   : > { %5711 = vmatprep.subr.bf16.mxu0 %v5710_v0  ;;  %v4770_v0 = vld [vmem:[%s9687_s3 + $0x4d0] sm:$0xff] }
 0x15e   : > { %v5750_v3 = vpack.c.bf16 %v4770_v0, %v4768_v63  ;;  %v4807_v63 = vld [vmem:[%s9687_s3 + $0x5f8] sm:$0xff] }
 0x160   : > { %5713 = vmatpush1.bf16.msra.mxu0 %v5712_v6  ;;  %v5752_v6 = vpack.c.bf16 %v4775_v2, %v4773_v1  ;;  %v4804_v2 = vld [vmem:[%s9687_s3 + $0x5e0] sm:$0xff] }
 0x161   : > { %5715 = vmatprep.subr.bf16.mxu0 %v5714_v7  ;;  %v4772_v7 = vld [vmem:[%s9687_s3 + $0x4e0] sm:$0xff] }
 0x164   : > { %5717 = vmatpush1.bf16.msra.mxu0 %v5716_v13  ;;  %v2126_v13 = vrot.slane %v2034_v5, 2  ;;  %v4809_v5 = vld [vmem:[%s9687_s3 + $0x608] sm:$0xff] }
 0x165   : > { %5719 = vmatprep.subr.bf16.mxu0 %v5718_v14  ;;  %v5754_v14 = vpack.c.bf16 %v4774_v8, %v4772_v7 }
 0x166   : > { %v2128_v20 = vsel %vm2122_vm2, %v2126_v13, %v2127_v15  ;;  %v4815_v13 = vld [vmem:[%s9687_s3 + $0x638] sm:$0xff] }
 0x168   : > { %5721 = vmatpush1.bf16.msra.mxu0 %v5720_v19  ;;  %v4781_v19 = vld [vmem:[%s9687_s3 + $0x528] sm:$0xff] }
 0x169   : > { %5723 = vmatprep.subr.bf16.mxu0 %v5722_v50  ;;  %v4783_v50 = vld [vmem:[%s9687_s3 + $0x538] sm:$0xff] }
 0x16a   : > { %v5760_v22 = vpack.c.bf16 %v4783_v50, %v4781_v19  ;;  %v4817_v19 = vld [vmem:[%s9687_s3 + $0x648] sm:$0xff]  ;;  %v4819_v50 = vld [vmem:[%s9687_s3 + $0x658] sm:$0xff] }
 0x16c   : > { %5725 = vmatpush1.bf16.msra.mxu0 %v5724_v26  ;;  %v4782_v26 = vld [vmem:[%s9687_s3 + $0x530] sm:$0xff] }
 0x16d   : > { %5727 = vmatprep.subr.bf16.mxu0 %v5726_v27  ;;  %v4785_v27 = vld [vmem:[%s9687_s3 + $0x548] sm:$0xff]  ;;  %v5762_v29 = vpack.c.bf16 %v4782_v26, %v4780_v24  ;;  %v4818_v24 = vld [vmem:[%s9687_s3 + $0x650] sm:$0xff] }
 0x16e   : > { %v5764_v30 = vpack.c.bf16 %v4787_v28, %v4785_v27  ;;  %v4821_v26 = vld [vmem:[%s9687_s3 + $0x668] sm:$0xff]  ;;  %v4823_v27 = vld [vmem:[%s9687_s3 + $0x678] sm:$0xff] }
 0x170   : > { %5729 = vmatpush1.bf16.msra.mxu0 %v5728_v32  ;;  %v4786_v32 = vld [vmem:[%s9687_s3 + $0x550] sm:$0xff] }
 0x171   : > { %5731 = vmatprep.subr.bf16.mxu0 %v5730_v33  ;;  %v4789_v33 = vld [vmem:[%s9687_s3 + $0x568] sm:$0xff]  ;;  %v5766_v35 = vpack.c.bf16 %v4786_v32, %v4784_v31  ;;  %v4822_v31 = vld [vmem:[%s9687_s3 + $0x670] sm:$0xff] }
 0x172   : > { %v5768_v36 = vpack.c.bf16 %v4791_v34, %v4789_v33  ;;  %v4825_v32 = vld [vmem:[%s9687_s3 + $0x688] sm:$0xff]  ;;  %v4827_v33 = vld [vmem:[%s9687_s3 + $0x698] sm:$0xff] }
 0x174   : > { %5733 = vmatpush1.bf16.msra.mxu0 %v5732_v39  ;;  %v4790_v39 = vld [vmem:[%s9687_s3 + $0x570] sm:$0xff] }
 0x175   : > { %5735 = vmatprep.subr.bf16.mxu0 %v5734_v40  ;;  %v4793_v40 = vld [vmem:[%s9687_s3 + $0x588] sm:$0xff]  ;;  %v5770_v42 = vpack.c.bf16 %v4790_v39, %v4788_v38  ;;  %v4826_v38 = vld [vmem:[%s9687_s3 + $0x690] sm:$0xff] }
 0x176   : > { %v5772_v43 = vpack.c.bf16 %v4795_v41, %v4793_v40  ;;  %v4829_v39 = vld [vmem:[%s9687_s3 + $0x6a8] sm:$0xff]  ;;  %v4831_v40 = vld [vmem:[%s9687_s3 + $0x6b8] sm:$0xff] }
 0x177   : > { %1944 = vmatmul.mubr.f32.vlgmr.msra.gmra.mrb[6].mxu0 %v7126_v46  ;;  %v4771_v46 = vld [vmem:[%s9687_s3 + $0x4d8] sm:$0xff] }
 0x178   : > { %1949 = vmatprep.mubr.f32.mxu0 %v7135_v61  ;;  %5737 = vmatpush1.bf16.msra.mxu0 %v5736_v47  ;;  %v5748_v62 = vpack.c.bf16 %v4771_v46, %v4769_v58  ;;  %v4794_v47 = vld [vmem:[%s9687_s3 + $0x590] sm:$0xff]  ;;  %v4800_v46 = vld [vmem:[%s9687_s3 + $0x5c0] sm:$0xff] }
 0x179   : > { %5739 = vmatprep.subr.bf16.mxu0 %v5738_v48  ;;  %v4797_v48 = vld [vmem:[%s9687_s3 + $0x5a8] sm:$0xff]  ;;  %v5774_v51 = vpack.c.bf16 %v4794_v47, %v4792_v45  ;;  %v4830_v45 = vld [vmem:[%s9687_s3 + $0x6b0] sm:$0xff] }
 0x17a   : > { %v5776_v52 = vpack.c.bf16 %v4799_v49, %v4797_v48  ;;  %v4833_v47 = vld [vmem:[%s9687_s3 + $0x6c8] sm:$0xff]  ;;  %v4835_v48 = vld [vmem:[%s9687_s3 + $0x6d8] sm:$0xff]  ;;  %v2033_v49 = vld [vmem:[#allocation2] sm:$0xfc] }
 0x17b   : > { %1950 = vmatmul.mubr.f32.gmra.mrb[8].mxu0 %v7133_v60 }
 0x17c   : > { %5741 = vmatpush1.bf16.msra.mxu0 %v5740_v54  ;;  %2020 = vmatprep.mubr.f32.mxu0 %v6583_v9  ;;  %v4798_v54 = vld [vmem:[%s9687_s3 + $0x5b0] sm:$0xff] }
 0x17d   : > { %5744 = vmatprep.subr.msk.bf16.mxu0 %vm7174_vm1, %v5742_v55  ;;  %v4801_v55 = vld [vmem:[%s9687_s3 + $0x5c8] sm:$0xff]  ;;  %v5778_v57 = vpack.c.bf16 %v4798_v54, %v4796_v53  ;;  %v5812_v53 = vpack.c.bf16 %v4835_v48, %v4833_v47  ;;  %v4832_v54 = vld [vmem:[%s9687_s3 + $0x6c0] sm:$0xff] }
 0x17e   : > { %v5780_v58 = vpack.c.bf16 %v4803_v56, %v4801_v55  ;;  %v4834_v55 = vld [vmem:[%s9687_s3 + $0x6d0] sm:$0xff]  ;;  %v2123_v56 = vrot.slane %v2033_v49, 2 }
 0x180   : > { %5747 = vmatpush1.bf16.msk.msra.mxu0 %vm7174_vm1, %v5745_v59  ;;  %v4802_v59 = vld [vmem:[%s9687_s3 + $0x5d0] sm:$0xff] }
 0x181   : > { %5749 = vmatprep.subr.bf16.mxu0 %v5748_v62  ;;  %v4805_v62 = vld [vmem:[%s9687_s3 + $0x5e8] sm:$0xff]  ;;  %v5782_v0 = vpack.c.bf16 %v4802_v59, %v4800_v46  ;;  %v2036_v59 = vld [vmem:[#allocation2 + $0x30] sm:$0x3] }
 0x182   : > { %v5784_v1 = vpack.c.bf16 %v4807_v63, %v4805_v62  ;;  %v2124_v62 = vrot.slane %v7133_v60, 2  ;;  %v5814_v63 = vpack.c.bf16 %v4834_v55, %v4832_v54  ;;  %v4843_v60 = vld [vmem:[%s9687_s3 + $0x718] sm:$0xf] }
 0x183   : > { %4766 = vmatmul.mubr.msk.f32.vlgmr.msra.gmra.mrb[6].mxu0 %vm1500_vm3, %v1511_v10  ;;  %v4808_v10 = vld [vmem:[%s9687_s3 + $0x600] sm:$0xff]  ;;  %v4867_v54 = vld [vmem:[%s9687_s3 + $0x7b8] sm:$0xff] }
 0x184   : > { %5751 = vmatpush1.bf16.msra.mxu0 %v5750_v3  ;;  %2026 = vmatprep.mubr.f32.mxu0 %v6583_v9  ;;  %v4806_v3 = vld [vmem:[%s9687_s3 + $0x5f0] sm:$0xff] }
 0x185   : > { %5753 = vmatprep.subr.bf16.mxu0 %v5752_v6  ;;  %v4811_v6 = vld [vmem:[%s9687_s3 + $0x618] sm:$0xff]  ;;  %v5786_v7 = vpack.c.bf16 %v4806_v3, %v4804_v2  ;;  %v4838_v2 = vld [vmem:[%s9687_s3 + $0x6f0] sm:$0xff]  ;;  %v2125_v3 = vsel %vm2122_vm2, %v2123_v56, %v2124_v62 }
 0x186   : > { %v5788_v8 = vpack.c.bf16 %v4811_v6, %v4809_v5  ;;  %v2132_v5 = vrot.slane %v2036_v59, 2  ;;  %v4841_v6 = vld [vmem:[%s9687_s3 + $0x708] sm:$0xff]  ;;  %v4871_v59 = vld [vmem:[%s9687_s3 + $0x7d8] sm:$0xff] }
 0x187   : > { %4767 = vmatmul.mubr.msk.f32.gmra.mrb[8].mxu0 %vm1500_vm3, %v7187_v44 }
 0x188   : > { %5755 = vmatpush1.bf16.msra.mxu0 %v5754_v14  ;;  %2216 = vmatprep.mubr.f32.mxu0 %v2128_v20  ;;  %v5790_v14 = vpack.c.bf16 %v4810_v11, %v4808_v10  ;;  %v5794_v20 = vpack.c.bf16 %v4814_v18, %v4812_v17  ;;  %v5820_v10 = vpack.c.bf16 %v4843_v60, %v4841_v6  ;;  %v4840_v11 = vld [vmem:[%s9687_s3 + $0x700] sm:$0xff]  ;;  %v2035_v17 = vld [vmem:[#allocation2 + $0x10] sm:$0xfc] }
 0x189   : > { %5757 = vmatprep.subr.bf16.mxu0 %v5756_v16  ;;  %v5792_v16 = vpack.c.bf16 %v4815_v13, %v4813_v12  ;;  %v4842_v12 = vld [vmem:[%s9687_s3 + $0x710] sm:$0xf]  ;;  %v2133_v13 = vsel %vm2122_vm2, %v2124_v62, %v2132_v5  ;;  %v4872_v60 = vld [vmem:[%s9687_s3 + $0x7e0] sm:$0xff] }
 0x18c   : > { %5759 = vmatpush1.bf16.msra.mxu0 %v5758_v21  ;;  %v5796_v21 = vpack.c.bf16 %v4819_v50, %v4817_v19  ;;  %v4848_v19 = vld [vmem:[%s9687_s3 + $0x720] sm:$0xff]  ;;  %v4850_v50 = vld [vmem:[%s9687_s3 + $0x730] sm:$0xff] }
 0x18d   : > { %5761 = vmatprep.subr.bf16.mxu0 %v5760_v22  ;;  %v4816_v22 = vld [vmem:[%s9687_s3 + $0x640] sm:$0xff] }
 0x18e   : > { %v5798_v28 = vpack.c.bf16 %v4818_v24, %v4816_v22  ;;  %v4855_v22 = vld [vmem:[%s9687_s3 + $0x758] sm:$0xff]  ;;  %v2038_v24 = vld [vmem:[#allocation2 + $0x40] sm:$0x3] }
 0x190   : > { %5763 = vmatpush1.bf16.msra.mxu0 %v5762_v29  ;;  %v5800_v29 = vpack.c.bf16 %v4823_v27, %v4821_v26  ;;  %v2129_v26 = vrot.slane %v2035_v17, 2  ;;  %v5828_v27 = vpack.c.bf16 %v4850_v50, %v4848_v19  ;;  %v4880_v19 = vld [vmem:[%s9687_s3 + $0x820] sm:$0xff]  ;;  %v4882_v50 = vld [vmem:[%s9687_s3 + $0x830] sm:$0xff] }
 0x191   : > { %5765 = vmatprep.subr.bf16.mxu0 %v5764_v30  ;;  %v4820_v30 = vld [vmem:[%s9687_s3 + $0x660] sm:$0xff] }
 0x192   : > { %v5802_v34 = vpack.c.bf16 %v4822_v31, %v4820_v30  ;;  %v4854_v30 = vld [vmem:[%s9687_s3 + $0x750] sm:$0xff] }
 0x194   : > { %5767 = vmatpush1.bf16.msra.mxu0 %v5766_v35  ;;  %v5804_v35 = vpack.c.bf16 %v4827_v33, %v4825_v32  ;;  %v2136_v32 = vrot.slane %v2038_v24, 2  ;;  %v4857_v33 = vld [vmem:[%s9687_s3 + $0x768] sm:$0xff]  ;;  %v4886_v24 = vld [vmem:[%s9687_s3 + $0x850] sm:$0xff] }
 0x195   : > { %5769 = vmatprep.subr.bf16.mxu0 %v5768_v36  ;;  %v4824_v36 = vld [vmem:[%s9687_s3 + $0x680] sm:$0xff] }
 0x196   : > { %v5806_v41 = vpack.c.bf16 %v4826_v38, %v4824_v36  ;;  %v2404_v38 = vrot.slane %v7135_v61, 3 }
 0x198   : > { %5771 = vmatpush1.bf16.msra.mxu0 %v5770_v42  ;;  %v5808_v42 = vpack.c.bf16 %v4831_v40, %v4829_v39  ;;  %v4856_v40 = vld [vmem:[%s9687_s3 + $0x760] sm:$0xff] }
 0x199   : > { %5773 = vmatprep.subr.bf16.mxu0 %v5772_v43  ;;  %v4828_v43 = vld [vmem:[%s9687_s3 + $0x6a0] sm:$0xff] }
 0x19c   : > { %5775 = vmatpush1.bf16.msra.mxu0 %v5774_v51  ;;  %v5810_v51 = vpack.c.bf16 %v4830_v45, %v4828_v43  ;;  %v4861_v43 = vld [vmem:[%s9687_s3 + $0x788] sm:$0xff]  ;;  %v4863_v45 = vld [vmem:[%s9687_s3 + $0x798] sm:$0xff] }
 0x19d   : > { %5777 = vmatprep.subr.bf16.mxu0 %v5776_v52  ;;  %v2037_v52 = vld [vmem:[#allocation2 + $0x38] sm:$0x3]  ;;  %v5838_v49 = vpack.c.bf16 %v4863_v45, %v4861_v43 }
 0x19e   : > { %v2134_v46 = vrot.slane %v2037_v52, 2  ;;  %v4862_v52 = vld [vmem:[%s9687_s3 + $0x790] sm:$0xff]  ;;  %v5019_v43 = vld [vmem:[%s9689_s5 + $0x238] sm:$0xff] }
 0x1a0   : > { %5779 = vmatpush1.bf16.msra.mxu0 %v5778_v57  ;;  %v4837_v57 = vld [vmem:[%s9687_s3 + $0x6e8] sm:$0xff] }
 0x1a1   : > { %5781 = vmatprep.subr.bf16.mxu0 %v5780_v58  ;;  %v4839_v58 = vld [vmem:[%s9687_s3 + $0x6f8] sm:$0xff] }
 0x1a4   : > { %5783 = vmatpush1.bf16.msra.mxu0 %v5782_v0  ;;  %v5816_v0 = vpack.c.bf16 %v4839_v58, %v4837_v57  ;;  %v4864_v57 = vld [vmem:[%s9687_s3 + $0x7a0] sm:$0xff]  ;;  %v4866_v58 = vld [vmem:[%s9687_s3 + $0x7b0] sm:$0xff] }
 0x1a5   : > { %5785 = vmatprep.subr.bf16.mxu0 %v5784_v1  ;;  %v4836_v1 = vld [vmem:[%s9687_s3 + $0x6e0] sm:$0xff]  ;;  %v5844_v62 = vpack.c.bf16 %v4866_v58, %v4864_v57  ;;  %v4893_v57 = vld [vmem:[%s9687_s3 + $0x888] sm:$0xff]  ;;  %v4895_v58 = vld [vmem:[%s9687_s3 + $0x898] sm:$0xff] }
 0x1a8   : > { %5787 = vmatpush1.bf16.msra.mxu0 %v5786_v7  ;;  %v2135_v7 = vsel %vm2122_vm2, %v2127_v15, %v2134_v46  ;;  %v4851_v15 = vld [vmem:[%s9687_s3 + $0x738] sm:$0xff]  ;;  %v4869_v46 = vld [vmem:[%s9687_s3 + $0x7c8] sm:$0xff] }
 0x1a9   : > { %5789 = vmatprep.subr.bf16.mxu0 %v5788_v8  ;;  %v5818_v8 = vpack.c.bf16 %v4838_v2, %v4836_v1  ;;  %v4870_v1 = vld [vmem:[%s9687_s3 + $0x7d0] sm:$0xff]  ;;  %v4873_v2 = vld [vmem:[%s9687_s3 + $0x7e8] sm:$0xff] }
 0x1ac   : > { %5791 = vmatpush1.bf16.msra.mxu0 %v5790_v14  ;;  %v4849_v14 = vld [vmem:[%s9687_s3 + $0x728] sm:$0xff] }
 0x1ad   : > { %5793 = vmatprep.subr.bf16.mxu0 %v5792_v16  ;;  %v5823_v16 = vpack.c.bf16 %v4842_v12, %v4840_v11  ;;  %v5826_v18 = vpack.c.bf16 %v4851_v15, %v4849_v14  ;;  %v4878_v14 = vld [vmem:[%s9687_s3 + $0x810] sm:$0xff]  ;;  %v4881_v15 = vld [vmem:[%s9687_s3 + $0x828] sm:$0xff] }
 0x1b0   : > { %5795 = vmatpush1.bf16.msra.mxu0 %v5794_v20  ;;  %v2130_v20 = vrot.slane %v7187_v44, 2  ;;  %v4852_v44 = vld [vmem:[%s9687_s3 + $0x740] sm:$0xff] }
 0x1b1   : > { %5797 = vmatprep.subr.bf16.mxu0 %v5796_v21  ;;  %v4853_v21 = vld [vmem:[%s9687_s3 + $0x748] sm:$0xff]  ;;  %v5832_v36 = vpack.c.bf16 %v4854_v30, %v4852_v44  ;;  %v5010_v30 = vld [vmem:[%s9689_s5 + $0x1f0] sm:$0xff] }
 0x1b2   : > { %v2131_v31 = vsel %vm2122_vm2, %v2129_v26, %v2130_v20  ;;  %v5009_v26 = vld [vmem:[%s9689_s5 + $0x1e8] sm:$0xff] }
 0x1b4   : > { %5799 = vmatpush1.bf16.msra.mxu0 %v5798_v28  ;;  %v2311_v28 = vld [vmem:[#allocation2 + $0x8] sm:$0xf8] }
 0x1b5   : > { %5801 = vmatprep.subr.bf16.mxu0 %v5800_v29  ;;  %v5830_v29 = vpack.c.bf16 %v4855_v22, %v4853_v21  ;;  %v4887_v21 = vld [vmem:[%s9687_s3 + $0x858] sm:$0xff]  ;;  %v4884_v22 = vld [vmem:[%s9687_s3 + $0x840] sm:$0xff] }
 0x1b8   : > { %5803 = vmatpush1.bf16.msra.mxu0 %v5802_v34  ;;  %v4859_v34 = vld [vmem:[%s9687_s3 + $0x778] sm:$0xff] }
 0x1b9   : > { %5805 = vmatprep.subr.bf16.mxu0 %v5804_v35  ;;  %v2403_v35 = vrot.slane %v2311_v28, 3  ;;  %v5834_v39 = vpack.c.bf16 %v4859_v34, %v4857_v33  ;;  %v5008_v28 = vld [vmem:[%s9689_s5 + $0x1e0] sm:$0xff] }
 0x1ba   : > { %v5984_v34 = vpack.c.bf16 %v5010_v30, %v5008_v28  ;;  %v5035_v30 = vld [vmem:[%s9689_s5 + $0x2b8] sm:$0xff] }
 0x1bb   : > { %v2405_v47 = vsel %vm2399_vm4, %v2403_v35, %v2404_v38 }
 0x1bc   : > { %5807 = vmatpush1.bf16.msra.mxu0 %v5806_v41  ;;  %v4858_v41 = vld [vmem:[%s9687_s3 + $0x770] sm:$0xff] }
 0x1bd   : > { %5809 = vmatprep.subr.bf16.mxu0 %v5808_v42  ;;  %v2137_v42 = vsel %vm2122_vm2, %v2130_v20, %v2136_v32  ;;  %v5836_v48 = vpack.c.bf16 %v4858_v41, %v4856_v40  ;;  %v4885_v20 = vld [vmem:[%s9687_s3 + $0x848] sm:$0xff]  ;;  %v5015_v32 = vld [vmem:[%s9689_s5 + $0x218] sm:$0xff] }
 0x1be   : > { %v5862_v33 = vpack.c.bf16 %v4887_v21, %v4885_v20  ;;  %v5017_v40 = vld [vmem:[%s9689_s5 + $0x228] sm:$0xff] }
 0x1bf   : > { %v4889_v41 = vld [vmem:[%s9687_s3 + $0x868] sm:$0xff] }
 0x1c0   : > { %5811 = vmatpush1.bf16.msra.mxu0 %v5810_v51  ;;  %v4860_v51 = vld [vmem:[%s9687_s3 + $0x780] sm:$0xff] }
 0x1c1   : > { %5813 = vmatprep.subr.bf16.mxu0 %v5812_v53  ;;  %v4865_v53 = vld [vmem:[%s9687_s3 + $0x7a8] sm:$0xff]  ;;  %v5840_v55 = vpack.c.bf16 %v4862_v52, %v4860_v51  ;;  %v5016_v51 = vld [vmem:[%s9689_s5 + $0x220] sm:$0xff]  ;;  %v5018_v52 = vld [vmem:[%s9689_s5 + $0x230] sm:$0xff] }
 0x1c2   : > { %v5842_v56 = vpack.c.bf16 %v4867_v54, %v4865_v53  ;;  %v4890_v54 = vld [vmem:[%s9687_s3 + $0x870] sm:$0xff] }
 0x1c3   : > { %2217 = vmatmul.mubr.f32.vlgmr.msra.gmra.mrb[6].mxu0 %v2125_v3  ;;  %v4875_v3 = vld [vmem:[%s9687_s3 + $0x7f8] sm:$0xff] }
 0x1c4   : > { %2222 = vmatprep.mubr.f32.mxu0 %v2135_v7  ;;  %5815 = vmatpush1.bf16.msra.mxu0 %v5814_v63  ;;  %v5846_v63 = vpack.c.bf16 %v4871_v59, %v4869_v46  ;;  %v5850_v6 = vpack.c.bf16 %v4875_v3, %v4873_v2  ;;  %v4874_v7 = vld [vmem:[%s9687_s3 + $0x7f0] sm:$0xff]  ;;  %v5992_v46 = vpack.c.bf16 %v5018_v52, %v5016_v51  ;;  %v4908_v52 = vld [vmem:[%s9687_s3 + $0x900] sm:$0xff] }
 0x1c5   : > { %5817 = vmatprep.subr.bf16.mxu0 %v5816_v0  ;;  %v4868_v0 = vld [vmem:[%s9687_s3 + $0x7c0] sm:$0xff]  ;;  %v5852_v11 = vpack.c.bf16 %v4874_v7, %v4872_v60  ;;  %v5870_v2 = vpack.c.bf16 %v4895_v58, %v4893_v57  ;;  %v4894_v3 = vld [vmem:[%s9687_s3 + $0x890] sm:$0xff]  ;;  %v4897_v60 = vld [vmem:[%s9687_s3 + $0x8a8] sm:$0xff] }
 0x1c6   : > { %v5848_v5 = vpack.c.bf16 %v4870_v1, %v4868_v0  ;;  %v5020_v0 = vld [vmem:[%s9689_s5 + $0x240] sm:$0xff]  ;;  %v5022_v1 = vld [vmem:[%s9689_s5 + $0x250] sm:$0xff]  ;;  %v4899_v7 = vld [vmem:[%s9687_s3 + $0x8b8] sm:$0xff] }
 0x1c7   : > { %2223 = vmatmul.mubr.f32.gmra.mrb[8].mxu0 %v2133_v13  ;;  %v4876_v13 = vld [vmem:[%s9687_s3 + $0x800] sm:$0xff]  ;;  %v4910_v57 = vld [vmem:[%s9687_s3 + $0x910] sm:$0xff]  ;;  %v5041_v58 = vld [vmem:[%s9689_s5 + $0x2e8] sm:$0xff] }
 0x1c8   : > { %5819 = vmatpush1.bf16.msra.mxu0 %v5818_v8  ;;  %2293 = vmatprep.mubr.f32.mxu0 %v6583_v9  ;;  %v4877_v8 = vld [vmem:[%s9687_s3 + $0x808] sm:$0xff]  ;;  %v5856_v17 = vpack.c.bf16 %v4878_v14, %v4876_v13  ;;  %v5024_v13 = vld [vmem:[%s9689_s5 + $0x260] sm:$0xff]  ;;  %v5026_v14 = vld [vmem:[%s9689_s5 + $0x270] sm:$0xff] }
 0x1c9   : > { %5822 = vmatprep.subr.msk.bf16.mxu0 %vm7174_vm1, %v5820_v10  ;;  %v4879_v10 = vld [vmem:[%s9687_s3 + $0x818] sm:$0xff]  ;;  %v6000_v20 = vpack.c.bf16 %v5026_v14, %v5024_v13  ;;  %v5045_v13 = vld [vmem:[%s9689_s5 + $0x308] sm:$0xff] }
 0x1ca   : > { %v5854_v12 = vpack.c.bf16 %v4879_v10, %v4877_v8  ;;  %v5996_v8 = vpack.c.bf16 %v5022_v1, %v5020_v0  ;;  %v5888_v1 = vpack.c.bf16 %v4910_v57, %v4908_v52  ;;  %v5047_v14 = vld [vmem:[%s9689_s5 + $0x318] sm:$0xff]  ;;  %v2315_v52 = vld [vmem:[#allocation2 + $0x40] sm:$0x7] }
 0x1cb   : > { %v4932_v57 = vld [vmem:[%s9687_s3 + $0x9a0] sm:$0xff] }
 0x1cc   : > { %5825 = vmatpush1.bf16.msk.msra.mxu0 %vm7174_vm1, %v5823_v16  ;;  %v4883_v16 = vld [vmem:[%s9687_s3 + $0x838] sm:$0xff] }
 0x1cd   : > { %5827 = vmatprep.subr.bf16.mxu0 %v5826_v18  ;;  %v5858_v18 = vpack.c.bf16 %v4883_v16, %v4881_v15  ;;  %v5874_v15 = vpack.c.bf16 %v4899_v7, %v4897_v60  ;;  %v4898_v16 = vld [vmem:[%s9687_s3 + $0x8b0] sm:$0xff]  ;;  %v4912_v7 = vld [vmem:[%s9687_s3 + $0x920] sm:$0xff] }
 0x1cf   : > { %4846 = vmatmul.mubr.msk.f32.vlgmr.msra.gmra.mrb[6].mxu0 %vm1500_vm3, %v2131_v31  ;;  %v5013_v31 = vld [vmem:[%s9689_s5 + $0x208] sm:$0xff] }
 0x1d0   : > { %5829 = vmatpush1.bf16.msra.mxu0 %v5828_v27  ;;  %2299 = vmatprep.mubr.f32.mxu0 %v6583_v9  ;;  %v5011_v27 = vld [vmem:[%s9689_s5 + $0x1f8] sm:$0xff]  ;;  %v5986_v35 = vpack.c.bf16 %v5015_v32, %v5013_v31  ;;  %v4905_v31 = vld [vmem:[%s9687_s3 + $0x8e8] sm:$0xff] }
 0x1d1   : > { %5831 = vmatprep.subr.bf16.mxu0 %v5830_v29  ;;  %v5860_v29 = vpack.c.bf16 %v4882_v50, %v4880_v19  ;;  %v5982_v44 = vpack.c.bf16 %v5011_v27, %v5009_v26  ;;  %v4901_v19 = vld [vmem:[%s9687_s3 + $0x8c8] sm:$0xff]  ;;  %v4903_v50 = vld [vmem:[%s9687_s3 + $0x8d8] sm:$0xff]  ;;  %v5028_v26 = vld [vmem:[%s9689_s5 + $0x280] sm:$0xff] }
 0x1d2   : > { %v5030_v27 = vld [vmem:[%s9689_s5 + $0x290] sm:$0xff]  ;;  %v5878_v28 = vpack.c.bf16 %v4903_v50, %v4901_v19  ;;  %v4907_v32 = vld [vmem:[%s9687_s3 + $0x8f8] sm:$0xff] }
 0x1d3   : > { %4847 = vmatmul.mubr.msk.f32.gmra.mrb[8].mxu0 %vm1500_vm3, %v2137_v42  ;;  %v4891_v42 = vld [vmem:[%s9687_s3 + $0x878] sm:$0xff]  ;;  %5983 = vmatprep.subr.bf16.mxu1 %v5982_v44  ;;  %v5033_v44 = vld [vmem:[%s9689_s5 + $0x2a8] sm:$0xff] }
 0x1d4   : > { %5833 = vmatpush1.bf16.msra.mxu0 %v5832_v36  ;;  %2493 = vmatprep.mubr.f32.mxu0 %v2405_v47  ;;  %v5012_v36 = vld [vmem:[%s9689_s5 + $0x200] sm:$0xff]  ;;  %v5864_v47 = vpack.c.bf16 %v4886_v24, %v4884_v22  ;;  %v5866_v53 = vpack.c.bf16 %v4891_v42, %v4889_v41  ;;  %v5882_v41 = vpack.c.bf16 %v4907_v32, %v4905_v31  ;;  %v4906_v42 = vld [vmem:[%s9687_s3 + $0x8f0] sm:$0xff] }
 0x1d5   : > { %5835 = vmatprep.subr.bf16.mxu0 %v5834_v39  ;;  %v5014_v39 = vld [vmem:[%s9689_s5 + $0x210] sm:$0xff]  ;;  %5985 = vmatpush1.bf16.msra.mxu1 %v5984_v34  ;;  %v4900_v22 = vld [vmem:[%s9687_s3 + $0x8c0] sm:$0xff] }
 0x1d6   : > { %v5988_v45 = vpack.c.bf16 %v5014_v39, %v5012_v36  ;;  %5987 = vmatprep.subr.bf16.mxu1 %v5986_v35  ;;  %v4904_v35 = vld [vmem:[%s9687_s3 + $0x8e0] sm:$0xff]  ;;  %v6006_v36 = vpack.c.bf16 %v5035_v30, %v5033_v44  ;;  %v4921_v44 = vld [vmem:[%s9687_s3 + $0x968] sm:$0xff]  ;;  %v4923_v30 = vld [vmem:[%s9687_s3 + $0x978] sm:$0xf] }
 0x1d7   : > { %v5032_v39 = vld [vmem:[%s9689_s5 + $0x2a0] sm:$0xff]  ;;  %v5884_v51 = vpack.c.bf16 %v4906_v42, %v4904_v35 }
 0x1d8   : > { %5837 = vmatpush1.bf16.msra.mxu0 %v5836_v48  ;;  %v4888_v48 = vld [vmem:[%s9687_s3 + $0x860] sm:$0xff] }
 0x1d9   : > { %5839 = vmatprep.subr.bf16.mxu0 %v5838_v49  ;;  %v5990_v49 = vpack.c.bf16 %v5019_v43, %v5017_v40  ;;  %5989 = vmatpush1.bf16.msra.mxu1 %v5988_v45  ;;  %v5868_v59 = vpack.c.bf16 %v4890_v54, %v4888_v48  ;;  %v5034_v40 = vld [vmem:[%s9689_s5 + $0x2b0] sm:$0xff]  ;;  %v5037_v43 = vld [vmem:[%s9689_s5 + $0x2c8] sm:$0xff]  ;;  %v5039_v45 = vld [vmem:[%s9689_s5 + $0x2d8] sm:$0xff] }
 0x1da   : > { %v4911_v48 = vld [vmem:[%s9687_s3 + $0x918] sm:$0xff]  ;;  %v5036_v54 = vld [vmem:[%s9689_s5 + $0x2c0] sm:$0xff] }
 0x1db   : > { %5991 = vmatprep.subr.bf16.mxu1 %v5990_v49  ;;  %v6008_v49 = vpack.c.bf16 %v5034_v40, %v5032_v39  ;;  %v4920_v35 = vld [vmem:[%s9687_s3 + $0x960] sm:$0xff]  ;;  %v4931_v39 = vld [vmem:[%s9687_s3 + $0x998] sm:$0xff] }
 0x1dc   : > { %5841 = vmatpush1.bf16.msra.mxu0 %v5840_v55  ;;  %v5021_v55 = vld [vmem:[%s9689_s5 + $0x248] sm:$0xff] }
 0x1dd   : > { %5843 = vmatprep.subr.bf16.mxu0 %v5842_v56  ;;  %v5023_v56 = vld [vmem:[%s9689_s5 + $0x258] sm:$0xff]  ;;  %5993 = vmatpush1.bf16.msra.mxu1 %v5992_v46 }
 0x1de   : > { %v5043_v46 = vld [vmem:[%s9689_s5 + $0x2f8] sm:$0xff] }
 0x1e0   : > { %5845 = vmatpush1.bf16.msra.mxu0 %v5844_v62  ;;  %v4892_v62 = vld [vmem:[%s9687_s3 + $0x880] sm:$0xff] }
 0x1e1   : > { %5847 = vmatprep.subr.bf16.mxu0 %v5846_v63  ;;  %v5994_v63 = vpack.c.bf16 %v5023_v56, %v5021_v55  ;;  %v5872_v10 = vpack.c.bf16 %v4894_v3, %v4892_v62  ;;  %v5038_v55 = vld [vmem:[%s9689_s5 + $0x2d0] sm:$0xff]  ;;  %v4915_v62 = vld [vmem:[%s9687_s3 + $0x938] sm:$0xff]  ;;  %v6014_v3 = vpack.c.bf16 %v5043_v46, %v5041_v58 }
 0x1e2   : > { %v6012_v0 = vpack.c.bf16 %v5038_v55, %v5036_v54  ;;  %v2588_v55 = vld [vmem:[#allocation2 + $0x8] sm:$0xf0]  ;;  %v4934_v58 = vld [vmem:[%s9687_s3 + $0x9b0] sm:$0xff] }
 0x1e3   : > { %5995 = vmatprep.subr.bf16.mxu1 %v5994_v63  ;;  %v2310_v63 = vld [vmem:[#allocation2] sm:$0xf8] }
 0x1e4   : > { %5849 = vmatpush1.bf16.msra.mxu0 %v5848_v5  ;;  %v5025_v5 = vld [vmem:[%s9689_s5 + $0x268] sm:$0xff]  ;;  %5997 = vmatpush1.bf16.msra.mxu1 %v5996_v8  ;;  %v4914_v8 = vld [vmem:[%s9687_s3 + $0x930] sm:$0xff] }
 0x1e5   : > { %5851 = vmatprep.subr.bf16.mxu0 %v5850_v6  ;;  %v5027_v6 = vld [vmem:[%s9689_s5 + $0x278] sm:$0xff]  ;;  %v5892_v50 = vpack.c.bf16 %v4914_v8, %v4912_v7  ;;  %v4941_v8 = vld [vmem:[%s9687_s3 + $0x9e8] sm:$0xff] }
 0x1e8   : > { %5853 = vmatpush1.bf16.msra.mxu0 %v5852_v11  ;;  %v4896_v11 = vld [vmem:[%s9687_s3 + $0x8a0] sm:$0xff] }
 0x1e9   : > { %5855 = vmatprep.subr.bf16.mxu0 %v5854_v12  ;;  %v5998_v12 = vpack.c.bf16 %v5027_v6, %v5025_v5  ;;  %v5876_v21 = vpack.c.bf16 %v4898_v16, %v4896_v11  ;;  %v5040_v5 = vld [vmem:[%s9689_s5 + $0x2e0] sm:$0xff]  ;;  %v5042_v6 = vld [vmem:[%s9689_s5 + $0x2f0] sm:$0xff]  ;;  %v2400_v11 = vrot.slane %v2310_v63, 3  ;;  %v4939_v63 = vld [vmem:[%s9687_s3 + $0x9d8] sm:$0xff] }
 0x1ea   : > { %v2313_v16 = vld [vmem:[#allocation2 + $0x30] sm:$0x7] }
 0x1eb   : > { %5999 = vmatprep.subr.bf16.mxu1 %v5998_v12  ;;  %v4919_v12 = vld [vmem:[%s9687_s3 + $0x958] sm:$0xff] }
 0x1ec   : > { %5857 = vmatpush1.bf16.msra.mxu0 %v5856_v17  ;;  %v5029_v17 = vld [vmem:[%s9689_s5 + $0x288] sm:$0xff]  ;;  %6001 = vmatpush1.bf16.msra.mxu1 %v6000_v20  ;;  %v5044_v20 = vld [vmem:[%s9689_s5 + $0x300] sm:$0xff] }
 0x1ed   : > { %5859 = vmatprep.subr.bf16.mxu0 %v5858_v18  ;;  %v5031_v18 = vld [vmem:[%s9689_s5 + $0x298] sm:$0xff] }
 0x1ee   : > { %v6002_v24 = vpack.c.bf16 %v5031_v18, %v5029_v17  ;;  %v6016_v17 = vpack.c.bf16 %v5042_v6, %v5040_v5  ;;  %v8014_v18 = vld [vmem:[#allocation2 + $0x18] sm:$0xff]  ;;  %v4936_v6 = vld [vmem:[%s9687_s3 + $0x9c0] sm:$0xff] }
 0x1ef   : > { %v2401_v19 = vrot.slane %v8014_v18, 3 }
 0x1f0   : > { %5861 = vmatpush1.bf16.msra.mxu0 %v5860_v29  ;;  %v4902_v29 = vld [vmem:[%s9687_s3 + $0x8d0] sm:$0xff]  ;;  %6003 = vmatprep.subr.bf16.mxu1 %v6002_v24  ;;  %v4916_v24 = vld [vmem:[%s9687_s3 + $0x940] sm:$0xff] }
 0x1f1   : > { %5863 = vmatprep.subr.bf16.mxu0 %v5862_v33  ;;  %v6004_v33 = vpack.c.bf16 %v5030_v27, %v5028_v26  ;;  %v5880_v34 = vpack.c.bf16 %v4902_v29, %v4900_v22  ;;  %v4918_v26 = vld [vmem:[%s9687_s3 + $0x950] sm:$0xff]  ;;  %v6018_v27 = vpack.c.bf16 %v5047_v14, %v5045_v13  ;;  %v2409_v29 = vrot.slane %v2313_v16, 3  ;;  %v4940_v14 = vld [vmem:[%s9687_s3 + $0x9e0] sm:$0xff]  ;;  %v4945_v16 = vld [vmem:[%s9687_s3 + $0xa08] sm:$0xff] }
 0x1f3   : > { %6005 = vmatpush1.bf16.msra.mxu1 %v6004_v33  ;;  %v5896_v33 = vpack.c.bf16 %v4918_v26, %v4916_v24  ;;  %v2410_v61 = vsel %vm2399_vm4, %v2401_v19, %v2409_v29  ;;  %v4951_v24 = vld [vmem:[%s9687_s3 + $0xa38] sm:$0xff]  ;;  %v4950_v29 = vld [vmem:[%s9687_s3 + $0xa30] sm:$0xff] }
 0x1f4   : > { %5865 = vmatpush1.bf16.msra.mxu0 %v5864_v47  ;;  %v4909_v47 = vld [vmem:[%s9687_s3 + $0x908] sm:$0xff]  ;;  %6007 = vmatprep.subr.bf16.mxu1 %v6006_v36  ;;  %v4922_v36 = vld [vmem:[%s9687_s3 + $0x970] sm:$0xf] }
 0x1f5   : > { %5867 = vmatprep.subr.bf16.mxu0 %v5866_v53  ;;  %v6010_v53 = vpack.c.bf16 %v5039_v45, %v5037_v43  ;;  %v5886_v56 = vpack.c.bf16 %v4911_v48, %v4909_v47  ;;  %v5901_v40 = vpack.c.bf16 %v4922_v36, %v4920_v35  ;;  %v4928_v43 = vld [vmem:[%s9687_s3 + $0x980] sm:$0xff]  ;;  %v4930_v45 = vld [vmem:[%s9687_s3 + $0x990] sm:$0xff]  ;;  %v8061_v47 = vld [vmem:[#allocation2 + $0x28] sm:$0xff] }
 0x1f6   : > { %v2407_v48 = vrot.slane %v8061_v47, 3  ;;  %v5906_v54 = vpack.c.bf16 %v4930_v45, %v4928_v43  ;;  %v4957_v35 = vld [vmem:[%s9687_s3 + $0xa68] sm:$0xff]  ;;  %v4959_v36 = vld [vmem:[%s9687_s3 + $0xa78] sm:$0xff] }
 0x1f7   : > { %6009 = vmatpush1.bf16.msra.mxu1 %v6008_v49  ;;  %v4933_v49 = vld [vmem:[%s9687_s3 + $0x9a8] sm:$0xff] }
 0x1f8   : > { %5869 = vmatpush1.bf16.msra.mxu0 %v5868_v59  ;;  %v4913_v59 = vld [vmem:[%s9687_s3 + $0x928] sm:$0xff]  ;;  %6011 = vmatprep.subr.bf16.mxu1 %v6010_v53 }
 0x1f9   : > { %5871 = vmatprep.subr.bf16.mxu0 %v5870_v2  ;;  %v2314_v2 = vld [vmem:[#allocation2 + $0x38] sm:$0x7]  ;;  %v5890_v60 = vpack.c.bf16 %v4915_v62, %v4913_v59  ;;  %v2413_v59 = vrot.slane %v2315_v52, 3  ;;  %v4937_v62 = vld [vmem:[%s9687_s3 + $0x9c8] sm:$0xff] }
 0x1fa   : > { %v5912_v5 = vpack.c.bf16 %v4939_v63, %v4937_v62  ;;  %v4967_v52 = vld [vmem:[%s9687_s3 + $0xab8] sm:$0xff]  ;;  %v4968_v62 = vld [vmem:[%s9687_s3 + $0xac0] sm:$0xff]  ;;  %v4970_v63 = vld [vmem:[%s9687_s3 + $0xad0] sm:$0xff] }
 0x1fb   : > { %6013 = vmatpush1.bf16.msra.mxu1 %v6012_v0  ;;  %v2679_v0 = vrot.slane %v2588_v55, 4  ;;  %v2414_v7 = vsel %vm2399_vm4, %v2407_v48, %v2413_v59  ;;  %v4964_v55 = vld [vmem:[%s9687_s3 + $0xaa0] sm:$0xff] }
 0x1fc   : > { %5873 = vmatpush1.bf16.msra.mxu0 %v5872_v10  ;;  %v4917_v10 = vld [vmem:[%s9687_s3 + $0x948] sm:$0xff]  ;;  %6015 = vmatprep.subr.bf16.mxu1 %v6014_v3 }
 0x1fd   : > { %5875 = vmatprep.subr.bf16.mxu0 %v5874_v15  ;;  %v2411_v15 = vrot.slane %v2314_v2, 3  ;;  %v5894_v22 = vpack.c.bf16 %v4919_v12, %v4917_v10  ;;  %v8087_v2 = vld [vmem:[#allocation2 + $0x20] sm:$0xff]  ;;  %v4943_v10 = vld [vmem:[%s9687_s3 + $0x9f8] sm:$0xff] }
 0x1fe   : > { %v2680_v3 = vrot.slane %v8087_v2, 4  ;;  %v5916_v13 = vpack.c.bf16 %v4943_v10, %v4941_v8  ;;  %v4977_v8 = vld [vmem:[%s9687_s3 + $0xb08] sm:$0xff]  ;;  %v4979_v10 = vld [vmem:[%s9687_s3 + $0xb18] sm:$0xff] }
 0x1ff   : > { %v2412_v31 = vsel %vm2399_vm4, %v2404_v38, %v2411_v15  ;;  %6017 = vmatpush1.bf16.msra.mxu1 %v6016_v17  ;;  %v4929_v38 = vld [vmem:[%s9687_s3 + $0x988] sm:$0xff]  ;;  %v4942_v15 = vld [vmem:[%s9687_s3 + $0x9f0] sm:$0xff]  ;;  %v4947_v17 = vld [vmem:[%s9687_s3 + $0xa18] sm:$0xff] }
 0x200   : > { %5877 = vmatpush1.bf16.msra.mxu0 %v5876_v21  ;;  %v5046_v21 = vld [vmem:[%s9689_s5 + $0x310] sm:$0xff]  ;;  %6019 = vmatprep.subr.bf16.mxu1 %v6018_v27  ;;  %v5904_v42 = vpack.c.bf16 %v4931_v39, %v4929_v38  ;;  %v5932_v38 = vpack.c.bf16 %v4959_v36, %v4957_v35  ;;  %v4956_v39 = vld [vmem:[%s9687_s3 + $0xa60] sm:$0xff]  ;;  %v4995_v35 = vld [vmem:[%s9687_s3 + $0xb98] sm:$0xff] }
 0x201   : > { %5879 = vmatprep.subr.bf16.mxu0 %v5878_v28  ;;  %v2402_v28 = vsel %vm2399_vm4, %v2400_v11, %v2401_v19  ;;  %v6020_v32 = vpack.c.bf16 %v5046_v21, %v5044_v20  ;;  %v2681_v11 = vsel %vm1707_vm14, %v2679_v0, %v2680_v3  ;;  %v5918_v19 = vpack.c.bf16 %v4942_v15, %v4940_v14  ;;  %v4944_v20 = vld [vmem:[%s9687_s3 + $0xa00] sm:$0xff]  ;;  %v4946_v21 = vld [vmem:[%s9687_s3 + $0xa10] sm:$0xff]  ;;  %v4973_v0 = vld [vmem:[%s9687_s3 + $0xae8] sm:$0xff] }
 0x202   : > { %v5922_v26 = vpack.c.bf16 %v4946_v21, %v4944_v20  ;;  %v4978_v14 = vld [vmem:[%s9687_s3 + $0xb10] sm:$0xff]  ;;  %v4981_v15 = vld [vmem:[%s9687_s3 + $0xb28] sm:$0xff]  ;;  %v2587_v36 = vld [vmem:[#allocation2] sm:$0xf0] }
 0x203   : > { %6021 = vmatpush1.bf16.msra.mxu1 %v6020_v32  ;;  %v4982_v20 = vld [vmem:[%s9687_s3 + $0xb30] sm:$0xff]  ;;  %v4985_v21 = vld [vmem:[%s9687_s3 + $0xb48] sm:$0xff] }
 0x204   : > { %5881 = vmatpush1.bf16.msra.mxu0 %v5880_v34  ;;  %v5898_v34 = vpack.c.bf16 %v4923_v30, %v4921_v44  ;;  %v4953_v44 = vld [vmem:[%s9687_s3 + $0xa48] sm:$0xff]  ;;  %v4955_v30 = vld [vmem:[%s9687_s3 + $0xa58] sm:$0xff] }
 0x205   : > { %5883 = vmatprep.subr.bf16.mxu0 %v5882_v41  ;;  %v2312_v41 = vld [vmem:[#allocation2 + $0x10] sm:$0xf8]  ;;  %v5928_v32 = vpack.c.bf16 %v4955_v30, %v4953_v44  ;;  %v4991_v44 = vld [vmem:[%s9687_s3 + $0xb78] sm:$0xff] }
 0x206   : > { %v2406_v53 = vrot.slane %v2312_v41, 3  ;;  %v4961_v41 = vld [vmem:[%s9687_s3 + $0xa88] sm:$0xff] }
 0x208   : > { %5885 = vmatpush1.bf16.msra.mxu0 %v5884_v51  ;;  %v4935_v51 = vld [vmem:[%s9687_s3 + $0x9b8] sm:$0xff]  ;;  %v2408_v46 = vsel %vm2399_vm4, %v2406_v53, %v2407_v48  ;;  %v4960_v48 = vld [vmem:[%s9687_s3 + $0xa80] sm:$0xff] }
 0x209   : > { %5887 = vmatprep.subr.bf16.mxu0 %v5886_v56  ;;  %v5908_v56 = vpack.c.bf16 %v4935_v51, %v4933_v49  ;;  %v4962_v49 = vld [vmem:[%s9687_s3 + $0xa90] sm:$0xff]  ;;  %v4965_v51 = vld [vmem:[%s9687_s3 + $0xaa8] sm:$0xff] }
 0x20a   : > { %v5938_v53 = vpack.c.bf16 %v4962_v49, %v4960_v48  ;;  %v2590_v49 = vld [vmem:[#allocation2 + $0x30] sm:$0xf] }
 0x20c   : > { %5889 = vmatpush1.bf16.msra.mxu0 %v5888_v1  ;;  %v5910_v1 = vpack.c.bf16 %v4934_v58, %v4932_v57  ;;  %v4969_v57 = vld [vmem:[%s9687_s3 + $0xac8] sm:$0xff]  ;;  %v4971_v58 = vld [vmem:[%s9687_s3 + $0xad8] sm:$0xff] }
 0x20d   : > { %5891 = vmatprep.subr.bf16.mxu0 %v5890_v60  ;;  %v4938_v60 = vld [vmem:[%s9687_s3 + $0x9d0] sm:$0xff]  ;;  %v5944_v59 = vpack.c.bf16 %v4971_v58, %v4969_v57  ;;  %v2685_v57 = vrot.slane %v2590_v49, 4  ;;  %v5001_v58 = vld [vmem:[%s9687_s3 + $0xbc8] sm:$0xff] }
 0x20e   : > { %v5914_v12 = vpack.c.bf16 %v4938_v60, %v4936_v6  ;;  %v4972_v60 = vld [vmem:[%s9687_s3 + $0xae0] sm:$0xff] }
 0x20f   : > { %2494 = vmatmul.mubr.f32.vlgmr.msra.gmra.mrb[6].mxu0 %v2402_v28  ;;  %v4948_v28 = vld [vmem:[%s9687_s3 + $0xa20] sm:$0xff] }
 0x210   : > { %2499 = vmatprep.mubr.f32.mxu0 %v2412_v31  ;;  %5893 = vmatpush1.bf16.msra.mxu0 %v5892_v50  ;;  %v5920_v50 = vpack.c.bf16 %v4947_v17, %v4945_v16  ;;  %v5926_v31 = vpack.c.bf16 %v4950_v29, %v4948_v28  ;;  %v4983_v16 = vld [vmem:[%s9687_s3 + $0xb38] sm:$0xff]  ;;  %v4986_v28 = vld [vmem:[%s9687_s3 + $0xb50] sm:$0xff]  ;;  %v4989_v29 = vld [vmem:[%s9687_s3 + $0xb68] sm:$0xff] }
 0x211   : > { %5895 = vmatprep.subr.bf16.mxu0 %v5894_v22  ;;  %v4949_v22 = vld [vmem:[%s9687_s3 + $0xa28] sm:$0xff] }
 0x212   : > { %v5924_v27 = vpack.c.bf16 %v4951_v24, %v4949_v22  ;;  %v4987_v22 = vld [vmem:[%s9687_s3 + $0xb58] sm:$0xff] }
 0x213   : > { %2500 = vmatmul.mubr.f32.gmra.mrb[8].mxu0 %v2410_v61 }
 0x214   : > { %5897 = vmatpush1.bf16.msra.mxu0 %v5896_v33  ;;  %2570 = vmatprep.mubr.f32.mxu0 %v6583_v9  ;;  %v4952_v33 = vld [vmem:[%s9687_s3 + $0xa40] sm:$0xff] }
 0x215   : > { %5900 = vmatprep.subr.msk.bf16.mxu0 %vm7174_vm1, %v5898_v34  ;;  %v4954_v34 = vld [vmem:[%s9687_s3 + $0xa50] sm:$0xff] }
 0x216   : > { %v5930_v61 = vpack.c.bf16 %v4954_v34, %v4952_v33  ;;  %v4990_v33 = vld [vmem:[%s9687_s3 + $0xb70] sm:$0xff]  ;;  %v4993_v34 = vld [vmem:[%s9687_s3 + $0xb88] sm:$0xff] }
 0x218   : > { %5903 = vmatpush1.bf16.msk.msra.mxu0 %vm7174_vm1, %v5901_v40  ;;  %v4958_v40 = vld [vmem:[%s9687_s3 + $0xa70] sm:$0xff] }
 0x219   : > { %5905 = vmatprep.subr.bf16.mxu0 %v5904_v42  ;;  %v4963_v42 = vld [vmem:[%s9687_s3 + $0xa98] sm:$0xff]  ;;  %v5934_v43 = vpack.c.bf16 %v4958_v40, %v4956_v39  ;;  %v5968_v39 = vpack.c.bf16 %v4995_v35, %v4993_v34  ;;  %v4992_v40 = vld [vmem:[%s9687_s3 + $0xb80] sm:$0xff] }
 0x21a   : > { %v5936_v45 = vpack.c.bf16 %v4963_v42, %v4961_v41  ;;  %v4994_v41 = vld [vmem:[%s9687_s3 + $0xb90] sm:$0xff]  ;;  %v2676_v42 = vrot.slane %v2587_v36, 4  ;;  %v5067_v34 = vld [vmem:[%s9689_s5 + $0x3b8] sm:$0xff] }
 0x21b   : > { %4926 = vmatmul.mubr.msk.f32.vlgmr.msra.gmra.mrb[6].mxu0 %vm1500_vm3, %v2408_v46 }
 0x21c   : > { %5907 = vmatpush1.bf16.msra.mxu0 %v5906_v54  ;;  %2576 = vmatprep.mubr.f32.mxu0 %v6583_v9  ;;  %v5940_v54 = vpack.c.bf16 %v4967_v52, %v4965_v51  ;;  %v2677_v51 = vrot.slane %v8014_v18, 4  ;;  %v5970_v52 = vpack.c.bf16 %v4994_v41, %v4992_v40  ;;  %v5003_v18 = vld [vmem:[%s9687_s3 + $0xbd8] sm:$0xf] }
 0x21d   : > { %5909 = vmatprep.subr.bf16.mxu0 %v5908_v56  ;;  %v4966_v56 = vld [vmem:[%s9687_s3 + $0xab0] sm:$0xff]  ;;  %v2903_v40 = vld [vmem:[%s9689_s5 + $0x18] sm:$0xff] }
 0x21e   : > { %v5942_v46 = vpack.c.bf16 %v4966_v56, %v4964_v55  ;;  %v4998_v55 = vld [vmem:[%s9687_s3 + $0xbb0] sm:$0xff]  ;;  %v2678_v56 = vsel %vm1707_vm14, %v2676_v42, %v2677_v51 }
 0x21f   : > { %4927 = vmatmul.mubr.msk.f32.gmra.mrb[8].mxu0 %vm1500_vm3, %v2414_v7  ;;  %v4974_v7 = vld [vmem:[%s9687_s3 + $0xaf0] sm:$0xff] }
 0x220   : > { %5911 = vmatpush1.bf16.msra.mxu0 %v5910_v1  ;;  %2769 = vmatprep.mubr.f32.mxu0 %v2681_v11  ;;  %v4975_v1 = vld [vmem:[%s9687_s3 + $0xaf8] sm:$0xff]  ;;  %v5950_v11 = vpack.c.bf16 %v4974_v7, %v4972_v60 }
 0x221   : > { %5913 = vmatprep.subr.bf16.mxu0 %v5912_v5  ;;  %v5946_v5 = vpack.c.bf16 %v4970_v63, %v4968_v62  ;;  %v5948_v6 = vpack.c.bf16 %v4975_v1, %v4973_v0  ;;  %v5976_v62 = vpack.c.bf16 %v5003_v18, %v5001_v58  ;;  %v5000_v63 = vld [vmem:[%s9687_s3 + $0xbc0] sm:$0xff]  ;;  %v5002_v0 = vld [vmem:[%s9687_s3 + $0xbd0] sm:$0xf]  ;;  %v2686_v1 = vsel %vm1707_vm14, %v2677_v51, %v2685_v57 }
 0x222   : > { %v5979_v2 = vpack.c.bf16 %v5002_v0, %v5000_v63 }
 0x224   : > { %5915 = vmatpush1.bf16.msra.mxu0 %v5914_v12  ;;  %v5952_v12 = vpack.c.bf16 %v4979_v10, %v4977_v8 }
 0x225   : > { %5917 = vmatprep.subr.bf16.mxu0 %v5916_v13  ;;  %v4976_v13 = vld [vmem:[%s9687_s3 + $0xb00] sm:$0xff] }
 0x226   : > { %v5954_v17 = vpack.c.bf16 %v4978_v14, %v4976_v13  ;;  %v5050_v13 = vld [vmem:[%s9689_s5 + $0x330] sm:$0xff] }
 0x228   : > { %5919 = vmatpush1.bf16.msra.mxu0 %v5918_v19  ;;  %v5956_v19 = vpack.c.bf16 %v4983_v16, %v4981_v15  ;;  %v5053_v15 = vld [vmem:[%s9689_s5 + $0x348] sm:$0xff]  ;;  %v5055_v16 = vld [vmem:[%s9689_s5 + $0x358] sm:$0xff] }
 0x229   : > { %5921 = vmatprep.subr.bf16.mxu0 %v5920_v50  ;;  %v4980_v50 = vld [vmem:[%s9687_s3 + $0xb20] sm:$0xff] }
 0x22a   : > { %v5958_v24 = vpack.c.bf16 %v4982_v20, %v4980_v50  ;;  %v5054_v50 = vld [vmem:[%s9689_s5 + $0x350] sm:$0xff]  ;;  %v5057_v20 = vld [vmem:[%s9689_s5 + $0x368] sm:$0xff] }
 0x22c   : > { %5923 = vmatpush1.bf16.msra.mxu0 %v5922_v26  ;;  %v5960_v26 = vpack.c.bf16 %v4987_v22, %v4985_v21  ;;  %v5059_v21 = vld [vmem:[%s9689_s5 + $0x378] sm:$0xff] }
 0x22d   : > { %5925 = vmatprep.subr.bf16.mxu0 %v5924_v27  ;;  %v4984_v27 = vld [vmem:[%s9687_s3 + $0xb40] sm:$0xff] }
 0x22e   : > { %v5962_v30 = vpack.c.bf16 %v4986_v28, %v4984_v27  ;;  %v5058_v27 = vld [vmem:[%s9689_s5 + $0x370] sm:$0xff]  ;;  %v5061_v28 = vld [vmem:[%s9689_s5 + $0x388] sm:$0xff] }
 0x230   : > { %5927 = vmatpush1.bf16.msra.mxu0 %v5926_v31  ;;  %v5964_v31 = vpack.c.bf16 %v4991_v44, %v4989_v29  ;;  %v5063_v29 = vld [vmem:[%s9689_s5 + $0x398] sm:$0xff] }
 0x231   : > { %5929 = vmatprep.subr.bf16.mxu0 %v5928_v32  ;;  %v4988_v32 = vld [vmem:[%s9687_s3 + $0xb60] sm:$0xff] }
 0x234   : > { %5931 = vmatpush1.bf16.msra.mxu0 %v5930_v61  ;;  %v5966_v61 = vpack.c.bf16 %v4990_v33, %v4988_v32  ;;  %v5062_v32 = vld [vmem:[%s9689_s5 + $0x390] sm:$0xff]  ;;  %v5065_v33 = vld [vmem:[%s9689_s5 + $0x3a8] sm:$0xff] }
 0x235   : > { %5933 = vmatprep.subr.bf16.mxu0 %v5932_v38  ;;  %v2591_v38 = vld [vmem:[#allocation2 + $0x38] sm:$0xf]  ;;  %v6038_v36 = vpack.c.bf16 %v5067_v34, %v5065_v33  ;;  %v2917_v33 = vld [vmem:[%s9689_s5 + $0x88] sm:$0xff] }
 0x236   : > { %v2687_v48 = vrot.slane %v2591_v38, 4  ;;  %v5066_v38 = vld [vmem:[%s9689_s5 + $0x3b0] sm:$0xff]  ;;  %v2919_v34 = vld [vmem:[%s9689_s5 + $0x98] sm:$0xff] }
 0x238   : > { %5935 = vmatpush1.bf16.msra.mxu0 %v5934_v43  ;;  %v4997_v43 = vld [vmem:[%s9687_s3 + $0xba8] sm:$0xff] }
 0x239   : > { %5937 = vmatprep.subr.bf16.mxu0 %v5936_v45  ;;  %v4999_v45 = vld [vmem:[%s9687_s3 + $0xbb8] sm:$0xff] }
 0x23c   : > { %5939 = vmatpush1.bf16.msra.mxu0 %v5938_v53  ;;  %v5972_v53 = vpack.c.bf16 %v4999_v45, %v4997_v43  ;;  %v2863_v43 = vld [vmem:[%s9688_s4] sm:$0x3] }
 0x23d   : > { %5941 = vmatprep.subr.bf16.mxu0 %v5940_v54  ;;  %v4996_v54 = vld [vmem:[%s9687_s3 + $0xba0] sm:$0xff]  ;;  %v2868_v45 = vrot.slane %v2863_v43, %v7117_v23 }
 0x240   : > { %5943 = vmatpush1.bf16.msra.mxu0 %v5942_v46  ;;  %v2688_v46 = vsel %vm1707_vm14, %v2680_v3, %v2687_v48  ;;  %v2589_v3 = vld [vmem:[#allocation2 + $0x10] sm:$0xf0]  ;;  %v2872_v48 = vrot.slane %v2863_v43, %v7122_v25  ;;  %v2920_v43 = vld [vmem:[%s9689_s5 + $0xa0] sm:$0xff] }
 0x241   : > { %5945 = vmatprep.subr.bf16.mxu0 %v5944_v59  ;;  %v5974_v59 = vpack.c.bf16 %v4998_v55, %v4996_v54  ;;  %v2682_v60 = vrot.slane %v2589_v3, 4  ;;  %v2900_v3 = vld [vmem:[%s9689_s5] sm:$0xff] }
 0x244   : > { %5947 = vmatpush1.bf16.msra.mxu0 %v5946_v5  ;;  %v2683_v5 = vrot.slane %v8061_v47, 4  ;;  %v5049_v47 = vld [vmem:[%s9689_s5 + $0x328] sm:$0xff] }
 0x245   : > { %5949 = vmatprep.subr.bf16.mxu0 %v5948_v6  ;;  %v2592_v6 = vld [vmem:[#allocation2 + $0x40] sm:$0xf] }
 0x246   : > { %v2684_v7 = vsel %vm1707_vm14, %v2682_v60, %v2683_v5  ;;  %v2689_v8 = vrot.slane %v2592_v6, 4  ;;  %v2902_v60 = vld [vmem:[%s9689_s5 + $0x10] sm:$0xff] }
 0x248   : > { %5951 = vmatpush1.bf16.msra.mxu0 %v5950_v11  ;;  %v2690_v10 = vsel %vm1707_vm14, %v2683_v5, %v2689_v8  ;;  %v5048_v11 = vld [vmem:[%s9689_s5 + $0x320] sm:$0xff] }
 0x249   : > { %5953 = vmatprep.subr.bf16.mxu0 %v5952_v12  ;;  %v6022_v12 = vpack.c.bf16 %v5051_v37, %v5049_v47  ;;  %v6024_v14 = vpack.c.bf16 %v5050_v13, %v5048_v11  ;;  %v2907_v47 = vld [vmem:[%s9689_s5 + $0x38] sm:$0xff]  ;;  %v6044_v13 = vpack.c.bf16 %v2902_v60, %v2900_v3  ;;  %v2934_v3 = vld [vmem:[%s9689_s5 + $0x110] sm:$0xff] }
 0x24b   : > { %6023 = vmatprep.subr.bf16.mxu1 %v6022_v12 }
 0x24c   : > { %5955 = vmatpush1.bf16.msra.mxu0 %v5954_v17  ;;  %6025 = vmatpush1.bf16.msra.mxu1 %v6024_v14  ;;  %v5052_v17 = vld [vmem:[%s9689_s5 + $0x340] sm:$0xff] }
 0x24d   : > { %5957 = vmatprep.subr.bf16.mxu0 %v5956_v19  ;;  %v6026_v19 = vpack.c.bf16 %v5055_v16, %v5053_v15  ;;  %v6028_v22 = vpack.c.bf16 %v5054_v50, %v5052_v17  ;;  %v2904_v16 = vld [vmem:[%s9689_s5 + $0x20] sm:$0xff]  ;;  %v2906_v17 = vld [vmem:[%s9689_s5 + $0x30] sm:$0xff]  ;;  %v2909_v50 = vld [vmem:[%s9689_s5 + $0x48] sm:$0xff] }
 0x24f   : > { %6027 = vmatprep.subr.bf16.mxu1 %v6026_v19 }
 0x250   : > { %5959 = vmatpush1.bf16.msra.mxu0 %v5958_v24  ;;  %v6030_v24 = vpack.c.bf16 %v5059_v21, %v5057_v20  ;;  %6029 = vmatpush1.bf16.msra.mxu1 %v6028_v22  ;;  %v2911_v20 = vld [vmem:[%s9689_s5 + $0x58] sm:$0xff]  ;;  %v6048_v21 = vpack.c.bf16 %v2906_v17, %v2904_v16 }
 0x251   : > { %5961 = vmatprep.subr.bf16.mxu0 %v5960_v26  ;;  %v5056_v26 = vld [vmem:[%s9689_s5 + $0x360] sm:$0xff]  ;;  %v6050_v22 = vpack.c.bf16 %v2911_v20, %v2909_v50  ;;  %v2947_v16 = vld [vmem:[%s9689_s5 + $0x178] sm:$0xff]  ;;  %v2946_v20 = vld [vmem:[%s9689_s5 + $0x170] sm:$0xff] }
 0x252   : > { %v6032_v44 = vpack.c.bf16 %v5058_v27, %v5056_v26  ;;  %6031 = vmatprep.subr.bf16.mxu1 %v6030_v24  ;;  %v2908_v24 = vld [vmem:[%s9689_s5 + $0x40] sm:$0xff]  ;;  %v2910_v26 = vld [vmem:[%s9689_s5 + $0x50] sm:$0xff]  ;;  %v2913_v27 = vld [vmem:[%s9689_s5 + $0x68] sm:$0xff] }
 0x253   : > { %v2944_v50 = vld [vmem:[%s9689_s5 + $0x160] sm:$0xff] }
 0x254   : > { %5963 = vmatpush1.bf16.msra.mxu0 %v5962_v30  ;;  %v6034_v30 = vpack.c.bf16 %v5063_v29, %v5061_v28  ;;  %6033 = vmatpush1.bf16.msra.mxu1 %v6032_v44  ;;  %v2915_v28 = vld [vmem:[%s9689_s5 + $0x78] sm:$0xff]  ;;  %v6052_v44 = vpack.c.bf16 %v2910_v26, %v2908_v24  ;;  %v6088_v24 = vpack.c.bf16 %v2946_v20, %v2944_v50  ;;  %v5092_v20 = vld [vmem:[%s9689_s5 + $0x460] sm:$0xff] }
 0x255   : > { %5965 = vmatprep.subr.bf16.mxu0 %v5964_v31  ;;  %v5060_v31 = vld [vmem:[%s9689_s5 + $0x380] sm:$0xff] }
 0x256   : > { %v6036_v35 = vpack.c.bf16 %v5062_v32, %v5060_v31  ;;  %6035 = vmatprep.subr.bf16.mxu1 %v6034_v30  ;;  %v6054_v30 = vpack.c.bf16 %v2915_v28, %v2913_v27  ;;  %v2912_v31 = vld [vmem:[%s9689_s5 + $0x60] sm:$0xff]  ;;  %v2914_v32 = vld [vmem:[%s9689_s5 + $0x70] sm:$0xff] }
 0x257   : > { %v2948_v27 = vld [vmem:[%s9689_s5 + $0x180] sm:$0xff]  ;;  %v2950_v28 = vld [vmem:[%s9689_s5 + $0x190] sm:$0xff] }
 0x258   : > { %5967 = vmatpush1.bf16.msra.mxu0 %v5966_v61  ;;  %v5064_v61 = vld [vmem:[%s9689_s5 + $0x3a0] sm:$0xff]  ;;  %6037 = vmatpush1.bf16.msra.mxu1 %v6036_v35  ;;  %v6056_v35 = vpack.c.bf16 %v2914_v32, %v2912_v31 }
 0x259   : > { %5969 = vmatprep.subr.bf16.mxu0 %v5968_v39  ;;  %v2901_v39 = vld [vmem:[%s9689_s5 + $0x8] sm:$0xff]  ;;  %v6040_v41 = vpack.c.bf16 %v5066_v38, %v5064_v61  ;;  %6039 = vmatprep.subr.bf16.mxu1 %v6038_v36  ;;  %v6058_v36 = vpack.c.bf16 %v2919_v34, %v2917_v33  ;;  %v2916_v61 = vld [vmem:[%s9689_s5 + $0x80] sm:$0xff]  ;;  %v2918_v38 = vld [vmem:[%s9689_s5 + $0x90] sm:$0xff] }
 0x25a   : > { %v6042_v42 = vpack.c.bf16 %v2903_v40, %v2901_v39  ;;  %v2921_v39 = vld [vmem:[%s9689_s5 + $0xa8] sm:$0xff]  ;;  %v2923_v40 = vld [vmem:[%s9689_s5 + $0xb8] sm:$0xff]  ;;  %v2952_v32 = vld [vmem:[%s9689_s5 + $0x1a0] sm:$0xff] }
 0x25b   : > { %2770 = vmatmul.mubr.f32.vlgmr.msra.gmra.mrb[6].mxu0 %v2678_v56  ;;  %v2954_v33 = vld [vmem:[%s9689_s5 + $0x1b0] sm:$0xff]  ;;  %v2957_v34 = vld [vmem:[%s9689_s5 + $0x1c8] sm:$0xff] }
 0x25c   : > { %2775 = vmatprep.mubr.f32.mxu0 %v2688_v46  ;;  %5971 = vmatpush1.bf16.msra.mxu0 %v5970_v52 }
 0x25d   : > { %5973 = vmatprep.subr.bf16.mxu0 %v5972_v53  ;;  %6041 = vmatpush1.bf16.msra.mxu1 %v6040_v41  ;;  %v6060_v41 = vpack.c.bf16 %v2918_v38, %v2916_v61  ;;  %v2956_v38 = vld [vmem:[%s9689_s5 + $0x1c0] sm:$0xff] }
 0x25e   : > { %6043 = vmatprep.subr.bf16.mxu1 %v6042_v42  ;;  %v6062_v42 = vpack.c.bf16 %v2923_v40, %v2921_v39  ;;  %v2958_v39 = vld [vmem:[%s9689_s5 + $0x1d0] sm:$0xff]  ;;  %v5073_v40 = vld [vmem:[%s9689_s5 + $0x3c8] sm:$0xff] }
 0x25f   : > { %2776 = vmatmul.mubr.f32.gmra.mrb[8].mxu0 %v2686_v1 }
 0x260   : > { %5975 = vmatpush1.bf16.msra.mxu0 %v5974_v59  ;;  %2846 = vmatprep.mubr.f32.mxu0 %v6583_v9 }
 0x261   : > { %5978 = vmatprep.subr.msk.bf16.mxu0 %vm7174_vm1, %v5976_v62 }
 0x264   : > { %5981 = vmatpush1.bf16.msk.msra.mxu0 %vm7174_vm1, %v5979_v2 }
 0x265   : > { %6348 = vmatprep.subr.bf16.mxu0 %v6581_v4 }
 0x267   : > { %5006 = vmatmul.mubr.msk.f32.vlgmr.msra.gmra.mrb[6].mxu0 %vm1500_vm3, %v2684_v7 }
 0x268   : > { %2852 = vmatprep.mubr.f32.mxu0 %v6583_v9 }
 0x26b   : > { %5007 = vmatmul.mubr.msk.f32.gmra.mrb[8].mxu0 %vm1500_vm3, %v2690_v10  ;;  %v2905_v10 = vld [vmem:[%s9689_s5 + $0x28] sm:$0xff] }
 0x26c   : > { %v6046_v15 = vpack.c.bf16 %v2907_v47, %v2905_v10  ;;  %v2938_v10 = vld [vmem:[%s9689_s5 + $0x130] sm:$0xff]  ;;  %v2941_v47 = vld [vmem:[%s9689_s5 + $0x148] sm:$0xff] }
 0x33a   : > { %v2848_v49 = vpop.f32.mrb[6].mxu0 }
 0x33b   : > { %v2875_v51 = vadd.f32 %v2868_v45, %v2848_v49  ;;  %v2850_v52 = vpop.f32.mrb[7].mxu0  ;;  %v2927_v49 = vld [vmem:[%s9689_s5 + $0xd8] sm:$0xff] }
 0x33c   : > { %v2876_v53 = vadd.f32 %v2872_v48, %v2850_v52 }
 0x33d   : > { %vm2879_vm3 = vcmp.gt.f32.partialorder %v2875_v51, 0.0  ;;  %v2883_v54 = vmul.f32 0.3, %v2875_v51 }
 0x33e   : > { %vm2880_vm5 = vcmp.gt.f32.partialorder %v2876_v53, 0.0  ;;  %v2884_v55 = vmul.f32 0.3, %v2876_v53  ;;  %v2854_v56 = vpop.f32.mrb[8].mxu0 }
 0x33f   : > { %v8382_v57 = vsel %vm2879_vm3, %v2875_v51, %v2883_v54  ;;  %v2877_v58 = vadd.f32 %v2868_v45, %v2854_v56  ;;  %v2856_v18 = vpop.f32.mrb[9].mxu0  ;;  %v2922_v45 = vld [vmem:[%s9689_s5 + $0xb0] sm:$0xff]  ;;  %v2931_v56 = vld [vmem:[%s9689_s5 + $0xf8] sm:$0xff]  ;;  %vm3719_vm3 = vcmask 420864  }
 0x340   : > { %2891 = vst [vmem:[#allocation3] sm:$0xff] %v8382_v57  ;;  %v2888_v46 = vsel %vm2880_vm5, %v2876_v53, %v2884_v55  ;;  %v2878_v59 = vadd.f32 %v2872_v48, %v2856_v18  ;;  %v2925_v48 = vld [vmem:[%s9689_s5 + $0xc8] sm:$0xff]  ;;  %v6064_v51 = vpack.c.bf16 %v2922_v45, %v2920_v43  ;;  %v2924_v53 = vld [vmem:[%s9689_s5 + $0xc0] sm:$0xff]  ;;  %v2926_v54 = vld [vmem:[%s9689_s5 + $0xd0] sm:$0xff] }
 0x341   : > { %2893 = vst.msk [vmem:[#allocation3 + $0x8] sm:$0xff] %vm2892_vm6, %v2888_v46  ;;  %vm2881_vm7 = vcmp.gt.f32.partialorder %v2877_v58, 0.0  ;;  %v2885_v62 = vmul.f32 0.3, %v2877_v58  ;;  %v6066_v52 = vpack.c.bf16 %v2927_v49, %v2925_v48  ;;  %v2929_v55 = vld [vmem:[%s9689_s5 + $0xe8] sm:$0xff]  ;;  %v2928_v46 = vld [vmem:[%s9689_s5 + $0xe0] sm:$0xff] }
 0x342   : > { %vm2882_vm8 = vcmp.gt.f32.partialorder %v2878_v59, 0.0  ;;  %v2886_v63 = vmul.f32 0.3, %v2878_v59  ;;  %v6070_v18 = vpack.c.bf16 %v2931_v56, %v2929_v55  ;;  %v5072_v45 = vld [vmem:[%s9689_s5 + $0x3c0] sm:$0xff]  ;;  %v5074_v48 = vld [vmem:[%s9689_s5 + $0x3d0] sm:$0xff]  ;;  %v5077_v49 = vld [vmem:[%s9689_s5 + $0x3e8] sm:$0xff] }
 0x343   : > { %v2889_v0 = vsel %vm2881_vm7, %v2877_v58, %v2885_v62  ;;  %v6068_v58 = vpack.c.bf16 %v2926_v54, %v2924_v53  ;;  %v2933_v62 = vld [vmem:[%s9689_s5 + $0x108] sm:$0xff]  ;;  %v5076_v55 = vld [vmem:[%s9689_s5 + $0x3e0] sm:$0xff]  ;;  %v5078_v56 = vld [vmem:[%s9689_s5 + $0x3f0] sm:$0xff]  ;;  %vm4486_vm7 = vcmask 80896  }
 0x344   : > { %2894 = vst [vmem:[#allocation3 + $0x10] sm:$0xff] %v2889_v0  ;;  %v2890_v1 = vsel %vm2882_vm8, %v2878_v59, %v2886_v63  ;;  %v2930_v59 = vld [vmem:[%s9689_s5 + $0xf0] sm:$0xff]  ;;  %v2935_v63 = vld [vmem:[%s9689_s5 + $0x118] sm:$0xff] }
 0x345   : > { %2895 = vst.msk [vmem:[#allocation3 + $0x18] sm:$0xff] %vm2892_vm6, %v2890_v1  ;;  %v6072_v0 = vpack.c.bf16 %v2930_v59, %v2928_v46  ;;  %v6074_v1 = vpack.c.bf16 %v2935_v63, %v2933_v62  ;;  %v5083_v46 = vld [vmem:[%s9689_s5 + $0x418] sm:$0xff]  ;;  %v6108_v63 = vpack.c.bf16 %v5078_v56, %v5076_v55  ;;  %v5112_v56 = vld [vmem:[%s9689_s5 + $0x500] sm:$0xff] }
 0x347   : > { %v2960_v5 = vld [vmem:[#allocation3] sm:$0xfe] }
 0x348   : > { %v2961_v2 = vld [vmem:[#allocation3 + $0x8] sm:$0xfe]  ;;  %v3029_v12 = vrot.slane %v2960_v5, 1  ;;  %v2937_v5 = vld [vmem:[%s9689_s5 + $0x128] sm:$0xff] }
 0x349   : > { %v3032_v37 = vrot.slane %v2961_v2, 1  ;;  %v2897_v29 = vld [vmem:[#allocation3 + $0x8] sm:$0xff]  ;;  %v2932_v2 = vld [vmem:[%s9689_s5 + $0x100] sm:$0xff] }
 0x34a   : > { %v6076_v60 = vpack.c.bf16 %v2934_v3, %v2932_v2  ;;  %v5080_v2 = vld [vmem:[%s9689_s5 + $0x400] sm:$0xff]  ;;  %v5082_v3 = vld [vmem:[%s9689_s5 + $0x410] sm:$0xff] }
 0x34b   : > { %v2962_v6 = vld [vmem:[#allocation3 + $0x10] sm:$0x1f] }
 0x34c   : > { %v2963_v7 = vld [vmem:[#allocation3 + $0x18] sm:$0x1f]  ;;  %v3030_v8 = vrot.slane %v2962_v6, 1  ;;  %v2939_v6 = vld [vmem:[%s9689_s5 + $0x138] sm:$0xff] }
 0x34d   : > { %v3033_v11 = vrot.slane %v2963_v7, 1  ;;  %v6078_v7 = vpack.c.bf16 %v2939_v6, %v2937_v5  ;;  %v8584_v53 = vld [vmem:[#allocation3 + $0x18] sm:$0x3f]  ;;  %v2898_v5 = vld [vmem:[#allocation3 + $0x10] sm:$0xf] }
 0x34e   : > { %v3031_v19 = vsel %vm1683_vm10, %v3029_v12, %v3030_v8  ;;  %v2899_v59 = vld [vmem:[#allocation3 + $0x18] sm:$0xf]  ;;  %v3274_v62 = vrot.slane %v8584_v53, 2  ;;  %v5087_v6 = vld [vmem:[%s9689_s5 + $0x438] sm:$0xff]  ;;  %v5144_v53 = vld [vmem:[%s9689_s5 + $0x5f0] sm:$0xff] }
 0x34f   : > { %v3034_v14 = vsel %vm1683_vm10, %v3032_v37, %v3033_v11  ;;  %v2943_v37 = vld [vmem:[%s9689_s5 + $0x158] sm:$0xff] }
 0x350   : > { %5068 = vmatprep.mubr.msk.f32.mxu1 %vm2892_vm6, %v3034_v14  ;;  %v6082_v12 = vpack.c.bf16 %v2943_v37, %v2941_v47  ;;  %v2942_v14 = vld [vmem:[%s9689_s5 + $0x150] sm:$0xff]  ;;  %v5089_v37 = vld [vmem:[%s9689_s5 + $0x448] sm:$0xff] }
 0x351   : > { %3106 = vmatmul.mubr.f32.vlgmr.msra.gmra.mrb[30].mxu1 %v3031_v19  ;;  %v5086_v47 = vld [vmem:[%s9689_s5 + $0x430] sm:$0xff] }
 0x352   : > { %6045 = vmatpush1.bf16.msra.mxu1 %v6044_v13  ;;  %5069 = vmatprep.mubr.msk.f32.mxu1 %vm2892_vm6, %v3033_v11  ;;  %v2940_v13 = vld [vmem:[%s9689_s5 + $0x140] sm:$0xff] }
 0x353   : > { %6047 = vmatprep.subr.bf16.mxu1 %v6046_v15  ;;  %v2945_v15 = vld [vmem:[%s9689_s5 + $0x168] sm:$0xff]  ;;  %v6084_v17 = vpack.c.bf16 %v2942_v14, %v2940_v13  ;;  %v5088_v14 = vld [vmem:[%s9689_s5 + $0x440] sm:$0xff] }
 0x354   : > { %v6086_v19 = vpack.c.bf16 %v2947_v16, %v2945_v15  ;;  %v5090_v15 = vld [vmem:[%s9689_s5 + $0x450] sm:$0xff]  ;;  %v5093_v16 = vld [vmem:[%s9689_s5 + $0x468] sm:$0xff] }
 0x355   : > { %3112 = vmatmul.mubr.f32.gmra.mrb[32].mxu1 %v3030_v8  ;;  %v2936_v8 = vld [vmem:[%s9689_s5 + $0x120] sm:$0xff] }
 0x356   : > { %6049 = vmatpush1.bf16.msra.mxu1 %v6048_v21  ;;  %5070 = vmatprep.mubr.msk.f32.mxu1 %vm2892_vm6, %v2897_v29  ;;  %v6080_v11 = vpack.c.bf16 %v2938_v10, %v2936_v8  ;;  %v2949_v21 = vld [vmem:[%s9689_s5 + $0x188] sm:$0xff]  ;;  %v5084_v10 = vld [vmem:[%s9689_s5 + $0x420] sm:$0xff] }
 0x357   : > { %6051 = vmatprep.subr.bf16.mxu1 %v6050_v22  ;;  %v2951_v22 = vld [vmem:[%s9689_s5 + $0x198] sm:$0xff]  ;;  %v2953_v29 = vld [vmem:[%s9689_s5 + $0x1a8] sm:$0xff] }
 0x358   : > { %v6090_v26 = vpack.c.bf16 %v2951_v22, %v2949_v21  ;;  %v5094_v21 = vld [vmem:[%s9689_s5 + $0x470] sm:$0xff]  ;;  %v5097_v22 = vld [vmem:[%s9689_s5 + $0x488] sm:$0xff] }
 0x35a   : > { %6053 = vmatpush1.bf16.msra.mxu1 %v6052_v44  ;;  %v2955_v44 = vld [vmem:[%s9689_s5 + $0x1b8] sm:$0xff] }
 0x35b   : > { %6055 = vmatprep.subr.bf16.mxu1 %v6054_v30  ;;  %v6092_v30 = vpack.c.bf16 %v2950_v28, %v2948_v27  ;;  %v6094_v31 = vpack.c.bf16 %v2955_v44, %v2953_v29  ;;  %v5096_v28 = vld [vmem:[%s9689_s5 + $0x480] sm:$0xff]  ;;  %v5098_v29 = vld [vmem:[%s9689_s5 + $0x490] sm:$0xff]  ;;  %v5101_v44 = vld [vmem:[%s9689_s5 + $0x4a8] sm:$0xff] }
 0x35e   : > { %6057 = vmatpush1.bf16.msra.mxu1 %v6056_v35  ;;  %v2959_v35 = vld [vmem:[%s9689_s5 + $0x1d8] sm:$0xff] }
 0x35f   : > { %6059 = vmatprep.subr.bf16.mxu1 %v6058_v36  ;;  %v6096_v36 = vpack.c.bf16 %v2954_v33, %v2952_v32  ;;  %v6098_v61 = vpack.c.bf16 %v2959_v35, %v2957_v34  ;;  %v5100_v33 = vld [vmem:[%s9689_s5 + $0x4a0] sm:$0xff]  ;;  %v5102_v34 = vld [vmem:[%s9689_s5 + $0x4b0] sm:$0xff]  ;;  %v5105_v35 = vld [vmem:[%s9689_s5 + $0x4c8] sm:$0xff] }
 0x362   : > { %6061 = vmatpush1.bf16.msra.mxu1 %v6060_v41  ;;  %v5075_v41 = vld [vmem:[%s9689_s5 + $0x3d8] sm:$0xff] }
 0x363   : > { %6063 = vmatprep.subr.bf16.mxu1 %v6062_v42  ;;  %v6100_v42 = vpack.c.bf16 %v2958_v39, %v2956_v38  ;;  %v6102_v43 = vpack.c.bf16 %v5075_v41, %v5073_v40  ;;  %v5104_v39 = vld [vmem:[%s9689_s5 + $0x4c0] sm:$0xff]  ;;  %v5106_v40 = vld [vmem:[%s9689_s5 + $0x4d0] sm:$0xff]  ;;  %v5109_v41 = vld [vmem:[%s9689_s5 + $0x4e8] sm:$0xff] }
 0x366   : > { %6065 = vmatpush1.bf16.msra.mxu1 %v6064_v51  ;;  %v5079_v51 = vld [vmem:[%s9689_s5 + $0x3f8] sm:$0xff] }
 0x367   : > { %6067 = vmatprep.subr.bf16.mxu1 %v6066_v52  ;;  %v6104_v52 = vpack.c.bf16 %v5074_v48, %v5072_v45  ;;  %v6106_v54 = vpack.c.bf16 %v5079_v51, %v5077_v49  ;;  %v5108_v48 = vld [vmem:[%s9689_s5 + $0x4e0] sm:$0xff]  ;;  %v5110_v49 = vld [vmem:[%s9689_s5 + $0x4f0] sm:$0xff]  ;;  %v5113_v51 = vld [vmem:[%s9689_s5 + $0x508] sm:$0xff] }
 0x36a   : > { %6069 = vmatpush1.bf16.msra.mxu1 %v6068_v58  ;;  %v3202_v58 = vld [vmem:[#allocation3 + $0x8] sm:$0xfc] }
 0x36b   : > { %6071 = vmatprep.subr.bf16.mxu1 %v6070_v18  ;;  %v5081_v18 = vld [vmem:[%s9689_s5 + $0x408] sm:$0xff] }
 0x36e   : > { %6073 = vmatpush1.bf16.msra.mxu1 %v6072_v0  ;;  %v3273_v0 = vrot.slane %v3202_v58, 2  ;;  %v5114_v58 = vld [vmem:[%s9689_s5 + $0x510] sm:$0xff] }
 0x36f   : > { %6075 = vmatprep.subr.bf16.mxu1 %v6074_v1  ;;  %v6110_v1 = vpack.c.bf16 %v5083_v46, %v5081_v18  ;;  %v5117_v18 = vld [vmem:[%s9689_s5 + $0x528] sm:$0xff]  ;;  %v5119_v46 = vld [vmem:[%s9689_s5 + $0x538] sm:$0xff] }
 0x372   : > { %6077 = vmatpush1.bf16.msra.mxu1 %v6076_v60  ;;  %v3275_v60 = vsel %vm2122_vm2, %v3273_v0, %v3274_v62  ;;  %v5116_v0 = vld [vmem:[%s9689_s5 + $0x520] sm:$0xff] }
 0x373   : > { %6079 = vmatprep.subr.bf16.mxu1 %v6078_v7  ;;  %v6112_v7 = vpack.c.bf16 %v5082_v3, %v5080_v2  ;;  %v5121_v2 = vld [vmem:[%s9689_s5 + $0x548] sm:$0xff]  ;;  %v5123_v3 = vld [vmem:[%s9689_s5 + $0x558] sm:$0xff] }
 0x376   : > { %6081 = vmatpush1.bf16.msra.mxu1 %v6080_v11  ;;  %v5091_v11 = vld [vmem:[%s9689_s5 + $0x458] sm:$0xff] }
 0x377   : > { %6083 = vmatprep.subr.bf16.mxu1 %v6082_v12  ;;  %v6116_v12 = vpack.c.bf16 %v5086_v47, %v5084_v10  ;;  %v6118_v13 = vpack.c.bf16 %v5091_v11, %v5089_v37  ;;  %v5124_v37 = vld [vmem:[%s9689_s5 + $0x560] sm:$0xff]  ;;  %v5126_v11 = vld [vmem:[%s9689_s5 + $0x570] sm:$0xff] }
 0x37a   : > { %6085 = vmatpush1.bf16.msra.mxu1 %v6084_v17  ;;  %v5095_v17 = vld [vmem:[%s9689_s5 + $0x478] sm:$0xff] }
 0x37b   : > { %6087 = vmatprep.subr.bf16.mxu1 %v6086_v19  ;;  %v6120_v19 = vpack.c.bf16 %v5090_v15, %v5088_v14  ;;  %v6122_v50 = vpack.c.bf16 %v5095_v17, %v5093_v16  ;;  %v6156_v14 = vpack.c.bf16 %v5126_v11, %v5124_v37  ;;  %v5128_v16 = vld [vmem:[%s9689_s5 + $0x580] sm:$0xff]  ;;  %v5130_v17 = vld [vmem:[%s9689_s5 + $0x590] sm:$0xff] }
 0x37c   : > { %v5150_v37 = vld [vmem:[%s9689_s5 + $0x620] sm:$0xff]  ;;  %v5152_v11 = vld [vmem:[%s9689_s5 + $0x630] sm:$0xff] }
 0x37e   : > { %6089 = vmatpush1.bf16.msra.mxu1 %v6088_v24  ;;  %v5099_v24 = vld [vmem:[%s9689_s5 + $0x498] sm:$0xff] }
 0x37f   : > { %6091 = vmatprep.subr.bf16.mxu1 %v6090_v26  ;;  %v6124_v26 = vpack.c.bf16 %v5094_v21, %v5092_v20  ;;  %v6126_v27 = vpack.c.bf16 %v5099_v24, %v5097_v22  ;;  %v3203_v20 = vld [vmem:[#allocation3 + $0x10] sm:$0x3f]  ;;  %v6160_v21 = vpack.c.bf16 %v5130_v17, %v5128_v16  ;;  %v3201_v22 = vld [vmem:[#allocation3] sm:$0xfc]  ;;  %v5295_v16 = vld [vmem:[%s9691_s7 + $0x1c0] sm:$0xff] }
 0x380   : > { %v5296_v17 = vld [vmem:[%s9691_s7 + $0x1c8] sm:$0xff] }
 0x382   : > { %6093 = vmatpush1.bf16.msra.mxu1 %v6092_v30  ;;  %v5103_v30 = vld [vmem:[%s9689_s5 + $0x4b8] sm:$0xff] }
 0x383   : > { %6095 = vmatprep.subr.bf16.mxu1 %v6094_v31  ;;  %v6128_v31 = vpack.c.bf16 %v5098_v29, %v5096_v28  ;;  %v6130_v32 = vpack.c.bf16 %v5103_v30, %v5101_v44  ;;  %v3271_v28 = vrot.slane %v3203_v20, 2  ;;  %v5139_v29 = vld [vmem:[%s9689_s5 + $0x5c8] sm:$0xff]  ;;  %v5141_v44 = vld [vmem:[%s9689_s5 + $0x5d8] sm:$0xff]  ;;  %v5285_v30 = vld [vmem:[%s9691_s7 + $0x170] sm:$0xff] }
 0x384   : > { %v5156_v20 = vld [vmem:[%s9689_s5 + $0x650] sm:$0xff] }
 0x386   : > { %6097 = vmatpush1.bf16.msra.mxu1 %v6096_v36  ;;  %v5107_v36 = vld [vmem:[%s9689_s5 + $0x4d8] sm:$0xff] }
 0x387   : > { %6099 = vmatprep.subr.bf16.mxu1 %v6098_v61  ;;  %v6132_v61 = vpack.c.bf16 %v5102_v34, %v5100_v33  ;;  %v6134_v38 = vpack.c.bf16 %v5107_v36, %v5105_v35  ;;  %v5138_v33 = vld [vmem:[%s9689_s5 + $0x5c0] sm:$0xff]  ;;  %v5286_v35 = vld [vmem:[%s9691_s7 + $0x178] sm:$0xff]  ;;  %v6166_v36 = vpack.c.bf16 %v5141_v44, %v5139_v29  ;;  %v5160_v29 = vld [vmem:[%s9689_s5 + $0x670] sm:$0xff] }
 0x388   : > { %v8779_v34 = vld [vmem:[#allocation3 + $0x18] sm:$0x7f]  ;;  %v5163_v44 = vld [vmem:[%s9689_s5 + $0x688] sm:$0xff] }
 0x38a   : > { %6101 = vmatpush1.bf16.msra.mxu1 %v6100_v42  ;;  %v5111_v42 = vld [vmem:[%s9689_s5 + $0x4f8] sm:$0xff] }
 0x38b   : > { %6103 = vmatprep.subr.bf16.mxu1 %v6102_v43  ;;  %v6136_v43 = vpack.c.bf16 %v5106_v40, %v5104_v39  ;;  %v6138_v45 = vpack.c.bf16 %v5111_v42, %v5109_v41  ;;  %v5287_v39 = vld [vmem:[%s9691_s7 + $0x180] sm:$0xff]  ;;  %v5288_v40 = vld [vmem:[%s9691_s7 + $0x188] sm:$0xff]  ;;  %v3364_v42 = vld [vmem:[#allocation3 + $0x8] sm:$0xf8] }
 0x38d   : > { %3189 = vmatmul.mubr.f32.vlgmr.msra.gmra.mrb[30].mxu1 %v8382_v57  ;;  %v5085_v57 = vld [vmem:[%s9689_s5 + $0x428] sm:$0xff] }
 0x38e   : > { %5071 = vmatprep.mubr.msk.f32.mxu1 %vm2892_vm6, %v2899_v59  ;;  %6105 = vmatpush1.bf16.msra.mxu1 %v6104_v52  ;;  %v6114_v8 = vpack.c.bf16 %v5087_v6, %v5085_v57  ;;  %v5115_v52 = vld [vmem:[%s9689_s5 + $0x518] sm:$0xff]  ;;  %v6144_v59 = vpack.c.bf16 %v5114_v58, %v5112_v56  ;;  %v6150_v57 = vpack.c.bf16 %v5123_v3, %v5121_v2  ;;  %v5120_v6 = vld [vmem:[%s9689_s5 + $0x540] sm:$0xff] }
 0x38f   : > { %6107 = vmatprep.subr.bf16.mxu1 %v6106_v54  ;;  %v6140_v54 = vpack.c.bf16 %v5110_v49, %v5108_v48  ;;  %v6142_v55 = vpack.c.bf16 %v5115_v52, %v5113_v51  ;;  %v3436_v48 = vrot.slane %v8779_v34, 3  ;;  %v6352_v49 = vpack.c.bf16 %v5288_v40, %v5287_v39  ;;  %v5289_v52 = vld [vmem:[%s9691_s7 + $0x190] sm:$0xff]  ;;  %v5142_v58 = vld [vmem:[%s9689_s5 + $0x5e0] sm:$0xff]  ;;  %v5211_v34 = vld [vmem:[%s9689_s5 + $0x7f8] sm:$0xff] }
 0x390   : > { %v5146_v3 = vld [vmem:[%s9689_s5 + $0x600] sm:$0xff] }
 0x391   : > { %3195 = vmatmul.mubr.f32.gmra.mrb[32].mxu1 %v2898_v5  ;;  %v5166_v40 = vld [vmem:[%s9689_s5 + $0x6a0] sm:$0xff] }
 0x392   : > { %6109 = vmatpush1.bf16.msra.mxu1 %v6108_v63  ;;  %5132 = vmatprep.mubr.msk.f32.mxu1 %vm2892_vm6, %v3275_v60  ;;  %v6146_v63 = vpack.c.bf16 %v5119_v46, %v5117_v18  ;;  %v5122_v60 = vld [vmem:[%s9689_s5 + $0x550] sm:$0xff]  ;;  %v5149_v18 = vld [vmem:[%s9689_s5 + $0x618] sm:$0xff] }
 0x393   : > { %6111 = vmatprep.subr.bf16.mxu1 %v6110_v1  ;;  %v5118_v1 = vld [vmem:[%s9689_s5 + $0x530] sm:$0xff]  ;;  %v6152_v10 = vpack.c.bf16 %v5122_v60, %v5120_v6  ;;  %v5153_v6 = vld [vmem:[%s9689_s5 + $0x638] sm:$0xff] }
 0x394   : > { %v6148_v5 = vpack.c.bf16 %v5118_v1, %v5116_v0  ;;  %v5291_v0 = vld [vmem:[%s9691_s7 + $0x1a0] sm:$0xff]  ;;  %v5292_v1 = vld [vmem:[%s9691_s7 + $0x1a8] sm:$0xff] }
 0x395   : > { %v6358_v60 = vpack.c.bf16 %v5292_v1, %v5291_v0  ;;  %v5178_v0 = vld [vmem:[%s9689_s5 + $0x700] sm:$0xff]  ;;  %v5180_v1 = vld [vmem:[%s9689_s5 + $0x710] sm:$0xff] }
 0x396   : > { %6113 = vmatpush1.bf16.msra.mxu1 %v6112_v7  ;;  %v5125_v7 = vld [vmem:[%s9689_s5 + $0x568] sm:$0xff] }
 0x397   : > { %6115 = vmatprep.subr.bf16.mxu1 %v6114_v8  ;;  %v5127_v8 = vld [vmem:[%s9689_s5 + $0x578] sm:$0xff] }
 0x398   : > { %v6154_v47 = vpack.c.bf16 %v5127_v8, %v5125_v7  ;;  %v5293_v8 = vld [vmem:[%s9691_s7 + $0x1b0] sm:$0xff] }
 0x39a   : > { %6117 = vmatpush1.bf16.msra.mxu1 %v6116_v12  ;;  %v5129_v12 = vld [vmem:[%s9689_s5 + $0x588] sm:$0xff] }
 0x39b   : > { %6119 = vmatprep.subr.bf16.mxu1 %v6118_v13  ;;  %v5131_v13 = vld [vmem:[%s9689_s5 + $0x598] sm:$0xff] }
 0x39c   : > { %v6158_v15 = vpack.c.bf16 %v5131_v13, %v5129_v12  ;;  %v5155_v12 = vld [vmem:[%s9689_s5 + $0x648] sm:$0xff]  ;;  %v5157_v13 = vld [vmem:[%s9689_s5 + $0x658] sm:$0xff] }
 0x39e   : > { %6121 = vmatpush1.bf16.msra.mxu1 %v6120_v19  ;;  %v5135_v19 = vld [vmem:[%s9689_s5 + $0x5a8] sm:$0xff] }
 0x39f   : > { %6123 = vmatprep.subr.bf16.mxu1 %v6122_v50  ;;  %v5137_v50 = vld [vmem:[%s9689_s5 + $0x5b8] sm:$0xff] }
 0x3a0   : > { %v6162_v24 = vpack.c.bf16 %v5137_v50, %v5135_v19  ;;  %v6182_v19 = vpack.c.bf16 %v5157_v13, %v5155_v12  ;;  %v5154_v50 = vld [vmem:[%s9689_s5 + $0x640] sm:$0xff]  ;;  %v5191_v12 = vld [vmem:[%s9689_s5 + $0x768] sm:$0xff]  ;;  %v5193_v13 = vld [vmem:[%s9689_s5 + $0x778] sm:$0xff] }
 0x3a2   : > { %6125 = vmatpush1.bf16.msra.mxu1 %v6124_v26  ;;  %v5134_v26 = vld [vmem:[%s9689_s5 + $0x5a0] sm:$0xff] }
 0x3a3   : > { %6127 = vmatprep.subr.bf16.mxu1 %v6126_v27  ;;  %v5136_v27 = vld [vmem:[%s9689_s5 + $0x5b0] sm:$0xff] }
 0x3a6   : > { %6129 = vmatpush1.bf16.msra.mxu1 %v6128_v31  ;;  %v3270_v31 = vrot.slane %v3201_v22, 2  ;;  %v5161_v22 = vld [vmem:[%s9689_s5 + $0x678] sm:$0xff] }
 0x3a7   : > { %6131 = vmatprep.subr.bf16.mxu1 %v6130_v32  ;;  %v6164_v32 = vpack.c.bf16 %v5136_v27, %v5134_v26  ;;  %v6184_v26 = vpack.c.bf16 %v5156_v20, %v5154_v50  ;;  %v5199_v50 = vld [vmem:[%s9689_s5 + $0x798] sm:$0xff] }
 0x3a8   : > { %v3272_v41 = vsel %vm2122_vm2, %v3270_v31, %v3271_v28  ;;  %v3365_v20 = vld [vmem:[#allocation3 + $0x10] sm:$0x7f] }
 0x3aa   : > { %6133 = vmatpush1.bf16.msra.mxu1 %v6132_v61  ;;  %v5140_v61 = vld [vmem:[%s9689_s5 + $0x5d0] sm:$0xff] }
 0x3ab   : > { %6135 = vmatprep.subr.bf16.mxu1 %v6134_v38  ;;  %v6349_v38 = vpack.c.bf16 %v5286_v35, %v5285_v30  ;;  %v6168_v51 = vpack.c.bf16 %v5140_v61, %v5138_v33  ;;  %v5165_v30 = vld [vmem:[%s9689_s5 + $0x698] sm:$0xff]  ;;  %v5162_v33 = vld [vmem:[%s9689_s5 + $0x680] sm:$0xff]  ;;  %v5164_v35 = vld [vmem:[%s9689_s5 + $0x690] sm:$0xff] }
 0x3ac   : > { %v5169_v61 = vld [vmem:[%s9689_s5 + $0x6b8] sm:$0xff] }
 0x3ad   : > { %6350 = vmatpush1.bf16.msra.mxu0 %v6349_v38  ;;  %v6192_v38 = vpack.c.bf16 %v5164_v35, %v5162_v33  ;;  %v5200_v35 = vld [vmem:[%s9689_s5 + $0x7a0] sm:$0xff] }
 0x3ae   : > { %6137 = vmatpush1.bf16.msra.mxu1 %v6136_v43  ;;  %v5143_v43 = vld [vmem:[%s9689_s5 + $0x5e8] sm:$0xff]  ;;  %6351 = vmatprep.subr.bf16.mxu0 %v6581_v4 }
 0x3af   : > { %6139 = vmatprep.subr.bf16.mxu1 %v6138_v45  ;;  %v5145_v45 = vld [vmem:[%s9689_s5 + $0x5f8] sm:$0xff] }
 0x3b0   : > { %v6170_v56 = vpack.c.bf16 %v5145_v45, %v5143_v43  ;;  %v5173_v43 = vld [vmem:[%s9689_s5 + $0x6d8] sm:$0xff] }
 0x3b1   : > { %6353 = vmatpush1.bf16.msra.mxu0 %v6352_v49 }
 0x3b2   : > { %6141 = vmatpush1.bf16.msra.mxu1 %v6140_v54  ;;  %v5290_v54 = vld [vmem:[%s9691_s7 + $0x198] sm:$0xff]  ;;  %6354 = vmatprep.subr.bf16.mxu0 %v6581_v4 }
 0x3b3   : > { %6143 = vmatprep.subr.bf16.mxu1 %v6142_v55  ;;  %v3435_v55 = vrot.slane %v3364_v42, 3  ;;  %v5171_v42 = vld [vmem:[%s9689_s5 + $0x6c8] sm:$0xff] }
 0x3b4   : > { %v6198_v49 = vpack.c.bf16 %v5173_v43, %v5171_v42 }
 0x3b5   : > { %v3437_v46 = vsel %vm2399_vm4, %v3435_v55, %v3436_v48  ;;  %v5177_v55 = vld [vmem:[%s9689_s5 + $0x6f8] sm:$0xff] }
 0x3b6   : > { %6145 = vmatpush1.bf16.msra.mxu1 %v6144_v59  ;;  %v6355_v59 = vpack.c.bf16 %v5290_v54, %v5289_v52  ;;  %v5172_v52 = vld [vmem:[%s9689_s5 + $0x6d0] sm:$0xff]  ;;  %v5175_v54 = vld [vmem:[%s9689_s5 + $0x6e8] sm:$0xff] }
 0x3b7   : > { %6147 = vmatprep.subr.bf16.mxu1 %v6146_v63  ;;  %v6172_v63 = vpack.c.bf16 %v5144_v53, %v5142_v58  ;;  %v6202_v58 = vpack.c.bf16 %v5177_v55, %v5175_v54  ;;  %v5174_v53 = vld [vmem:[%s9689_s5 + $0x6e0] sm:$0xff] }
 0x3b8   : > { %6356 = vmatpush1.bf16.msra.mxu0 %v6355_v59 }
 0x3b9   : > { %6357 = vmatprep.subr.bf16.mxu0 %v6581_v4 }
 0x3ba   : > { %6149 = vmatpush1.bf16.msra.mxu1 %v6148_v5  ;;  %v5148_v5 = vld [vmem:[%s9689_s5 + $0x610] sm:$0xff] }
 0x3bb   : > { %6151 = vmatprep.subr.bf16.mxu1 %v6150_v57  ;;  %v5151_v57 = vld [vmem:[%s9689_s5 + $0x628] sm:$0xff]  ;;  %v6176_v7 = vpack.c.bf16 %v5148_v5, %v5146_v3  ;;  %v5185_v3 = vld [vmem:[%s9689_s5 + $0x738] sm:$0xff]  ;;  %v6208_v5 = vpack.c.bf16 %v5180_v1, %v5178_v0 }
 0x3bc   : > { %6359 = vmatpush1.bf16.msra.mxu0 %v6358_v60  ;;  %v5184_v60 = vld [vmem:[%s9689_s5 + $0x730] sm:$0xff]  ;;  %v5217_v0 = vld [vmem:[%s9689_s5 + $0x828] sm:$0xff]  ;;  %v5219_v1 = vld [vmem:[%s9689_s5 + $0x838] sm:$0xff] }
 0x3bd   : > { %6360 = vmatprep.subr.bf16.mxu0 %v6581_v4 }
 0x3be   : > { %6153 = vmatpush1.bf16.msra.mxu1 %v6152_v10  ;;  %v5294_v10 = vld [vmem:[%s9691_s7 + $0x1b8] sm:$0xff] }
 0x3bf   : > { %6155 = vmatprep.subr.bf16.mxu1 %v6154_v47  ;;  %v6178_v47 = vpack.c.bf16 %v5153_v6, %v5151_v57  ;;  %v5182_v6 = vld [vmem:[%s9689_s5 + $0x720] sm:$0xff] }
 0x3c2   : > { %6157 = vmatpush1.bf16.msra.mxu1 %v6156_v14  ;;  %v6361_v14 = vpack.c.bf16 %v5294_v10, %v5293_v8  ;;  %v5189_v8 = vld [vmem:[%s9689_s5 + $0x758] sm:$0xff]  ;;  %v6212_v10 = vpack.c.bf16 %v5184_v60, %v5182_v6  ;;  %v5221_v6 = vld [vmem:[%s9689_s5 + $0x848] sm:$0xff] }
 0x3c3   : > { %6159 = vmatprep.subr.bf16.mxu1 %v6158_v15  ;;  %v6180_v15 = vpack.c.bf16 %v5152_v11, %v5150_v37  ;;  %v5186_v37 = vld [vmem:[%s9689_s5 + $0x740] sm:$0xff]  ;;  %v5188_v11 = vld [vmem:[%s9689_s5 + $0x750] sm:$0xff]  ;;  %v5223_v60 = vld [vmem:[%s9689_s5 + $0x858] sm:$0xff] }
 0x3c4   : > { %6362 = vmatpush1.bf16.msra.mxu0 %v6361_v14  ;;  %v6216_v14 = vpack.c.bf16 %v5188_v11, %v5186_v37  ;;  %v5225_v37 = vld [vmem:[%s9689_s5 + $0x868] sm:$0xff]  ;;  %v5227_v11 = vld [vmem:[%s9689_s5 + $0x878] sm:$0xff] }
 0x3c5   : > { %6363 = vmatprep.subr.bf16.mxu0 %v6581_v4 }
 0x3c6   : > { %6161 = vmatpush1.bf16.msra.mxu1 %v6160_v21  ;;  %v5159_v21 = vld [vmem:[%s9689_s5 + $0x668] sm:$0xff] }
 0x3c7   : > { %6163 = vmatprep.subr.bf16.mxu1 %v6162_v24  ;;  %v6364_v24 = vpack.c.bf16 %v5296_v17, %v5295_v16  ;;  %v6186_v27 = vpack.c.bf16 %v5161_v22, %v5159_v21  ;;  %v5190_v16 = vld [vmem:[%s9689_s5 + $0x760] sm:$0xff]  ;;  %v5192_v17 = vld [vmem:[%s9689_s5 + $0x770] sm:$0xff]  ;;  %v3363_v22 = vld [vmem:[#allocation3] sm:$0xf8] }
 0x3c8   : > { %v6220_v21 = vpack.c.bf16 %v5192_v17, %v5190_v16  ;;  %v5229_v16 = vld [vmem:[%s9689_s5 + $0x888] sm:$0xff]  ;;  %v5231_v17 = vld [vmem:[%s9689_s5 + $0x898] sm:$0xff] }
 0x3c9   : > { %3347 = vmatmul.mubr.f32.vlgmr.msra.gmra.mrb[30].mxu1 %v3272_v41  ;;  %6365 = vmatpush1.bf16.msra.mxu0 %v6364_v24  ;;  %v5168_v41 = vld [vmem:[%s9689_s5 + $0x6b0] sm:$0xff] }
 0x3ca   : > { %5133 = vmatprep.mubr.msk.f32.mxu1 %vm2892_vm6, %v3274_v62  ;;  %6165 = vmatpush1.bf16.msra.mxu1 %v6164_v32  ;;  %v5147_v62 = vld [vmem:[%s9689_s5 + $0x608] sm:$0xff]  ;;  %v6190_v32 = vpack.c.bf16 %v5165_v30, %v5163_v44  ;;  %v6196_v45 = vpack.c.bf16 %v5168_v41, %v5166_v40  ;;  %v5203_v44 = vld [vmem:[%s9689_s5 + $0x7b8] sm:$0xff]  ;;  %v3432_v30 = vrot.slane %v3363_v22, 3 }
 0x3cb   : > { %6167 = vmatprep.subr.bf16.mxu1 %v6166_v36  ;;  %v6174_v2 = vpack.c.bf16 %v5149_v18, %v5147_v62  ;;  %6366 = vmatprep.subr.bf16.mxu0 %v6581_v4  ;;  %v5167_v36 = vld [vmem:[%s9689_s5 + $0x6a8] sm:$0xff]  ;;  %v5176_v62 = vld [vmem:[%s9689_s5 + $0x6f0] sm:$0xff]  ;;  %v5207_v40 = vld [vmem:[%s9689_s5 + $0x7d8] sm:$0xff] }
 0x3cc   : > { %v6194_v39 = vpack.c.bf16 %v5169_v61, %v5167_v36  ;;  %v5179_v18 = vld [vmem:[%s9689_s5 + $0x708] sm:$0xff]  ;;  %v6204_v59 = vpack.c.bf16 %v5176_v62, %v5174_v53  ;;  %v5202_v36 = vld [vmem:[%s9689_s5 + $0x7b0] sm:$0xff]  ;;  %v5215_v62 = vld [vmem:[%s9689_s5 + $0x818] sm:$0xff] }
 0x3cd   : > { %3353 = vmatmul.mubr.f32.gmra.mrb[32].mxu1 %v3271_v28  ;;  %v5158_v28 = vld [vmem:[%s9689_s5 + $0x660] sm:$0xff]  ;;  %v6228_v42 = vpack.c.bf16 %v5202_v36, %v5200_v35  ;;  %v5213_v53 = vld [vmem:[%s9689_s5 + $0x808] sm:$0xff]  ;;  %v5238_v36 = vld [vmem:[%s9689_s5 + $0x8d0] sm:$0xff] }
 0x3ce   : > { %6169 = vmatpush1.bf16.msra.mxu1 %v6168_v51  ;;  %5194 = vmatprep.mubr.msk.f32.mxu1 %vm2892_vm6, %v3437_v46  ;;  %v6188_v31 = vpack.c.bf16 %v5160_v29, %v5158_v28  ;;  %v5170_v51 = vld [vmem:[%s9689_s5 + $0x6c0] sm:$0xff]  ;;  %v5181_v46 = vld [vmem:[%s9689_s5 + $0x718] sm:$0xff]  ;;  %v3433_v28 = vrot.slane %v3365_v20, 3  ;;  %v5201_v29 = vld [vmem:[%s9689_s5 + $0x7a8] sm:$0xff] }
 0x3cf   : > { %6171 = vmatprep.subr.bf16.mxu1 %v6170_v56  ;;  %v6200_v56 = vpack.c.bf16 %v5172_v52, %v5170_v51  ;;  %v6226_v33 = vpack.c.bf16 %v5203_v44, %v5201_v29  ;;  %v5206_v51 = vld [vmem:[%s9689_s5 + $0x7d0] sm:$0xff]  ;;  %v5209_v52 = vld [vmem:[%s9689_s5 + $0x7e8] sm:$0xff]  ;;  %v5228_v20 = vld [vmem:[%s9689_s5 + $0x880] sm:$0xff] }
 0x3d0   : > { %v3434_v61 = vsel %vm2399_vm4, %v3432_v30, %v3433_v28  ;;  %v6234_v55 = vpack.c.bf16 %v5211_v34, %v5209_v52  ;;  %v5233_v22 = vld [vmem:[%s9689_s5 + $0x8a8] sm:$0xff]  ;;  %v5234_v29 = vld [vmem:[%s9689_s5 + $0x8b0] sm:$0xff]  ;;  %v5239_v30 = vld [vmem:[%s9689_s5 + $0x8d8] sm:$0xff] }
 0x3d1   : > { %v5237_v44 = vld [vmem:[%s9689_s5 + $0x8c8] sm:$0xff]  ;;  %v5236_v35 = vld [vmem:[%s9689_s5 + $0x8c0] sm:$0xff] }
 0x3d2   : > { %6173 = vmatpush1.bf16.msra.mxu1 %v6172_v63  ;;  %v6206_v63 = vpack.c.bf16 %v5181_v46, %v5179_v18  ;;  %v6238_v46 = vpack.c.bf16 %v5215_v62, %v5213_v53  ;;  %v5244_v34 = vld [vmem:[%s9689_s5 + $0x900] sm:$0xff]  ;;  %v5250_v62 = vld [vmem:[%s9689_s5 + $0x930] sm:$0xff] }
 0x3d3   : > { %6175 = vmatprep.subr.bf16.mxu1 %v6174_v2  ;;  %v5183_v2 = vld [vmem:[%s9689_s5 + $0x728] sm:$0xff]  ;;  %v5248_v53 = vld [vmem:[%s9689_s5 + $0x920] sm:$0xff] }
 0x3d4   : > { %v6210_v57 = vpack.c.bf16 %v5185_v3, %v5183_v2  ;;  %v6242_v3 = vpack.c.bf16 %v5219_v1, %v5217_v0  ;;  %v5252_v0 = vld [vmem:[%s9689_s5 + $0x940] sm:$0xff]  ;;  %v5254_v1 = vld [vmem:[%s9689_s5 + $0x950] sm:$0xff] }
 0x3d6   : > { %6177 = vmatpush1.bf16.msra.mxu1 %v6176_v7  ;;  %v5187_v7 = vld [vmem:[%s9689_s5 + $0x748] sm:$0xff] }
 0x3d7   : > { %6179 = vmatprep.subr.bf16.mxu1 %v6178_v47  ;;  %v6214_v47 = vpack.c.bf16 %v5189_v8, %v5187_v7  ;;  %v6246_v8 = vpack.c.bf16 %v5223_v60, %v5221_v6  ;;  %v5259_v6 = vld [vmem:[%s9691_s7 + $0xc0] sm:$0xff] }
 0x3da   : > { %6181 = vmatpush1.bf16.msra.mxu1 %v6180_v15  ;;  %v6218_v15 = vpack.c.bf16 %v5193_v13, %v5191_v12  ;;  %v6250_v13 = vpack.c.bf16 %v5227_v11, %v5225_v37 }
 0x3db   : > { %6183 = vmatprep.subr.bf16.mxu1 %v6182_v19  ;;  %v5197_v19 = vld [vmem:[%s9689_s5 + $0x788] sm:$0xff] }
 0x3dc   : > { %v6222_v24 = vpack.c.bf16 %v5199_v50, %v5197_v19  ;;  %v6254_v50 = vpack.c.bf16 %v5231_v17, %v5229_v16  ;;  %v5266_v16 = vld [vmem:[%s9691_s7 + $0xf8] sm:$0xff]  ;;  %v5267_v17 = vld [vmem:[%s9691_s7 + $0x100] sm:$0xff] }
 0x3de   : > { %6185 = vmatpush1.bf16.msra.mxu1 %v6184_v26  ;;  %v5196_v26 = vld [vmem:[%s9689_s5 + $0x780] sm:$0xff] }
 0x3df   : > { %6187 = vmatprep.subr.bf16.mxu1 %v6186_v27  ;;  %v5198_v27 = vld [vmem:[%s9689_s5 + $0x790] sm:$0xff] }
 0x3e2   : > { %6189 = vmatpush1.bf16.msra.mxu1 %v6188_v31  ;;  %v6224_v31 = vpack.c.bf16 %v5198_v27, %v5196_v26 }
 0x3e3   : > { %6191 = vmatprep.subr.bf16.mxu1 %v6190_v32  ;;  %v9006_v32 = vld [vmem:[#allocation3 + $0x18] sm:$0xff] }
 0x3e4   : > { %v3598_v41 = vrot.slane %v9006_v32, 4  ;;  %v5264_v32 = vld [vmem:[%s9691_s7 + $0xe8] sm:$0xff] }
 0x3e6   : > { %6193 = vmatpush1.bf16.msra.mxu1 %v6192_v38  ;;  %v3526_v38 = vld [vmem:[#allocation3 + $0x8] sm:$0xf0] }
 0x3e7   : > { %6195 = vmatprep.subr.bf16.mxu1 %v6194_v39  ;;  %v5205_v39 = vld [vmem:[%s9689_s5 + $0x7c8] sm:$0xff]  ;;  %v3597_v43 = vrot.slane %v3526_v38, 4  ;;  %v5243_v38 = vld [vmem:[%s9689_s5 + $0x8f8] sm:$0xff] }
 0x3ea   : > { %6197 = vmatpush1.bf16.msra.mxu1 %v6196_v45  ;;  %v6230_v45 = vpack.c.bf16 %v5207_v40, %v5205_v39  ;;  %v6264_v39 = vpack.c.bf16 %v5238_v36, %v5236_v35  ;;  %v5300_v35 = vld [vmem:[%s9691_s7 + $0x1e8] sm:$0xff]  ;;  %v5274_v36 = vld [vmem:[%s9691_s7 + $0x138] sm:$0xff] }
 0x3eb   : > { %6199 = vmatprep.subr.bf16.mxu1 %v6198_v49  ;;  %v5204_v49 = vld [vmem:[%s9689_s5 + $0x7c0] sm:$0xff] }
 0x3ec   : > { %v6232_v54 = vpack.c.bf16 %v5206_v51, %v5204_v49  ;;  %v5247_v49 = vld [vmem:[%s9689_s5 + $0x918] sm:$0xff] }
 0x3ee   : > { %6201 = vmatpush1.bf16.msra.mxu1 %v6200_v56  ;;  %v5208_v56 = vld [vmem:[%s9689_s5 + $0x7e0] sm:$0xff] }
 0x3ef   : > { %6203 = vmatprep.subr.bf16.mxu1 %v6202_v58  ;;  %v5210_v58 = vld [vmem:[%s9689_s5 + $0x7f0] sm:$0xff] }
 0x3f0   : > { %v6236_v18 = vpack.c.bf16 %v5210_v58, %v5208_v56 }
 0x3f2   : > { %6205 = vmatpush1.bf16.msra.mxu1 %v6204_v59  ;;  %v5212_v59 = vld [vmem:[%s9689_s5 + $0x800] sm:$0xff] }
 0x3f3   : > { %6207 = vmatprep.subr.bf16.mxu1 %v6206_v63  ;;  %v5214_v63 = vld [vmem:[%s9689_s5 + $0x810] sm:$0xff] }
 0x3f4   : > { %v6240_v2 = vpack.c.bf16 %v5214_v63, %v5212_v59  ;;  %v6276_v59 = vpack.c.bf16 %v5250_v62, %v5248_v53 }
 0x3f6   : > { %6209 = vmatpush1.bf16.msra.mxu1 %v6208_v5  ;;  %v5216_v5 = vld [vmem:[%s9689_s5 + $0x820] sm:$0xff] }
 0x3f7   : > { %6211 = vmatprep.subr.bf16.mxu1 %v6210_v57  ;;  %v5218_v57 = vld [vmem:[%s9689_s5 + $0x830] sm:$0xff] }
 0x3f8   : > { %v6244_v7 = vpack.c.bf16 %v5218_v57, %v5216_v5  ;;  %v3525_v5 = vld [vmem:[#allocation3] sm:$0xf0]  ;;  %v5258_v57 = vld [vmem:[%s9691_s7 + $0xb8] sm:$0xff] }
 0x3fa   : > { %6213 = vmatpush1.bf16.msra.mxu1 %v6212_v10  ;;  %v5220_v10 = vld [vmem:[%s9689_s5 + $0x840] sm:$0xff] }
 0x3fb   : > { %6215 = vmatprep.subr.bf16.mxu1 %v6214_v47  ;;  %v5222_v47 = vld [vmem:[%s9689_s5 + $0x850] sm:$0xff] }
 0x3fc   : > { %v6248_v12 = vpack.c.bf16 %v5222_v47, %v5220_v10  ;;  %v5260_v10 = vld [vmem:[%s9691_s7 + $0xc8] sm:$0xff]  ;;  %v5261_v47 = vld [vmem:[%s9691_s7 + $0xd0] sm:$0xff] }
 0x3fd   : > { %v6286_v11 = vpack.c.bf16 %v5261_v47, %v5260_v10 }
 0x3fe   : > { %6217 = vmatpush1.bf16.msra.mxu1 %v6216_v14  ;;  %v5224_v14 = vld [vmem:[%s9689_s5 + $0x860] sm:$0xff] }
 0x3ff   : > { %6219 = vmatprep.subr.bf16.mxu1 %v6218_v15  ;;  %v5226_v15 = vld [vmem:[%s9689_s5 + $0x870] sm:$0xff] }
 0x400   : > { %v6252_v19 = vpack.c.bf16 %v5226_v15, %v5224_v14 }
 0x402   : > { %6221 = vmatpush1.bf16.msra.mxu1 %v6220_v21  ;;  %v5230_v21 = vld [vmem:[%s9689_s5 + $0x890] sm:$0xff] }
 0x403   : > { %6223 = vmatprep.subr.bf16.mxu1 %v6222_v24  ;;  %v5235_v24 = vld [vmem:[%s9689_s5 + $0x8b8] sm:$0xff]  ;;  %v6256_v26 = vpack.c.bf16 %v5230_v21, %v5228_v20  ;;  %v5269_v20 = vld [vmem:[%s9691_s7 + $0x110] sm:$0xff] }
 0x404   : > { %v6258_v27 = vpack.c.bf16 %v5235_v24, %v5233_v22  ;;  %v5270_v22 = vld [vmem:[%s9691_s7 + $0x118] sm:$0xff]  ;;  %v5271_v24 = vld [vmem:[%s9691_s7 + $0x120] sm:$0xff] }
 0x405   : > { %3509 = vmatmul.mubr.f32.vlgmr.msra.gmra.mrb[30].mxu1 %v3434_v61  ;;  %v5241_v61 = vld [vmem:[%s9689_s5 + $0x8e8] sm:$0xff] }
 0x406   : > { %5195 = vmatprep.mubr.msk.f32.mxu1 %vm2892_vm6, %v3436_v48  ;;  %6225 = vmatpush1.bf16.msra.mxu1 %v6224_v31  ;;  %v3599_v48 = vsel %vm1707_vm14, %v3597_v43, %v3598_v41  ;;  %v6266_v40 = vpack.c.bf16 %v5243_v38, %v5241_v61  ;;  %v5242_v43 = vld [vmem:[%s9689_s5 + $0x8f0] sm:$0xff]  ;;  %v5275_v61 = vld [vmem:[%s9691_s7 + $0x140] sm:$0xff] }
 0x407   : > { %6227 = vmatprep.subr.bf16.mxu1 %v6226_v33  ;;  %v6262_v33 = vpack.c.bf16 %v5239_v30, %v5237_v44  ;;  %v5272_v44 = vld [vmem:[%s9691_s7 + $0x128] sm:$0xff]  ;;  %v5273_v30 = vld [vmem:[%s9691_s7 + $0x130] sm:$0xff] }
 0x409   : > { %3515 = vmatmul.mubr.f32.gmra.mrb[32].mxu1 %v3433_v28  ;;  %v5232_v28 = vld [vmem:[%s9689_s5 + $0x8a0] sm:$0xff] }
 0x40a   : > { %6229 = vmatpush1.bf16.msra.mxu1 %v6228_v42  ;;  %5256 = vmatprep.mubr.msk.f32.mxu1 %vm2892_vm6, %v3599_v48  ;;  %v6260_v31 = vpack.c.bf16 %v5234_v29, %v5232_v28  ;;  %v5240_v42 = vld [vmem:[%s9689_s5 + $0x8e0] sm:$0xff]  ;;  %v5246_v48 = vld [vmem:[%s9689_s5 + $0x910] sm:$0xff]  ;;  %v5298_v28 = vld [vmem:[%s9691_s7 + $0x1d8] sm:$0xff] }
 0x40b   : > { %6231 = vmatprep.subr.bf16.mxu1 %v6230_v45  ;;  %v5245_v45 = vld [vmem:[%s9689_s5 + $0x908] sm:$0xff]  ;;  %v6268_v51 = vpack.c.bf16 %v5242_v43, %v5240_v42  ;;  %v6272_v56 = vpack.c.bf16 %v5246_v48, %v5244_v34  ;;  %v6307_v42 = vpack.c.bf16 %v5275_v61, %v5274_v36 }
 0x40c   : > { %v6270_v52 = vpack.c.bf16 %v5247_v49, %v5245_v45  ;;  %v5276_v45 = vld [vmem:[%s9691_s7 + $0x148] sm:$0xff]  ;;  %v5277_v49 = vld [vmem:[%s9691_s7 + $0x150] sm:$0xff] }
 0x40d   : > { %v6310_v34 = vpack.c.bf16 %v5277_v49, %v5276_v45  ;;  %v5337_v45 = vld [vmem:[%s9691_s7 + $0x2f0] sm:$0xff]  ;;  %v5338_v49 = vld [vmem:[%s9691_s7 + $0x2f8] sm:$0xff] }
 0x40e   : > { %6233 = vmatpush1.bf16.msra.mxu1 %v6232_v54  ;;  %v5249_v54 = vld [vmem:[%s9689_s5 + $0x928] sm:$0xff] }
 0x40f   : > { %6235 = vmatprep.subr.bf16.mxu1 %v6234_v55  ;;  %v5251_v55 = vld [vmem:[%s9689_s5 + $0x938] sm:$0xff] }
 0x410   : > { %v6274_v58 = vpack.c.bf16 %v5251_v55, %v5249_v54  ;;  %v5278_v54 = vld [vmem:[%s9691_s7 + $0x158] sm:$0xff]  ;;  %v5279_v55 = vld [vmem:[%s9691_s7 + $0x160] sm:$0xff] }
 0x411   : > { %v6313_v53 = vpack.c.bf16 %v5279_v55, %v5278_v54 }
 0x412   : > { %6237 = vmatpush1.bf16.msra.mxu1 %v6236_v18  ;;  %v5253_v18 = vld [vmem:[%s9689_s5 + $0x948] sm:$0xff] }
 0x413   : > { %6239 = vmatprep.subr.bf16.mxu1 %v6238_v46  ;;  %v5255_v46 = vld [vmem:[%s9689_s5 + $0x958] sm:$0xff] }
 0x414   : > { %v6278_v63 = vpack.c.bf16 %v5255_v46, %v5253_v18  ;;  %v5280_v18 = vld [vmem:[%s9691_s7 + $0x168] sm:$0xf]  ;;  %v5307_v46 = vld [vmem:[%s9691_s7 + $0x220] sm:$0xf] }
 0x416   : > { %6241 = vmatpush1.bf16.msra.mxu1 %v6240_v2  ;;  %v3527_v2 = vld [vmem:[#allocation3 + $0x10] sm:$0xff] }
 0x417   : > { %6243 = vmatprep.subr.bf16.mxu1 %v6242_v3  ;;  %v6280_v3 = vpack.c.bf16 %v5254_v1, %v5252_v0  ;;  %v3595_v60 = vrot.slane %v3527_v2, 4 }
 0x41a   : > { %6245 = vmatpush1.bf16.msra.mxu1 %v6244_v7  ;;  %v3594_v7 = vrot.slane %v3525_v5, 4 }
 0x41b   : > { %6247 = vmatprep.subr.bf16.mxu1 %v6246_v8  ;;  %v6283_v8 = vpack.c.bf16 %v5259_v6, %v5258_v57 }
 0x41c   : > { %v3596_v37 = vsel %vm1707_vm14, %v3594_v7, %v3595_v60 }
 0x41e   : > { %6249 = vmatpush1.bf16.msra.mxu1 %v6248_v12  ;;  %v5262_v12 = vld [vmem:[%s9691_s7 + $0xd8] sm:$0xff] }
 0x41f   : > { %6251 = vmatprep.subr.bf16.mxu1 %v6250_v13  ;;  %v5263_v13 = vld [vmem:[%s9691_s7 + $0xe0] sm:$0xff] }
 0x420   : > { %v6289_v14 = vpack.c.bf16 %v5263_v13, %v5262_v12 }
 0x422   : > { %6253 = vmatpush1.bf16.msra.mxu1 %v6252_v19  ;;  %v6295_v19 = vpack.c.bf16 %v5267_v17, %v5266_v16 }
 0x423   : > { %6255 = vmatprep.subr.bf16.mxu1 %v6254_v50  ;;  %v5268_v50 = vld [vmem:[%s9691_s7 + $0x108] sm:$0xff] }
 0x424   : > { %v6298_v21 = vpack.c.bf16 %v5269_v20, %v5268_v50 }
 0x426   : > { %6257 = vmatpush1.bf16.msra.mxu1 %v6256_v26  ;;  %v5297_v26 = vld [vmem:[%s9691_s7 + $0x1d0] sm:$0xff] }
 0x427   : > { %6259 = vmatprep.subr.bf16.mxu1 %v6258_v27  ;;  %v6301_v27 = vpack.c.bf16 %v5271_v24, %v5270_v22  ;;  %v6367_v29 = vpack.c.bf16 %v5298_v28, %v5297_v26 }
 0x429   : > { %6368 = vmatpush1.bf16.msra.mxu0 %v6367_v29 }
 0x42a   : > { %6261 = vmatpush1.bf16.msra.mxu1 %v6260_v31  ;;  %v5299_v31 = vld [vmem:[%s9691_s7 + $0x1e0] sm:$0xff]  ;;  %6369 = vmatprep.subr.bf16.mxu0 %v6581_v4 }
 0x42b   : > { %6263 = vmatprep.subr.bf16.mxu1 %v6262_v33  ;;  %v6304_v33 = vpack.c.bf16 %v5273_v30, %v5272_v44  ;;  %v6370_v38 = vpack.c.bf16 %v5300_v35, %v5299_v31 }
 0x42d   : > { %6371 = vmatpush1.bf16.msra.mxu0 %v6370_v38 }
 0x42e   : > { %6265 = vmatpush1.bf16.msra.mxu1 %v6264_v39  ;;  %v5301_v39 = vld [vmem:[%s9691_s7 + $0x1f0] sm:$0xff]  ;;  %6372 = vmatprep.subr.bf16.mxu0 %v6581_v4 }
 0x42f   : > { %6267 = vmatprep.subr.bf16.mxu1 %v6266_v40  ;;  %v5302_v40 = vld [vmem:[%s9691_s7 + $0x1f8] sm:$0xff] }
 0x430   : > { %v6373_v43 = vpack.c.bf16 %v5302_v40, %v5301_v39  ;;  %v3725_v39 = vld [vmem:[%s9691_s7 + $0x10] sm:$0xff] }
 0x432   : > { %6269 = vmatpush1.bf16.msra.mxu1 %v6268_v51  ;;  %v5303_v51 = vld [vmem:[%s9691_s7 + $0x200] sm:$0xff]  ;;  %6374 = vmatpush1.bf16.msra.mxu0 %v6373_v43  ;;  %v3726_v43 = vld [vmem:[%s9691_s7 + $0x18] sm:$0xff] }
 0x433   : > { %6271 = vmatprep.subr.bf16.mxu1 %v6270_v52  ;;  %v5304_v52 = vld [vmem:[%s9691_s7 + $0x208] sm:$0xff]  ;;  %6375 = vmatprep.subr.bf16.mxu0 %v6581_v4  ;;  %v6319_v55 = vpack.c.bf16 %v3726_v43, %v3725_v39  ;;  %v3743_v39 = vld [vmem:[%s9691_s7 + $0xa0] sm:$0xff] }
 0x434   : > { %v6376_v48 = vpack.c.bf16 %v5304_v52, %v5303_v51  ;;  %v5356_v43 = vld [vmem:[%s9691_s7 + $0x388] sm:$0xff] }
 0x436   : > { %6273 = vmatpush1.bf16.msra.mxu1 %v6272_v56  ;;  %v5305_v56 = vld [vmem:[%s9691_s7 + $0x210] sm:$0xff]  ;;  %6377 = vmatpush1.bf16.msra.mxu0 %v6376_v48 }
 0x437   : > { %6275 = vmatprep.subr.bf16.mxu1 %v6274_v58  ;;  %v5306_v58 = vld [vmem:[%s9691_s7 + $0x218] sm:$0xff]  ;;  %6378 = vmatprep.subr.bf16.mxu0 %v6581_v4 }
 0x438   : > { %v6379_v62 = vpack.c.bf16 %v5306_v58, %v5305_v56  ;;  %v6418_v56 = vpack.c.bf16 %v5338_v49, %v5337_v45  ;;  %v3727_v58 = vld [vmem:[%s9691_s7 + $0x20] sm:$0xff] }
 0x43a   : > { %6277 = vmatpush1.bf16.msra.mxu1 %v6276_v59  ;;  %6380 = vmatpush1.bf16.msra.mxu0 %v6379_v62  ;;  %v3687_v59 = vld [vmem:[%s9690_s6] sm:$0x3] }
 0x43b   : > { %6279 = vmatprep.subr.bf16.mxu1 %v6278_v63  ;;  %4024 = vmatprep.subr.mxu0 %v6583_v9  ;;  %v3692_v63 = vrot.slane %v3687_v59, %v7117_v23  ;;  %v3696_v0 = vrot.slane %v3687_v59, %v7122_v25  ;;  %v5339_v62 = vld [vmem:[%s9691_s7 + $0x300] sm:$0xff] }
 0x43e   : > { %6281 = vmatpush1.bf16.msra.mxu1 %v6280_v3  ;;  %5308 = vmatpush1.msk.msra.mxu0 %vm1707_vm14, %v5307_v46 }
 0x43f   : > { %6282 = vmatprep.subr.bf16.mxu1 %v6581_v4  ;;  %6414 = vmatprep.subr.bf16.mxu0 %v6581_v4 }
 0x441   : > { %3671 = vmatmul.mubr.f32.vlgmr.msra.gmra.mrb[30].mxu1 %v3596_v37 }
 0x442   : > { %5257 = vmatprep.mubr.msk.f32.mxu1 %vm2892_vm6, %v3598_v41  ;;  %6284 = vmatpush1.bf16.msra.mxu1 %v6283_v8  ;;  %v5265_v41 = vld [vmem:[%s9691_s7 + $0xf0] sm:$0xff] }
 0x443   : > { %6285 = vmatprep.subr.bf16.mxu1 %v6581_v4  ;;  %v6292_v15 = vpack.c.bf16 %v5265_v41, %v5264_v32  ;;  %v3723_v32 = vld [vmem:[%s9691_s7] sm:$0xff]  ;;  %v3724_v41 = vld [vmem:[%s9691_s7 + $0x8] sm:$0xff] }
 0x444   : > { %v6316_v30 = vpack.c.bf16 %v3724_v41, %v3723_v32  ;;  %v3736_v32 = vld [vmem:[%s9691_s7 + $0x68] sm:$0xff]  ;;  %v5347_v41 = vld [vmem:[%s9691_s7 + $0x340] sm:$0xff] }
 0x445   : > { %3677 = vmatmul.mubr.f32.gmra.mrb[32].mxu1 %v3595_v60 }
 0x446   : > { %6287 = vmatpush1.bf16.msra.mxu1 %v6286_v11 }
 0x447   : > { %6288 = vmatprep.subr.bf16.mxu1 %v6581_v4 }
 0x44a   : > { %6290 = vmatpush1.bf16.msra.mxu1 %v6289_v14 }
 0x44b   : > { %6291 = vmatprep.subr.bf16.mxu1 %v6581_v4 }
 0x44e   : > { %6293 = vmatpush1.bf16.msra.mxu1 %v6292_v15  ;;  %v5335_v15 = vld [vmem:[%s9691_s7 + $0x2e0] sm:$0xff] }
 0x44f   : > { %6294 = vmatprep.subr.bf16.mxu1 %v6581_v4 }
 0x452   : > { %6296 = vmatpush1.bf16.msra.mxu1 %v6295_v19  ;;  %v5336_v19 = vld [vmem:[%s9691_s7 + $0x2e8] sm:$0xff] }
 0x453   : > { %6297 = vmatprep.subr.bf16.mxu1 %v6581_v4  ;;  %v6415_v61 = vpack.c.bf16 %v5336_v19, %v5335_v15  ;;  %v5348_v15 = vld [vmem:[%s9691_s7 + $0x348] sm:$0xff]  ;;  %v3737_v19 = vld [vmem:[%s9691_s7 + $0x70] sm:$0xff] }
 0x456   : > { %6299 = vmatpush1.bf16.msra.mxu1 %v6298_v21 }
 0x457   : > { %6300 = vmatprep.subr.bf16.mxu1 %v6581_v4 }
 0x45a   : > { %6302 = vmatpush1.bf16.msra.mxu1 %v6301_v27 }
 0x45b   : > { %6303 = vmatprep.subr.bf16.mxu1 %v6581_v4 }
 0x45e   : > { %6305 = vmatpush1.bf16.msra.mxu1 %v6304_v33 }
 0x45f   : > { %6306 = vmatprep.subr.bf16.mxu1 %v6581_v4 }
 0x462   : > { %6308 = vmatpush1.bf16.msra.mxu1 %v6307_v42 }
 0x463   : > { %6309 = vmatprep.subr.bf16.mxu1 %v6581_v4 }
 0x466   : > { %6311 = vmatpush1.bf16.msra.mxu1 %v6310_v34 }
 0x467   : > { %6312 = vmatprep.subr.bf16.mxu1 %v6581_v4 }
 0x46a   : > { %6314 = vmatpush1.bf16.msra.mxu1 %v6313_v53  ;;  %v3728_v53 = vld [vmem:[%s9691_s7 + $0x28] sm:$0xff] }
 0x46b   : > { %3834 = vmatprep.subr.mxu1 %v6583_v9  ;;  %v6322_v46 = vpack.c.bf16 %v3728_v53, %v3727_v58 }
 0x46e   : > { %5281 = vmatpush1.msk.msra.mxu1 %vm1707_vm14, %v5280_v18  ;;  %v5340_v18 = vld [vmem:[%s9691_s7 + $0x308] sm:$0xff] }
 0x46f   : > { %6315 = vmatprep.subr.bf16.mxu1 %v6581_v4  ;;  %v6421_v59 = vpack.c.bf16 %v5340_v18, %v5339_v62 }
 0x514   : > { %v3672_v1 = vpop.f32.mrb[30].mxu1 }
 0x515   : > { %v3699_v2 = vadd.f32 %v3692_v63, %v3672_v1  ;;  %v3674_v3 = vpop.f32.mrb[31].mxu1  ;;  %v5341_v1 = vld [vmem:[%s9691_s7 + $0x310] sm:$0xff] }
 0x516   : > { %v3700_v5 = vadd.f32 %v3696_v0, %v3674_v3 }
 0x517   : > { %vm3703_vm9 = vcmp.gt.f32.partialorder %v3699_v2, 0.0  ;;  %v3707_v57 = vmul.f32 0.3, %v3699_v2 }
 0x518   : > { %vm3704_vm11 = vcmp.gt.f32.partialorder %v3700_v5, 0.0  ;;  %v3708_v6 = vmul.f32 0.3, %v3700_v5  ;;  %v3678_v60 = vpop.f32.mrb[32].mxu1 }
 0x519   : > { %v9311_v7 = vsel %vm3703_vm9, %v3699_v2, %v3707_v57  ;;  %v3701_v8 = vadd.f32 %v3692_v63, %v3678_v60  ;;  %v3680_v10 = vpop.f32.mrb[33].mxu1  ;;  %v3729_v63 = vld [vmem:[%s9691_s7 + $0x30] sm:$0xff]  ;;  %v5342_v2 = vld [vmem:[%s9691_s7 + $0x318] sm:$0xff]  ;;  %v3731_v57 = vld [vmem:[%s9691_s7 + $0x40] sm:$0xff] }
 0x51a   : > { %3715 = vst [vmem:[#allocation4] sm:$0xff] %v9311_v7  ;;  %v3712_v47 = vsel %vm3704_vm11, %v3700_v5, %v3708_v6  ;;  %v3702_v23 = vadd.f32 %v3696_v0, %v3680_v10  ;;  %v3730_v0 = vld [vmem:[%s9691_s7 + $0x38] sm:$0xff]  ;;  %v6424_v5 = vpack.c.bf16 %v5342_v2, %v5341_v1  ;;  %v3732_v6 = vld [vmem:[%s9691_s7 + $0x48] sm:$0xff]  ;;  %v5343_v60 = vld [vmem:[%s9691_s7 + $0x320] sm:$0xff] }
 0x51b   : > { %3717 = vst.msk [vmem:[#allocation4 + $0x8] sm:$0xff] %vm3716_vm12, %v3712_v47  ;;  %vm3705_vm13 = vcmp.gt.f32.partialorder %v3701_v8, 0.0  ;;  %v3709_v25 = vmul.f32 0.3, %v3701_v8  ;;  %v6325_v3 = vpack.c.bf16 %v3730_v0, %v3729_v63  ;;  %v6328_v10 = vpack.c.bf16 %v3732_v6, %v3731_v57  ;;  %v5313_v63 = vld [vmem:[%s9691_s7 + $0x240] sm:$0xff]  ;;  %v5316_v6 = vld [vmem:[%s9691_s7 + $0x258] sm:$0xff] }
 0x51c   : > { %vm3706_vm1 = vcmp.gt.f32.partialorder %v3702_v23, 0.0  ;;  %v3710_v37 = vmul.f32 0.3, %v3702_v23 }
 0x51d   : > { %v3713_v11 = vsel %vm3705_vm13, %v3701_v8, %v3709_v25  ;;  %v5344_v8 = vld [vmem:[%s9691_s7 + $0x328] sm:$0xff]  ;;  %v3734_v25 = vld [vmem:[%s9691_s7 + $0x58] sm:$0xff] }
 0x51e   : > { %3718 = vst [vmem:[#allocation4 + $0x10] sm:$0xf] %v3713_v11  ;;  %v3714_v12 = vsel %vm3706_vm1, %v3702_v23, %v3710_v37  ;;  %v6427_v47 = vpack.c.bf16 %v5344_v8, %v5343_v60  ;;  %v3733_v23 = vld [vmem:[%s9691_s7 + $0x50] sm:$0xff]  ;;  %v5346_v11 = vld [vmem:[%s9691_s7 + $0x338] sm:$0xff]  ;;  %v5317_v60 = vld [vmem:[%s9691_s7 + $0x260] sm:$0xff] }
 0x51f   : > { %3720 = vst.msk [vmem:[#allocation4 + $0x18] sm:$0xf] %vm3719_vm3, %v3714_v12  ;;  %v5345_v37 = vld [vmem:[%s9691_s7 + $0x330] sm:$0xff]  ;;  %v6331_v12 = vpack.c.bf16 %v3734_v25, %v3733_v23  ;;  %v6391_v8 = vpack.c.bf16 %v5317_v60, %v5316_v6  ;;  %v5320_v25 = vld [vmem:[%s9691_s7 + $0x278] sm:$0xff] }
 0x521   : > { %v3746_v16 = vld [vmem:[#allocation4] sm:$0xfe] }
 0x522   : > { %v3747_v13 = vld [vmem:[#allocation4 + $0x8] sm:$0xfe]  ;;  %v3936_v17 = vld [vmem:[#allocation4] sm:$0xfc]  ;;  %v3778_v35 = vrot.slane %v3746_v16, 1 }
 0x523   : > { %v3937_v14 = vld [vmem:[#allocation4 + $0x8] sm:$0xfc]  ;;  %v3781_v50 = vrot.slane %v3747_v13, 1  ;;  %v3968_v36 = vrot.slane %v3936_v17, 2  ;;  %v6430_v13 = vpack.c.bf16 %v5346_v11, %v5345_v37  ;;  %v6433_v17 = vpack.c.bf16 %v5348_v15, %v5347_v41  ;;  %v5321_v37 = vld [vmem:[%s9691_s7 + $0x280] sm:$0xff] }
 0x524   : > { %v3971_v20 = vrot.slane %v3937_v14, 2  ;;  %v4167_v31 = vld [vmem:[#allocation4 + $0x8] sm:$0xf0]  ;;  %v3735_v14 = vld [vmem:[%s9691_s7 + $0x60] sm:$0xff]  ;;  %v6397_v11 = vpack.c.bf16 %v5321_v37, %v5320_v25 }
 0x525   : > { %v3748_v21 = vld [vmem:[#allocation4 + $0x10] sm:$0x1]  ;;  %v4201_v34 = vrot.slane %v4167_v31, 4  ;;  %v3722_v48 = vld [vmem:[#allocation4 + $0x8] sm:$0xff]  ;;  %v6334_v16 = vpack.c.bf16 %v3736_v32, %v3735_v14  ;;  %v5325_v41 = vld [vmem:[%s9691_s7 + $0x2a0] sm:$0xff] }
 0x526   : > { %v3938_v22 = vld [vmem:[#allocation4 + $0x10] sm:$0x3]  ;;  %v3749_v24 = vld [vmem:[#allocation4 + $0x18] sm:$0x1]  ;;  %v3779_v27 = vrot.slane %v3748_v21, 1  ;;  %v3741_v31 = vld [vmem:[%s9691_s7 + $0x90] sm:$0xff] }
 0x527   : > { %v3939_v26 = vld [vmem:[#allocation4 + $0x18] sm:$0x3]  ;;  %v3969_v28 = vrot.slane %v3938_v22, 2  ;;  %v3782_v29 = vrot.slane %v3749_v24, 1  ;;  %v5350_v21 = vld [vmem:[%s9691_s7 + $0x358] sm:$0xff] }
 0x528   : > { %v3972_v44 = vrot.slane %v3939_v26, 2  ;;  %v4169_v33 = vld [vmem:[#allocation4 + $0x18] sm:$0xf]  ;;  %v3780_v51 = vsel %vm1683_vm10, %v3778_v35, %v3779_v27  ;;  %v3740_v27 = vld [vmem:[%s9691_s7 + $0x88] sm:$0xff]  ;;  %v5353_v35 = vld [vmem:[%s9691_s7 + $0x370] sm:$0xff] }
 0x529   : > { %v4202_v38 = vrot.slane %v4169_v33, 4  ;;  %v3783_v40 = vsel %vm1683_vm10, %v3781_v50, %v3782_v29  ;;  %v3970_v52 = vsel %vm2122_vm2, %v3968_v36, %v3969_v28  ;;  %v3738_v50 = vld [vmem:[%s9691_s7 + $0x78] sm:$0xff]  ;;  %v3739_v26 = vld [vmem:[%s9691_s7 + $0x80] sm:$0xff]  ;;  %v5352_v29 = vld [vmem:[%s9691_s7 + $0x368] sm:$0xff] }
 0x52a   : > { %v3973_v42 = vsel %vm2122_vm2, %v3971_v20, %v3972_v44  ;;  %5282 = vmatprep.mubr.msk.f32.mxu1 %vm3716_vm12, %v3783_v40  ;;  %v5349_v20 = vld [vmem:[%s9691_s7 + $0x350] sm:$0xff]  ;;  %v6337_v22 = vpack.c.bf16 %v3738_v50, %v3737_v19  ;;  %v5351_v28 = vld [vmem:[%s9691_s7 + $0x360] sm:$0xff]  ;;  %v6340_v44 = vpack.c.bf16 %v3740_v27, %v3739_v26  ;;  %v3742_v33 = vld [vmem:[%s9691_s7 + $0x98] sm:$0xff] }
 0x52b   : > { %5309 = vmatprep.mubr.msk.f32.mxu0 %vm3716_vm12, %v3973_v42  ;;  %3855 = vmatmul.mubr.f32.vlgmr.msra.gmra.mrb[34].mxu1 %v3780_v51  ;;  %v4203_v54 = vsel %vm1707_vm14, %v4201_v34, %v4202_v38  ;;  %v6436_v24 = vpack.c.bf16 %v5350_v21, %v5349_v20  ;;  %v5354_v36 = vld [vmem:[%s9691_s7 + $0x378] sm:$0xff]  ;;  %v3744_v40 = vld [vmem:[%s9691_s7 + $0xa8] sm:$0xff]  ;;  %v5355_v42 = vld [vmem:[%s9691_s7 + $0x380] sm:$0xff] }
 0x52c   : > { %4045 = vmatmul.mubr.f32.vlgmr.msra.gmra.mrb[10].mxu0 %v3970_v52  ;;  %6317 = vmatpush1.bf16.msra.mxu1 %v6316_v30  ;;  %v6439_v30 = vpack.c.bf16 %v5352_v29, %v5351_v28  ;;  %v6442_v38 = vpack.c.bf16 %v5354_v36, %v5353_v35  ;;  %v6346_v45 = vpack.c.bf16 %v3744_v40, %v3743_v39  ;;  %v4168_v51 = vld [vmem:[#allocation4 + $0x10] sm:$0xf]  ;;  %v5310_v52 = vld [vmem:[%s9691_s7 + $0x228] sm:$0xff]  ;;  %v5311_v34 = vld [vmem:[%s9691_s7 + $0x230] sm:$0xff] }
 0x52d   : > { %6416 = vmatpush1.bf16.msra.mxu0 %v6415_v61  ;;  %5284 = vmatprep.mubr.msk.f32.mxu1 %vm3716_vm12, %v3722_v48  ;;  %v6343_v61 = vpack.c.bf16 %v3742_v33, %v3741_v31  ;;  %v6445_v49 = vpack.c.bf16 %v5356_v43, %v5355_v42  ;;  %v4054_v48 = vld [vmem:[#allocation4 + $0x18] sm:$0x7]  ;;  %v4199_v58 = vrot.slane %v4168_v51, 4  ;;  %v4052_v53 = vld [vmem:[#allocation4 + $0x8] sm:$0xf8]  ;;  %v6382_v62 = vpack.c.bf16 %v5311_v34, %v5310_v52  ;;  %v5324_v32 = vld [vmem:[%s9691_s7 + $0x298] sm:$0xff] }
 0x52e   : > { %5359 = vmatprep.mubr.msk.f32.mxu0 %vm3716_vm12, %v4203_v54  ;;  %6318 = vmatprep.subr.bf16.mxu1 %v6581_v4  ;;  %v3745_v54 = vld [vmem:[%s9691_s7 + $0xb0] sm:$0xf]  ;;  %v4087_v18 = vrot.slane %v4054_v48, 3  ;;  %v4086_v0 = vrot.slane %v4052_v53, 3  ;;  %v6403_v15 = vpack.c.bf16 %v5325_v41, %v5324_v32  ;;  %v5328_v50 = vld [vmem:[%s9691_s7 + $0x2b8] sm:$0xff]  ;;  %v5329_v20 = vld [vmem:[%s9691_s7 + $0x2c0] sm:$0xff] }
 0x52f   : > { %6417 = vmatprep.subr.bf16.mxu0 %v6581_v4  ;;  %v6409_v21 = vpack.c.bf16 %v5329_v20, %v5328_v50  ;;  %v4053_v27 = vld [vmem:[#allocation4 + $0x10] sm:$0x7]  ;;  %v4051_v28 = vld [vmem:[#allocation4] sm:$0xf8]  ;;  %v4302_v33 = vld [vmem:[%s9693_s9] sm:$0xff] }
 0x530   : > { %6320 = vmatpush1.bf16.msra.mxu1 %v6319_v55  ;;  %v4166_v55 = vld [vmem:[#allocation4] sm:$0xf0]  ;;  %v4088_v2 = vsel %vm2399_vm4, %v4086_v0, %v4087_v18  ;;  %v4084_v29 = vrot.slane %v4053_v27, 3  ;;  %v4304_v36 = vld [vmem:[%s9693_s9 + $0x10] sm:$0xff]  ;;  %v4306_v40 = vld [vmem:[%s9693_s9 + $0x20] sm:$0xff] }
 0x531   : > { %6419 = vmatpush1.bf16.msra.mxu0 %v6418_v56  ;;  %6321 = vmatprep.subr.bf16.mxu1 %v6581_v4  ;;  %v5357_v56 = vld [vmem:[%s9691_s7 + $0x390] sm:$0xf]  ;;  %v4303_v35 = vld [vmem:[%s9693_s9 + $0x8] sm:$0xff]  ;;  %v4310_v52 = vld [vmem:[%s9693_s9 + $0x40] sm:$0xff] }
 0x532   : > { %6420 = vmatprep.subr.bf16.mxu0 %v6581_v4  ;;  %v4307_v42 = vld [vmem:[%s9693_s9 + $0x28] sm:$0xff]  ;;  %v4316_v18 = vld [vmem:[%s9693_s9 + $0x70] sm:$0xff] }
 0x533   : > { %v6454_v43 = vpack.c.bf16 %v4307_v42, %v4306_v40  ;;  %v4311_v34 = vld [vmem:[%s9693_s9 + $0x48] sm:$0xff]  ;;  %v4396_v20 = vld [vmem:[%s9695_s11 + $0x10] sm:$0xff] }
 0x534   : > { %6323 = vmatpush1.bf16.msra.mxu1 %v6322_v46  ;;  %v4198_v46 = vrot.slane %v4166_v55, 4  ;;  %v6460_v48 = vpack.c.bf16 %v4311_v34, %v4310_v52  ;;  %v4313_v55 = vld [vmem:[%s9693_s9 + $0x58] sm:$0xff]  ;;  %v4315_v53 = vld [vmem:[%s9693_s9 + $0x68] sm:$0xff] }
 0x535   : > { %6422 = vmatpush1.bf16.msra.mxu0 %v6421_v59  ;;  %6324 = vmatprep.subr.bf16.mxu1 %v6581_v4  ;;  %v5312_v59 = vld [vmem:[%s9691_s7 + $0x238] sm:$0xff] }
 0x536   : > { %6423 = vmatprep.subr.bf16.mxu0 %v6581_v4  ;;  %v4200_v1 = vsel %vm1707_vm14, %v4198_v46, %v4199_v58  ;;  %v4314_v58 = vld [vmem:[%s9693_s9 + $0x60] sm:$0xff] }
 0x538   : > { %6326 = vmatpush1.bf16.msra.mxu1 %v6325_v3  ;;  %v6385_v3 = vpack.c.bf16 %v5313_v63, %v5312_v59 }
 0x539   : > { %6425 = vmatpush1.bf16.msra.mxu0 %v6424_v5  ;;  %6327 = vmatprep.subr.bf16.mxu1 %v6581_v4  ;;  %v5314_v5 = vld [vmem:[%s9691_s7 + $0x248] sm:$0xff] }
 0x53a   : > { %6426 = vmatprep.subr.bf16.mxu0 %v6581_v4 }
 0x53c   : > { %6329 = vmatpush1.bf16.msra.mxu1 %v6328_v10  ;;  %v5318_v10 = vld [vmem:[%s9691_s7 + $0x268] sm:$0xff] }
 0x53d   : > { %6428 = vmatpush1.bf16.msra.mxu0 %v6427_v47  ;;  %6330 = vmatprep.subr.bf16.mxu1 %v6581_v4  ;;  %v5319_v47 = vld [vmem:[%s9691_s7 + $0x270] sm:$0xff] }
 0x53e   : > { %6429 = vmatprep.subr.bf16.mxu0 %v6581_v4  ;;  %v6394_v23 = vpack.c.bf16 %v5319_v47, %v5318_v10  ;;  %v5360_v10 = vld [vmem:[%s9692_s8] ss:$0 sm:$0xff] }
 0x540   : > { %6332 = vmatpush1.bf16.msra.mxu1 %v6331_v12  ;;  %v5322_v12 = vld [vmem:[%s9691_s7 + $0x288] sm:$0xff] }
 0x541   : > { %6431 = vmatpush1.bf16.msra.mxu0 %v6430_v13  ;;  %6333 = vmatprep.subr.bf16.mxu1 %v6581_v4  ;;  %v5323_v13 = vld [vmem:[%s9691_s7 + $0x290] sm:$0xff] }
 0x542   : > { %6432 = vmatprep.subr.bf16.mxu0 %v6581_v4  ;;  %v6400_v14 = vpack.c.bf16 %v5323_v13, %v5322_v12 }
 0x544   : > { %6335 = vmatpush1.bf16.msra.mxu1 %v6334_v16  ;;  %v5326_v16 = vld [vmem:[%s9691_s7 + $0x2a8] sm:$0xff] }
 0x545   : > { %6434 = vmatpush1.bf16.msra.mxu0 %v6433_v17  ;;  %6336 = vmatprep.subr.bf16.mxu1 %v6581_v4  ;;  %v5327_v17 = vld [vmem:[%s9691_s7 + $0x2b0] sm:$0xff] }
 0x546   : > { %6435 = vmatprep.subr.bf16.mxu0 %v6581_v4  ;;  %v6406_v19 = vpack.c.bf16 %v5327_v17, %v5326_v16  ;;  %v4395_v16 = vld [vmem:[%s9695_s11 + $0x8] sm:$0xff] }
 0x548   : > { %6338 = vmatpush1.bf16.msra.mxu1 %v6337_v22  ;;  %v5330_v22 = vld [vmem:[%s9691_s7 + $0x2c8] sm:$0xff] }
 0x549   : > { %6437 = vmatpush1.bf16.msra.mxu0 %v6436_v24  ;;  %6339 = vmatprep.subr.bf16.mxu1 %v6581_v4  ;;  %v5331_v24 = vld [vmem:[%s9691_s7 + $0x2d0] sm:$0xff] }
 0x54a   : > { %6438 = vmatprep.subr.bf16.mxu0 %v6581_v4  ;;  %v6412_v26 = vpack.c.bf16 %v5331_v24, %v5330_v22  ;;  %v4398_v24 = vld [vmem:[%s9695_s11 + $0x20] sm:$0xff] }
 0x54c   : > { %6341 = vmatpush1.bf16.msra.mxu1 %v6340_v44  ;;  %v5332_v44 = vld [vmem:[%s9691_s7 + $0x2d8] sm:$0xf] }
 0x54d   : > { %6440 = vmatpush1.bf16.msra.mxu0 %v6439_v30  ;;  %6342 = vmatprep.subr.bf16.mxu1 %v6581_v4  ;;  %v4083_v30 = vrot.slane %v4051_v28, 3  ;;  %v4400_v28 = vld [vmem:[%s9695_s11 + $0x30] sm:$0x3] }
 0x54e   : > { %6441 = vmatprep.subr.bf16.mxu0 %v6581_v4 }
 0x54f   : > { %v4085_v31 = vsel %vm2399_vm4, %v4083_v30, %v4084_v29  ;;  %vm4402_vm4 = vcmask 408576  }
 0x550   : > { %6344 = vmatpush1.bf16.msra.mxu1 %v6343_v61  ;;  %v6448_v61 = vpack.c.bf16 %v4303_v35, %v4302_v33  ;;  %v4484_v35 = vld [vmem:[%s9697_s13 + $0x8] sm:$0x3] }
 0x551   : > { %6443 = vmatpush1.bf16.msra.mxu0 %v6442_v38  ;;  %6345 = vmatprep.subr.bf16.mxu1 %v6581_v4  ;;  %v4305_v38 = vld [vmem:[%s9693_s9 + $0x18] sm:$0xff] }
 0x552   : > { %6444 = vmatprep.subr.bf16.mxu0 %v6581_v4  ;;  %v6451_v39 = vpack.c.bf16 %v4305_v38, %v4304_v36 }
 0x554   : > { %6347 = vmatpush1.bf16.msra.mxu1 %v6346_v45  ;;  %v4308_v45 = vld [vmem:[%s9693_s9 + $0x30] sm:$0xff] }
 0x555   : > { %6446 = vmatpush1.bf16.msra.mxu0 %v6445_v49  ;;  %3910 = vmatprep.subr.mxu1 %v6583_v9  ;;  %v4309_v49 = vld [vmem:[%s9693_s9 + $0x38] sm:$0xff] }
 0x556   : > { %4254 = vmatprep.subr.mxu0 %v6583_v9  ;;  %v6457_v51 = vpack.c.bf16 %v4309_v49, %v4308_v45  ;;  %v4485_v45 = vld [vmem:[#allocation6] sm:$0x1] }
 0x558   : > { %5283 = vmatpush1.msk.msra.mxu1 %vm1707_vm14, %v3745_v54  ;;  %v4312_v54 = vld [vmem:[%s9693_s9 + $0x50] sm:$0xff] }
 0x559   : > { %5358 = vmatpush1.msk.msra.mxu0 %vm1707_vm14, %v5357_v56  ;;  %3931 = vmatmul.mubr.f32.vlgmr.msra.gmra.mrb[36].mxu1 %v9311_v7  ;;  %v5315_v7 = vld [vmem:[%s9691_s7 + $0x250] sm:$0xff]  ;;  %v6463_v56 = vpack.c.bf16 %v4313_v55, %v4312_v54 }
 0x55a   : > { %6381 = vmatprep.subr.bf16.mxu1 %v6581_v4  ;;  %4275 = vmatmul.mubr.f32.vlgmr.msra.gmra.mrb[12].mxu0 %v4200_v1  ;;  %v6388_v57 = vpack.c.bf16 %v5315_v7, %v5314_v5 }
 0x55b   : > { %6383 = vmatpush1.bf16.msra.mxu1 %v6382_v62  ;;  %5334 = vmatprep.mubr.msk.f32.mxu1 %vm3716_vm12, %v4088_v2  ;;  %v6466_v62 = vpack.c.bf16 %v4315_v53, %v4314_v58 }
 0x55c   : > { %6384 = vmatprep.subr.bf16.mxu1 %v6581_v4  ;;  %6477 = vmatprep.subr.bf16.mxu0 %v6581_v4 }
 0x55d   : > { %5554 = vmatprep.mubr.msk.f32.mxu0 %vm6582_vm0, %v6583_v9 }
 0x55f   : > { %6386 = vmatpush1.bf16.msra.mxu1 %v6385_v3 }
 0x560   : > { %6387 = vmatprep.subr.bf16.mxu1 %v6581_v4 }
 0x563   : > { %6389 = vmatpush1.bf16.msra.mxu1 %v6388_v57 }
 0x564   : > { %6390 = vmatprep.subr.bf16.mxu1 %v6581_v4 }
 0x567   : > { %6392 = vmatpush1.bf16.msra.mxu1 %v6391_v8 }
 0x568   : > { %6393 = vmatprep.subr.bf16.mxu1 %v6581_v4 }
 0x56b   : > { %6395 = vmatpush1.bf16.msra.mxu1 %v6394_v23 }
 0x56c   : > { %6396 = vmatprep.subr.bf16.mxu1 %v6581_v4 }
 0x56f   : > { %6398 = vmatpush1.bf16.msra.mxu1 %v6397_v11 }
 0x570   : > { %6399 = vmatprep.subr.bf16.mxu1 %v6581_v4 }
 0x573   : > { %6401 = vmatpush1.bf16.msra.mxu1 %v6400_v14 }
 0x574   : > { %6402 = vmatprep.subr.bf16.mxu1 %v6581_v4 }
 0x577   : > { %6404 = vmatpush1.bf16.msra.mxu1 %v6403_v15  ;;  %v4394_v15 = vld [vmem:[%s9695_s11] sm:$0xff] }
 0x578   : > { %6405 = vmatprep.subr.bf16.mxu1 %v6581_v4 }
 0x57b   : > { %6407 = vmatpush1.bf16.msra.mxu1 %v6406_v19  ;;  %v6469_v19 = vpack.c.bf16 %v4395_v16, %v4394_v15 }
 0x57c   : > { %6408 = vmatprep.subr.bf16.mxu1 %v6581_v4 }
 0x57f   : > { %6410 = vmatpush1.bf16.msra.mxu1 %v6409_v21  ;;  %v4397_v21 = vld [vmem:[%s9695_s11 + $0x18] sm:$0xff] }
 0x580   : > { %6411 = vmatprep.subr.bf16.mxu1 %v6581_v4  ;;  %v6472_v22 = vpack.c.bf16 %v4397_v21, %v4396_v20 }
 0x583   : > { %6413 = vmatpush1.bf16.msra.mxu1 %v6412_v26  ;;  %v4399_v26 = vld [vmem:[%s9695_s11 + $0x28] sm:$0xff] }
 0x584   : > { %4139 = vmatprep.subr.mxu1 %v6583_v9  ;;  %v6475_v27 = vpack.c.bf16 %v4399_v26, %v4398_v24 }
 0x587   : > { %5333 = vmatpush1.msk.msra.mxu1 %vm1707_vm14, %v5332_v44  ;;  %vm4292_vm14 = vcmask 982016  }
 0x588   : > { %4160 = vmatmul.mubr.f32.vlgmr.msra.gmra.mrb[38].mxu1 %v4085_v31  ;;  %6447 = vmatprep.subr.bf16.mxu1 %v6581_v4 }
 0x589   : > { %5530 = vmatprep.mubr.msk.f32.mxu1 %vm6582_vm0, %v6583_v9  ;;  %6449 = vmatpush3.bf16.msra.mxu1 %v6448_v61  ;;  %v4401_v61 = vld [vmem:[%s9696_s12] sm:$0x1] }
 0x58a   : > { %6450 = vmatprep.subr.bf16.mxu1 %v6581_v4 }
 0x58d   : > { %6452 = vmatpush3.bf16.msra.mxu1 %v6451_v39 }
 0x58e   : > { %6453 = vmatprep.subr.bf16.mxu1 %v6581_v4 }
 0x591   : > { %6455 = vmatpush3.bf16.msra.mxu1 %v6454_v43 }
 0x592   : > { %6456 = vmatprep.subr.bf16.mxu1 %v6581_v4 }
 0x595   : > { %6458 = vmatpush3.bf16.msra.mxu1 %v6457_v51 }
 0x596   : > { %6459 = vmatprep.subr.bf16.mxu1 %v6581_v4 }
 0x599   : > { %6461 = vmatpush3.bf16.msra.mxu1 %v6460_v48 }
 0x59a   : > { %6462 = vmatprep.subr.bf16.mxu1 %v6581_v4 }
 0x59d   : > { %6464 = vmatpush3.bf16.msra.mxu1 %v6463_v56 }
 0x59e   : > { %6465 = vmatprep.subr.bf16.mxu1 %v6581_v4 }
 0x5a1   : > { %6467 = vmatpush3.bf16.msra.mxu1 %v6466_v62 }
 0x5a2   : > { %5528 = vmatprep.subr.mxu1 %v6583_v9 }
 0x5a5   : > { %5529 = vmatpush3.msra.mxu1 %v4316_v18 }
 0x5a6   : > { %6468 = vmatprep.subr.bf16.mxu1 %v6581_v4 }
 0x5fe   : > { %v3856_v46 = vpop.f32.mrb[34].mxu1 }
 0x5ff   : > { %v4046_v59 = vpop.f32.mrb[10].mxu0  ;;  %v3858_v63 = vpop.f32.mrb[35].mxu1 }
 0x600   : > { %v4048_v0 = vpop.f32.mrb[11].mxu0 }
 0x62c   : > { %v3932_v1 = vpop.f32.mrb[36].mxu1 }
 0x62d   : > { %v3933_v2 = vadd.f32 %v3932_v1, %v3856_v46  ;;  %v4276_v3 = vpop.f32.mrb[12].mxu0  ;;  %v3934_v5 = vpop.f32.mrb[37].mxu1 }
 0x62e   : > { %v4278_v7 = vpop.f32.mrb[13].mxu0 }
 0x62f   : > { %v4050_v57 = vadd.f32 %v4046_v59, %v3933_v2 }
 0x65b   : > { %v4161_v6 = vpop.f32.mrb[38].mxu1 }
 0x65c   : > { %v4165_v60 = vadd.f32 %v4161_v6, %v4050_v57  ;;  %v4163_v8 = vpop.f32.mrb[39].mxu1 }
 0x65e   : > { %v4280_v47 = vadd.f32 %v4276_v3, %v4165_v60 }
 0x660   : > { %v4288_v23 = vadd.f32 %v5360_v10, %v4280_v47 }
 0x662   : > { %vm4289_vm10 = vcmp.gt.f32.partialorder %v4288_v23, 0.0  ;;  %v4290_v25 = vmul.f32 0.3, %v4288_v23 }
 0x664   : > { %v4291_v37 = vsel %vm4289_vm10, %v4288_v23, %v4290_v25 }
 0x665   : > { %4293 = vst.msk [vmem:[#allocation5] sm:$0xff] %vm4292_vm14, %v4291_v37 }
 0x66c   : > { %v4294_v11 = vld [vmem:[#allocation5] sm:$0xff] }
 0x66d   : > { %v4295_v12 = vsel %vm4292_vm14, %v4294_v11, 0.0 }
 0x66e   : > { %v4296_v13 = vrot.slane %v4295_v12, 4 }
 0x670   : > { %v4297_v14 = vadd.f32 %v4296_v13, %v4295_v12 }
 0x672   : > { %v4298_v32 = vrot.slane %v4297_v14, 2 }
 0x674   : > { %v4299_v41 = vadd.f32 %v4298_v32, %v4297_v14 }
 0x676   : > { %v4300_v17 = vrot.slane %v4299_v41, 1 }
 0x678   : > { %v4301_v50 = vadd.f32 %v4300_v17, %v4299_v41 }
 0x67a   : > { %5531 = vmatmul.mubr.msk.f32.vlgmr.msra.gmra.mrb[40].mxu1 %vm4292_vm14, %v4301_v50 }
 0x67b   : > { %6470 = vmatpush3.bf16.msra.mxu1 %v6469_v19  ;;  %5547 = vmatprep.mubr.msk.f32.mxu1 %vm6582_vm0, %v6583_v9  ;;  %vm4406_vm0 = vcmask 1041408  }
 0x67c   : > { %6471 = vmatprep.subr.bf16.mxu1 %v6581_v4  ;;  %vm6479_vm5 = vmpackc.low %vm4406_vm0, %vm6584_vm15  ;;  %vm4563_vm15 = vcmask 0  }
 0x67f   : > { %6473 = vmatpush3.bf16.msra.mxu1 %v6472_v22 }
 0x680   : > { %6474 = vmatprep.subr.bf16.mxu1 %v6581_v4  ;;  %v4317_v4 = vld [vmem:[%s9694_s10] sm:$0x1] }
 0x683   : > { %6476 = vmatpush3.bf16.msra.mxu1 %v6475_v27 }
 0x684   : > { %5545 = vmatprep.subr.mxu1 %v6583_v9  ;;  %v4483_v9 = vld [vmem:[%s9697_s13] sm:$0xff] }
 0x685   : > { %v6478_v36 = vpack.c.bf16 %v4484_v35, %v4483_v9 }
 0x687   : > { %5546 = vmatpush3.msk.msra.mxu1 %vm4406_vm0, %v4400_v28  ;;  %6480 = vmatpush3.bf16.msk.msra.mxu0 %vm6479_vm5, %v6478_v36 }
 0x74d   : > { %v4387_v29 = vpop.f32.mrb[40].mxu1 }
 0x74e   : > { %v4388_v44 = vadd.f32 %v4387_v29, %v4317_v4  ;;  %v5532_v30 = vpop.f32.mrb[41].mxu1 }
 0x750   : > { %vm4391_vm2 = vcmp.gt.f32.partialorder %v4388_v44, 0.0  ;;  %v4392_v31 = vmul.f32 0.3, %v4388_v44 }
 0x752   : > { %v4393_v33 = vsel %vm4391_vm2, %v4388_v44, %v4392_v31 }
 0x753   : > { %5548 = vmatmul.mubr.msk.f32.vlgmr.msra.gmra.mrb[42].mxu1 %vm4402_vm4, %v4393_v33 }
 0x826   : > { %v4476_v38 = vpop.f32.mrb[42].mxu1 }
 0x827   : > { %v4477_v39 = vadd.f32 %v4476_v38, %v4401_v61  ;;  %v5549_v40 = vpop.f32.mrb[43].mxu1 }
 0x829   : > { %vm4480_vm6 = vcmp.gt.f32.partialorder %v4477_v39, 0.0  ;;  %v4481_v42 = vmul.f32 0.3, %v4477_v39 }
 0x82b   : > { %v4482_v43 = vsel %vm4480_vm6, %v4477_v39, %v4481_v42 }
 0x82c   : > { %5555 = vmatmul.mubr.msk.f32.vlgmr.msra.gmra.mrb[14].mxu0 %vm4486_vm7, %v4482_v43 }
 0x8ff   : > { %v4559_v49 = vpop.f32.mrb[14].mxu0 }
 0x900   : > { %v4560_v51 = vadd.f32 %v4559_v49, %v4485_v45  ;;  %v5556_v52 = vpop.f32.mrb[15].mxu0 }
 0x902   : > { %4564 = vst.msk [vmem:[%s492_s22] sm:$0x1] %vm4563_vm15, %v4560_v51 }
 0x903 PF: > { %s27_s20 = sadd.s32 1, %s6579_s20  }
 0x904   : > { %p24_p4 = scmp.ge.s32.totalorder %s27_s20, 4  }
 0x906   :  { %26 = sbr.rel (!%p24_p4) target bundleno = 3 (0x3), region = 126 }

</bundles_post_ra>
